<compile_context>
chip_gen: v7x
topology: tpu7x:2x2x1
jax: 0.10.0
libtpu: 0.0.40
codegen_flags: <defaults>
</compile_context>

<pallas_src>
import functools

import jax
import jax.numpy as jnp
import numpy as np
from jax import lax
from jax.experimental import pallas as pl
from jax.experimental.pallas import tpu as pltpu


def _round_up(x, m):
    return (x + m - 1) // m * m


def _im2col_3x3(a, oh, ow):
    """a: (>=oh+2, >=ow+2, C) spatial slab. Returns (oh*ow, 9*C) taps, (ky,kx,cin) order."""
    c = a.shape[-1]
    wslabs = [a[:, kx:kx + ow, :] for kx in range(3)]   # 3 width-shifted slabs
    cols = []
    for ky in range(3):
        for kx in range(3):
            cols.append(wslabs[kx][ky:ky + oh].reshape(oh * ow, c))
    return jnp.concatenate(cols, axis=-1)


def basic_block_kernel(x_ref, mask_ref, w1_ref, s1_ref, b1_ref,
                       w2_ref, s2_ref, b2_ref, out_ref, *, W, TH):
    Cp = x_ref.shape[-1]
    He = TH + 2                      # conv1 output rows needed (1-row halo for conv2)
    WE = _round_up(W + 2, 8)         # conv1 output cols (8-aligned, >= W+2)
    cdt = w1_ref.dtype               # MXU compute dtype (bf16 or f32)

    xt = x_ref[...]                                       # (TH+4, WE+2, Cp) tile + halo

    # ---- conv1 + bn1 + relu over the extended (He, WE) region: one MXU matmul -----
    taps1 = _im2col_3x3(xt.astype(cdt), He, WE)           # (He*WE, 9*Cp)
    y = jnp.dot(taps1, w1_ref[...], preferred_element_type=jnp.float32)
    y = jnp.maximum(y * s1_ref[...] + b1_ref[...], 0.0)
    # Zero everything outside the image: this IS conv2's zero padding at the boundary.
    y = y * mask_ref[...]

    # ---- conv2 + bn2 over the (TH, W) output tile: one MXU matmul ------------------
    y3 = y.astype(w2_ref.dtype).reshape(He, WE, Cp)
    taps2 = _im2col_3x3(y3, TH, W)                        # (TH*W, 9*Cp)
    z = jnp.dot(taps2, w2_ref[...], preferred_element_type=jnp.float32)
    z = z * s2_ref[...] + b2_ref[...]

    # ---- identity residual (downsample is None, ctx is None) + relu ----------------
    resid = x_ref[pl.ds(2, TH), pl.ds(2, W), :].astype(jnp.float32)
    out = jnp.maximum(z + resid.reshape(TH * W, Cp), 0.0)
    out_ref[...] = out.reshape(TH, W, Cp).astype(out_ref.dtype)


def _pick_tile_h(H, W, Cp, budget=8 * 1024 * 1024):
    """Largest divisor of H whose per-step working set stays under `budget` bytes."""
    WE = _round_up(W + 2, 8)
    for th in range(H, 0, -1):
        if H % th:
            continue
        he = th + 2
        byt = (he * WE * 9 * Cp * 2                 # conv1 tap slab (bf16)
               + th * W * 9 * Cp * 2                # conv2 tap slab (bf16)
               + 2 * (th + 4) * (WE + 2) * Cp * 4   # double-buffered x tile (f32)
               + he * WE * Cp * 4                   # y (f32)
               + 2 * th * W * Cp * 4)               # double-buffered out tile (f32)
        if byt <= budget:
            return th
    return 1


def basic_block_forward(x_nchw, w1, g1, be1, m1, v1, w2, g2, be2, m2, v2,
                        eps=1e-5, tile_h=None, compute_dtype=jnp.bfloat16):
    """x_nchw: (N, C, H, W). w1/w2: HWIO (3, 3, Cin, Cout). BN params: (Cout,)."""
    N, C, H, W = x_nchw.shape
    width = w1.shape[-1]
    assert C == width, "identity residual requires inplanes == width"
    # TODO(synk): BatchNorm is folded in eval mode (running stats); training-mode
    # batch statistics are not computed in-kernel.

    Cp = _round_up(max(C, 1), 128)            # lane-dense channel count
    if tile_h is None:
        tile_h = _pick_tile_h(H, W, Cp)
    assert H % tile_h == 0, "tile_h must divide H"
    TH, nT = tile_h, H // tile_h
    He, WE = TH + 2, _round_up(W + 2, 8)
    WX = WE + 2                               # padded input width

    # Fold eval-mode BN into per-channel scale / bias, zero-padded to Cp.
    def fold(g, be, m, v):
        inv = g / jnp.sqrt(v + eps)
        s = jnp.pad(inv, (0, Cp - width)).reshape(1, Cp).astype(jnp.float32)
        b = jnp.pad(be - m * inv, (0, Cp - width)).reshape(1, Cp).astype(jnp.float32)
        return s, b
    s1, b1 = fold(g1, be1, m1, v1)
    s2, b2 = fold(g2, be2, m2, v2)

    # Weights: HWIO -> zero-pad channels -> (9*Cp, Cp) in the MXU compute dtype.
    w1p = jnp.pad(w1, ((0, 0), (0, 0), (0, Cp - C), (0, Cp - width)))
    w1p = w1p.reshape(9 * Cp, Cp).astype(compute_dtype)
    w2p = jnp.pad(w2, ((0, 0), (0, 0), (0, Cp - width), (0, Cp - width)))
    w2p = w2p.reshape(9 * Cp, Cp).astype(compute_dtype)

    # NCHW -> NHWC; zero-pad 2 rows top/bottom, 2 cols left + enough right for an
    # 8-aligned conv1 output width, and channels up to Cp.
    x_nhwc = jnp.transpose(x_nchw, (0, 2, 3, 1))
    xp = jnp.pad(x_nhwc, ((0, 0), (2, 2), (2, WX - 2 - W), (0, Cp - C)))
    # Overlapping row tiles (4-row halo) so BlockSpec tiling stays rectangular.
    x_tiles = jnp.stack([xp[:, t * TH:t * TH + TH + 4] for t in range(nT)], axis=1)
    # x_tiles: (N, nT, TH+4, WX, Cp)

    # Per-tile 0/1 "inside the image" mask for conv1's extended output.
    rows = np.arange(nT)[:, None] * TH - 1 + np.arange(He)[None, :]      # (nT, He)
    cols = np.arange(WE) - 1                                             # (WE,)
    inside = (((rows >= 0) & (rows < H))[:, :, None]
              & ((cols >= 0) & (cols < W))[None, None, :])               # (nT, He, WE)
    mask = jnp.asarray(inside.reshape(nT, He * WE, 1).astype(np.float32))

    kernel = functools.partial(basic_block_kernel, W=W, TH=TH)
    out_tiles = pl.pallas_call(
        kernel,
        out_shape=jax.ShapeDtypeStruct((N, nT, TH, W, Cp), x_nchw.dtype),
        grid_spec=pltpu.PrefetchScalarGridSpec(
            num_scalar_prefetch=0,
            grid=(N, nT),
            in_specs=[
                pl.BlockSpec((None, None, TH + 4, WX, Cp),
                             lambda n, t: (n, t, 0, 0, 0)),
                pl.BlockSpec((None, He * WE, 1), lambda n, t: (t, 0, 0)),
                pl.BlockSpec((9 * Cp, Cp), lambda n, t: (0, 0)),
                pl.BlockSpec((1, Cp), lambda n, t: (0, 0)),
                pl.BlockSpec((1, Cp), lambda n, t: (0, 0)),
                pl.BlockSpec((9 * Cp, Cp), lambda n, t: (0, 0)),
                pl.BlockSpec((1, Cp), lambda n, t: (0, 0)),
                pl.BlockSpec((1, Cp), lambda n, t: (0, 0)),
            ],
            out_specs=pl.BlockSpec((None, None, TH, W, Cp),
                                   lambda n, t: (n, t, 0, 0, 0)),
        ),
        compiler_params=pltpu.CompilerParams(
            dimension_semantics=("parallel", "parallel"),
            vmem_limit_bytes=64 * 1024 * 1024),
    )(x_tiles, mask, w1p, s1, b1, w2p, s2, b2)

    out = out_tiles.reshape(N, H, W, Cp)[..., :C]
    return jnp.transpose(out, (0, 3, 1, 2))


def ref_forward(x_nchw, w1, g1, be1, m1, v1, w2, g2, be2, m2, v2, eps=1e-5):
    """Pure-JAX reference (NHWC convs), returns NCHW."""
    x = jnp.transpose(x_nchw, (0, 2, 3, 1))
    dn = ('NHWC', 'HWIO', 'NHWC')
    y = lax.conv_general_dilated(x, w1, (1, 1), ((1, 1), (1, 1)),
                                 dimension_numbers=dn)
    y = (y - m1) / jnp.sqrt(v1 + eps) * g1 + be1
    y = jnp.maximum(y, 0.0)
    y2 = lax.conv_general_dilated(y, w2, (1, 1), ((1, 1), (1, 1)),
                                  dimension_numbers=dn)
    y2 = (y2 - m2) / jnp.sqrt(v2 + eps) * g2 + be2
    out = jnp.maximum(y2 + x, 0.0)
    return jnp.transpose(out, (0, 3, 1, 2))


if __name__ == "__main__":
    key = jax.random.PRNGKey(0)
    N, C, H, W = 2, 4, 16, 16          # inplanes = planes = 4 -> width = 4
    width = C

    ks = jax.random.split(key, 11)
    x = jax.random.normal(ks[0], (N, C, H, W), jnp.float32)

    w1 = 0.1 * jax.random.normal(ks[1], (3, 3, C, width), jnp.float32)
    w2 = 0.1 * jax.random.normal(ks[2], (3, 3, width, width), jnp.float32)

    g1 = 1.0 + 0.1 * jax.random.normal(ks[3], (width,), jnp.float32)
    be1 = 0.1 * jax.random.normal(ks[4], (width,), jnp.float32)
    m1 = 0.1 * jax.random.normal(ks[5], (width,), jnp.float32)
    v1 = 0.5 + jnp.abs(jax.random.normal(ks[6], (width,), jnp.float32))

    g2 = 1.0 + 0.1 * jax.random.normal(ks[7], (width,), jnp.float32)
    be2 = 0.1 * jax.random.normal(ks[8], (width,), jnp.float32)
    m2 = 0.1 * jax.random.normal(ks[9], (width,), jnp.float32)
    v2 = 0.5 + jnp.abs(jax.random.normal(ks[10], (width,), jnp.float32))

    args = (x, w1, g1, be1, m1, v1, w2, g2, be2, m2, v2)
    ref = ref_forward(*args)

    # Structural check of the tiled / halo path at f32 MXU precision (tight tolerance).
    out_f32 = jax.block_until_ready(
        basic_block_forward(*args, tile_h=8, compute_dtype=jnp.float32))
    assert out_f32.shape == (N, C, H, W)
    np.testing.assert_allclose(np.asarray(out_f32), np.asarray(ref),
                               rtol=1e-4, atol=1e-4)

    # Optimized bf16-MXU path (looser tolerance for bf16 conv inputs), multi-tile.
    out_bf16 = jax.block_until_ready(basic_block_forward(*args, tile_h=8))
    np.testing.assert_allclose(np.asarray(out_bf16), np.asarray(ref),
                               rtol=5e-2, atol=5e-2)

    # bf16 with auto-selected tile height (single-tile path on this small shape).
    out_auto = jax.block_until_ready(basic_block_forward(*args))
    np.testing.assert_allclose(np.asarray(out_auto), np.asarray(ref),
                               rtol=5e-2, atol=5e-2)

    print("KERNEL_OK")
</pallas_src>

<mosaic_0001>
module attributes {stable_mosaic.version = 11 : i64} {
  func.func @basic_block_kernel(%arg0: i32, %arg1: i32, %arg2: memref<1x1x12x26x128xf32, #tpu.memory_space<vmem>>, %arg3: memref<1x240x1xf32, #tpu.memory_space<vmem>>, %arg4: memref<1152x128xf32, #tpu.memory_space<vmem>>, %arg5: memref<1x128xf32, #tpu.memory_space<vmem>>, %arg6: memref<1x128xf32, #tpu.memory_space<vmem>>, %arg7: memref<1152x128xf32, #tpu.memory_space<vmem>>, %arg8: memref<1x128xf32, #tpu.memory_space<vmem>>, %arg9: memref<1x128xf32, #tpu.memory_space<vmem>>, %arg10: memref<1x1x8x16x128xf32, #tpu.memory_space<vmem>>) attributes {dimension_semantics = [#tpu.dimension_semantics<parallel>, #tpu.dimension_semantics<parallel>], iteration_bounds = array<i64: 2, 2>, scalar_prefetch = 0 : i64, scratch_operands = 0 : i64, tpu.core_type = #tpu.core_type<tc>, window_params = [{transform_indices = @transform_0, window_bounds = array<i64: 1, 1, 12, 26, 128>}, {transform_indices = @transform_1, window_bounds = array<i64: 1, 240, 1>}, {pipeline_mode = #tpu.pipeline_mode<synchronous>, transform_indices = @transform_2, window_bounds = array<i64: 1152, 128>}, {pipeline_mode = #tpu.pipeline_mode<synchronous>, transform_indices = @transform_3, window_bounds = array<i64: 1, 128>}, {pipeline_mode = #tpu.pipeline_mode<synchronous>, transform_indices = @transform_4, window_bounds = array<i64: 1, 128>}, {pipeline_mode = #tpu.pipeline_mode<synchronous>, transform_indices = @transform_5, window_bounds = array<i64: 1152, 128>}, {pipeline_mode = #tpu.pipeline_mode<synchronous>, transform_indices = @transform_6, window_bounds = array<i64: 1, 128>}, {pipeline_mode = #tpu.pipeline_mode<synchronous>, transform_indices = @transform_7, window_bounds = array<i64: 1, 128>}, {transform_indices = @transform_8, window_bounds = array<i64: 1, 1, 8, 16, 128>}]} {
    %c0 = arith.constant 0 : index
    %c0_0 = arith.constant 0 : index
    %c0_1 = arith.constant 0 : index
    %c0_2 = arith.constant 0 : index
    %c0_3 = arith.constant 0 : index
    %0 = vector.load %arg2[%c0, %c0_0, %c0_1, %c0_2, %c0_3] : memref<1x1x12x26x128xf32, #tpu.memory_space<vmem>>, vector<1x1x12x26x128xf32>
    %1 = vector.shape_cast %0 : vector<1x1x12x26x128xf32> to vector<12x26x128xf32>
    %2 = vector.extract_strided_slice %1 {offsets = [0, 0, 0], sizes = [12, 24, 128], strides = [1, 1, 1]} : vector<12x26x128xf32> to vector<12x24x128xf32>
    %3 = vector.extract_strided_slice %1 {offsets = [0, 1, 0], sizes = [12, 24, 128], strides = [1, 1, 1]} : vector<12x26x128xf32> to vector<12x24x128xf32>
    %4 = vector.extract_strided_slice %1 {offsets = [0, 2, 0], sizes = [12, 24, 128], strides = [1, 1, 1]} : vector<12x26x128xf32> to vector<12x24x128xf32>
    %5 = vector.extract_strided_slice %2 {offsets = [0, 0, 0], sizes = [10, 24, 128], strides = [1, 1, 1]} : vector<12x24x128xf32> to vector<10x24x128xf32>
    %6 = vector.shape_cast %5 : vector<10x24x128xf32> to vector<240x128xf32>
    %7 = vector.extract_strided_slice %3 {offsets = [0, 0, 0], sizes = [10, 24, 128], strides = [1, 1, 1]} : vector<12x24x128xf32> to vector<10x24x128xf32>
    %8 = vector.shape_cast %7 : vector<10x24x128xf32> to vector<240x128xf32>
    %9 = vector.extract_strided_slice %4 {offsets = [0, 0, 0], sizes = [10, 24, 128], strides = [1, 1, 1]} : vector<12x24x128xf32> to vector<10x24x128xf32>
    %10 = vector.shape_cast %9 : vector<10x24x128xf32> to vector<240x128xf32>
    %11 = vector.extract_strided_slice %2 {offsets = [1, 0, 0], sizes = [10, 24, 128], strides = [1, 1, 1]} : vector<12x24x128xf32> to vector<10x24x128xf32>
    %12 = vector.shape_cast %11 : vector<10x24x128xf32> to vector<240x128xf32>
    %13 = vector.extract_strided_slice %3 {offsets = [1, 0, 0], sizes = [10, 24, 128], strides = [1, 1, 1]} : vector<12x24x128xf32> to vector<10x24x128xf32>
    %14 = vector.shape_cast %13 : vector<10x24x128xf32> to vector<240x128xf32>
    %15 = vector.extract_strided_slice %4 {offsets = [1, 0, 0], sizes = [10, 24, 128], strides = [1, 1, 1]} : vector<12x24x128xf32> to vector<10x24x128xf32>
    %16 = vector.shape_cast %15 : vector<10x24x128xf32> to vector<240x128xf32>
    %17 = vector.extract_strided_slice %2 {offsets = [2, 0, 0], sizes = [10, 24, 128], strides = [1, 1, 1]} : vector<12x24x128xf32> to vector<10x24x128xf32>
    %18 = vector.shape_cast %17 : vector<10x24x128xf32> to vector<240x128xf32>
    %19 = vector.extract_strided_slice %3 {offsets = [2, 0, 0], sizes = [10, 24, 128], strides = [1, 1, 1]} : vector<12x24x128xf32> to vector<10x24x128xf32>
    %20 = vector.shape_cast %19 : vector<10x24x128xf32> to vector<240x128xf32>
    %21 = vector.extract_strided_slice %4 {offsets = [2, 0, 0], sizes = [10, 24, 128], strides = [1, 1, 1]} : vector<12x24x128xf32> to vector<10x24x128xf32>
    %22 = vector.shape_cast %21 : vector<10x24x128xf32> to vector<240x128xf32>
    %23 = tpu.concatenate %6, %8, %10, %12, %14, %16, %18, %20, %22 in 1 : vector<240x128xf32>, vector<240x128xf32>, vector<240x128xf32>, vector<240x128xf32>, vector<240x128xf32>, vector<240x128xf32>, vector<240x128xf32>, vector<240x128xf32>, vector<240x128xf32> -> vector<240x1152xf32>
    %c0_4 = arith.constant 0 : index
    %c0_5 = arith.constant 0 : index
    %24 = vector.load %arg4[%c0_4, %c0_5] : memref<1152x128xf32, #tpu.memory_space<vmem>>, vector<1152x128xf32>
    %cst = arith.constant dense<0.000000e+00> : vector<240x128xf32>
    %25 = tpu.matmul %23, %24, %cst {dimension_numbers = #tpu.dot_dimension_numbers<[1], [0], [0], [1], [0, 0, 1, 1], [], []>} : vector<240x1152xf32>, vector<1152x128xf32>, vector<240x128xf32> -> vector<240x128xf32>
    %c0_6 = arith.constant 0 : index
    %c0_7 = arith.constant 0 : index
    %26 = vector.load %arg5[%c0_6, %c0_7] : memref<1x128xf32, #tpu.memory_space<vmem>>, vector<1x128xf32>
    %27 = vector.broadcast %26 : vector<1x128xf32> to vector<240x128xf32>
    %28 = arith.mulf %25, %27 : vector<240x128xf32>
    %c0_8 = arith.constant 0 : index
    %c0_9 = arith.constant 0 : index
    %29 = vector.load %arg6[%c0_8, %c0_9] : memref<1x128xf32, #tpu.memory_space<vmem>>, vector<1x128xf32>
    %30 = vector.broadcast %29 : vector<1x128xf32> to vector<240x128xf32>
    %31 = arith.addf %28, %30 : vector<240x128xf32>
    %cst_10 = arith.constant 0.000000e+00 : f32
    %32 = vector.broadcast %cst_10 : f32 to vector<240x128xf32>
    %33 = arith.maximumf %31, %32 : vector<240x128xf32>
    %c0_11 = arith.constant 0 : index
    %c0_12 = arith.constant 0 : index
    %c0_13 = arith.constant 0 : index
    %34 = vector.load %arg3[%c0_11, %c0_12, %c0_13] : memref<1x240x1xf32, #tpu.memory_space<vmem>>, vector<1x240x1xf32>
    %35 = vector.shape_cast %34 : vector<1x240x1xf32> to vector<240x1xf32>
    %36 = vector.broadcast %35 : vector<240x1xf32> to vector<240x128xf32>
    %37 = arith.mulf %33, %36 : vector<240x128xf32>
    %38 = vector.shape_cast %37 : vector<240x128xf32> to vector<10x24x128xf32>
    %39 = vector.extract_strided_slice %38 {offsets = [0, 0, 0], sizes = [10, 16, 128], strides = [1, 1, 1]} : vector<10x24x128xf32> to vector<10x16x128xf32>
    %40 = vector.extract_strided_slice %38 {offsets = [0, 1, 0], sizes = [10, 16, 128], strides = [1, 1, 1]} : vector<10x24x128xf32> to vector<10x16x128xf32>
    %41 = vector.extract_strided_slice %38 {offsets = [0, 2, 0], sizes = [10, 16, 128], strides = [1, 1, 1]} : vector<10x24x128xf32> to vector<10x16x128xf32>
    %42 = vector.extract_strided_slice %39 {offsets = [0, 0, 0], sizes = [8, 16, 128], strides = [1, 1, 1]} : vector<10x16x128xf32> to vector<8x16x128xf32>
    %43 = vector.shape_cast %42 : vector<8x16x128xf32> to vector<128x128xf32>
    %44 = vector.extract_strided_slice %40 {offsets = [0, 0, 0], sizes = [8, 16, 128], strides = [1, 1, 1]} : vector<10x16x128xf32> to vector<8x16x128xf32>
    %45 = vector.shape_cast %44 : vector<8x16x128xf32> to vector<128x128xf32>
    %46 = vector.extract_strided_slice %41 {offsets = [0, 0, 0], sizes = [8, 16, 128], strides = [1, 1, 1]} : vector<10x16x128xf32> to vector<8x16x128xf32>
    %47 = vector.shape_cast %46 : vector<8x16x128xf32> to vector<128x128xf32>
    %48 = vector.extract_strided_slice %39 {offsets = [1, 0, 0], sizes = [8, 16, 128], strides = [1, 1, 1]} : vector<10x16x128xf32> to vector<8x16x128xf32>
    %49 = vector.shape_cast %48 : vector<8x16x128xf32> to vector<128x128xf32>
    %50 = vector.extract_strided_slice %40 {offsets = [1, 0, 0], sizes = [8, 16, 128], strides = [1, 1, 1]} : vector<10x16x128xf32> to vector<8x16x128xf32>
    %51 = vector.shape_cast %50 : vector<8x16x128xf32> to vector<128x128xf32>
    %52 = vector.extract_strided_slice %41 {offsets = [1, 0, 0], sizes = [8, 16, 128], strides = [1, 1, 1]} : vector<10x16x128xf32> to vector<8x16x128xf32>
    %53 = vector.shape_cast %52 : vector<8x16x128xf32> to vector<128x128xf32>
    %54 = vector.extract_strided_slice %39 {offsets = [2, 0, 0], sizes = [8, 16, 128], strides = [1, 1, 1]} : vector<10x16x128xf32> to vector<8x16x128xf32>
    %55 = vector.shape_cast %54 : vector<8x16x128xf32> to vector<128x128xf32>
    %56 = vector.extract_strided_slice %40 {offsets = [2, 0, 0], sizes = [8, 16, 128], strides = [1, 1, 1]} : vector<10x16x128xf32> to vector<8x16x128xf32>
    %57 = vector.shape_cast %56 : vector<8x16x128xf32> to vector<128x128xf32>
    %58 = vector.extract_strided_slice %41 {offsets = [2, 0, 0], sizes = [8, 16, 128], strides = [1, 1, 1]} : vector<10x16x128xf32> to vector<8x16x128xf32>
    %59 = vector.shape_cast %58 : vector<8x16x128xf32> to vector<128x128xf32>
    %60 = tpu.concatenate %43, %45, %47, %49, %51, %53, %55, %57, %59 in 1 : vector<128x128xf32>, vector<128x128xf32>, vector<128x128xf32>, vector<128x128xf32>, vector<128x128xf32>, vector<128x128xf32>, vector<128x128xf32>, vector<128x128xf32>, vector<128x128xf32> -> vector<128x1152xf32>
    %c0_14 = arith.constant 0 : index
    %c0_15 = arith.constant 0 : index
    %61 = vector.load %arg7[%c0_14, %c0_15] : memref<1152x128xf32, #tpu.memory_space<vmem>>, vector<1152x128xf32>
    %cst_16 = arith.constant dense<0.000000e+00> : vector<128x128xf32>
    %62 = tpu.matmul %60, %61, %cst_16 {dimension_numbers = #tpu.dot_dimension_numbers<[1], [0], [0], [1], [0, 0, 1, 1], [], []>} : vector<128x1152xf32>, vector<1152x128xf32>, vector<128x128xf32> -> vector<128x128xf32>
    %c0_17 = arith.constant 0 : index
    %c0_18 = arith.constant 0 : index
    %63 = vector.load %arg8[%c0_17, %c0_18] : memref<1x128xf32, #tpu.memory_space<vmem>>, vector<1x128xf32>
    %64 = vector.broadcast %63 : vector<1x128xf32> to vector<128x128xf32>
    %65 = arith.mulf %62, %64 : vector<128x128xf32>
    %c0_19 = arith.constant 0 : index
    %c0_20 = arith.constant 0 : index
    %66 = vector.load %arg9[%c0_19, %c0_20] : memref<1x128xf32, #tpu.memory_space<vmem>>, vector<1x128xf32>
    %67 = vector.broadcast %66 : vector<1x128xf32> to vector<128x128xf32>
    %68 = arith.addf %65, %67 : vector<128x128xf32>
    %c0_21 = arith.constant 0 : index
    %c0_22 = arith.constant 0 : index
    %c2 = arith.constant 2 : index
    %c2_23 = arith.constant 2 : index
    %c0_24 = arith.constant 0 : index
    %69 = vector.load %arg2[%c0_21, %c0_22, %c2, %c2_23, %c0_24] : memref<1x1x12x26x128xf32, #tpu.memory_space<vmem>>, vector<1x1x8x16x128xf32>
    %70 = vector.shape_cast %69 : vector<1x1x8x16x128xf32> to vector<8x16x128xf32>
    %71 = vector.shape_cast %70 : vector<8x16x128xf32> to vector<128x128xf32>
    %72 = arith.addf %68, %71 : vector<128x128xf32>
    %cst_25 = arith.constant 0.000000e+00 : f32
    %73 = vector.broadcast %cst_25 : f32 to vector<128x128xf32>
    %74 = arith.maximumf %72, %73 : vector<128x128xf32>
    %75 = vector.shape_cast %74 : vector<128x128xf32> to vector<8x16x128xf32>
    %c0_26 = arith.constant 0 : index
    %c0_27 = arith.constant 0 : index
    %c0_28 = arith.constant 0 : index
    %c0_29 = arith.constant 0 : index
    %c0_30 = arith.constant 0 : index
    %76 = vector.load %arg10[%c0_26, %c0_27, %c0_28, %c0_29, %c0_30] : memref<1x1x8x16x128xf32, #tpu.memory_space<vmem>>, vector<1x1x8x16x128xf32>
    %77 = vector.shape_cast %76 : vector<1x1x8x16x128xf32> to vector<8x16x128xf32>
    %78 = vector.shape_cast %75 : vector<8x16x128xf32> to vector<1x1x8x16x128xf32>
    tpu.vector_store %arg10[%c0_26, %c0_27, %c0_28, %c0_29, %c0_30], %78 {strides = array<i32>} : memref<1x1x8x16x128xf32, #tpu.memory_space<vmem>>, vector<1x1x8x16x128xf32>,
    return
  }
  func.func @transform_0(%arg0: i32, %arg1: i32) -> (i32, i32, i32, i32, i32) {
    %c0_i32 = arith.constant 0 : i32
    %c0_i32_0 = arith.constant 0 : i32
    %c0_i32_1 = arith.constant 0 : i32
    %c0_i32_2 = arith.constant 0 : i32
    return %arg0, %arg1, %c0_i32, %c0_i32_0, %c0_i32_1 : i32, i32, i32, i32, i32
  }
  func.func @transform_1(%arg0: i32, %arg1: i32) -> (i32, i32, i32) {
    %c0_i32 = arith.constant 0 : i32
    %c0_i32_0 = arith.constant 0 : i32
    %c0_i32_1 = arith.constant 0 : i32
    return %arg1, %c0_i32, %c0_i32_0 : i32, i32, i32
  }
  func.func @transform_2(%arg0: i32, %arg1: i32) -> (i32, i32) {
    %c0_i32 = arith.constant 0 : i32
    %c0_i32_0 = arith.constant 0 : i32
    %c0_i32_1 = arith.constant 0 : i32
    return %c0_i32, %c0_i32_0 : i32, i32
  }
  func.func @transform_3(%arg0: i32, %arg1: i32) -> (i32, i32) {
    %c0_i32 = arith.constant 0 : i32
    %c0_i32_0 = arith.constant 0 : i32
    %c0_i32_1 = arith.constant 0 : i32
    return %c0_i32, %c0_i32_0 : i32, i32
  }
  func.func @transform_4(%arg0: i32, %arg1: i32) -> (i32, i32) {
    %c0_i32 = arith.constant 0 : i32
    %c0_i32_0 = arith.constant 0 : i32
    %c0_i32_1 = arith.constant 0 : i32
    return %c0_i32, %c0_i32_0 : i32, i32
  }
  func.func @transform_5(%arg0: i32, %arg1: i32) -> (i32, i32) {
    %c0_i32 = arith.constant 0 : i32
    %c0_i32_0 = arith.constant 0 : i32
    %c0_i32_1 = arith.constant 0 : i32
    return %c0_i32, %c0_i32_0 : i32, i32
  }
  func.func @transform_6(%arg0: i32, %arg1: i32) -> (i32, i32) {
    %c0_i32 = arith.constant 0 : i32
    %c0_i32_0 = arith.constant 0 : i32
    %c0_i32_1 = arith.constant 0 : i32
    return %c0_i32, %c0_i32_0 : i32, i32
  }
  func.func @transform_7(%arg0: i32, %arg1: i32) -> (i32, i32) {
    %c0_i32 = arith.constant 0 : i32
    %c0_i32_0 = arith.constant 0 : i32
    %c0_i32_1 = arith.constant 0 : i32
    return %c0_i32, %c0_i32_0 : i32, i32
  }
  func.func @transform_8(%arg0: i32, %arg1: i32) -> (i32, i32, i32, i32, i32) {
    %c0_i32 = arith.constant 0 : i32
    %c0_i32_0 = arith.constant 0 : i32
    %c0_i32_1 = arith.constant 0 : i32
    %c0_i32_2 = arith.constant 0 : i32
    return %arg0, %arg1, %c0_i32, %c0_i32_0, %c0_i32_1 : i32, i32, i32, i32, i32
  }
}

</mosaic_0001>

<bundles_post_ra>
// kernel: tpu_custom_call.1
= control target key start
LH: loop header
LB: loop body
LE: loop exit
PB: predicated region body
PF: predicated region fallthrough
CT: control target
= control target key end

     0   :  { %s7749_s0 = inlined_call_operand.hbm [shape: f32[2,2,12,26,128], index: 0, kind: input, shape index: {}]   ;;  %s7750_s1 = inlined_call_operand.hbm [shape: f32[2,240,1], index: 1, kind: input, shape index: {}]   ;;  %s7751_s2 = inlined_call_operand.hbm [shape: f32[1152,128], index: 2, kind: input, shape index: {}]   ;;  %s7752_s3 = inlined_call_operand.hbm [shape: f32[1,128], index: 3, kind: input, shape index: {}]   ;;  %s7753_s4 = inlined_call_operand.hbm [shape: f32[1,128], index: 4, kind: input, shape index: {}]   ;;  %s7754_s5 = inlined_call_operand.hbm [shape: f32[1152,128], index: 5, kind: input, shape index: {}]   ;;  %s7755_s6 = inlined_call_operand.hbm [shape: f32[1,128], index: 6, kind: input, shape index: {}]   ;;  %s7756_s7 = inlined_call_operand.hbm [shape: f32[1,128], index: 7, kind: input, shape index: {}]   ;;  %s7757_s8 = inlined_call_operand.hbm [shape: f32[2,2,8,16,128], index: 8, kind: output, shape index: {}]  }
   0x1   :  { %7832 = sst [smem:[#allocation70_spill]] %s7749_s0 }
   0x2   :  { %7833 = sst [smem:[#allocation71_spill]] %s7750_s1 }
   0x3   :  { %7834 = sst [smem:[#allocation72_spill]] %s7751_s2 }
   0x4   :  { %7835 = sst [smem:[#allocation73_spill]] %s7752_s3 }
   0x5   :  { %7836 = sst [smem:[#allocation74_spill]] %s7753_s4 }
   0x6   :  { %7837 = sst [smem:[#allocation75_spill]] %s7754_s5 }
   0x7   :  { %7838 = sst [smem:[#allocation76_spill]] %s7755_s6 }
   0x8   :  { %7839 = sst [smem:[#allocation77_spill]] %s7756_s7 }
   0x9   :  { %7840 = sst [smem:[#allocation78_spill]] %s7757_s8 }
   0xa   :  { %13 = vsyncpa [#allocation3], 0 }
   0xb   :  { %15 = vsyncpa [#allocation3 + $0x1], 0 }
   0xc   :  { %16 = vsyncpa [#allocation6], 0 }
   0xd   :  { %18 = vsyncpa [#allocation6 + $0x1], 0 }
   0xe   :  { %19 = vsyncpa [#allocation9], 0 }
   0xf   :  { %20 = vsyncpa [#allocation12], 0 }
  0x10   :  { %21 = vsyncpa [#allocation15], 0 }
  0x11   :  { %22 = vsyncpa [#allocation4], 0 }
  0x12   :  { %24 = vsyncpa [#allocation4 + $0x1], 0  ;;  %s5458_s27 = smov 0   ;;  %s5460_s28 = smov 0  }
  0x13   :  { %s5462_s29 = smov 0   ;;  %s5464_s30 = smov 0  }
  0x14   :  { %s5466_s9 = smov 0   ;;  %s5468_s10 = smov 0  }
  0x15   :  { %s5470_s11 = smov 0   ;;  %s5472_s12 = smov 0  }
  0x16   :  { %s5474_s13 = smov 0   ;;  %s5476_s14 = smov 0  }
  0x17   :  { %s5478_s15 = smov 0  }
  0x18 LB: > { %7841 = sst [smem:[#allocation24_spill]] %s5356_s27  ;;  %s5514_s16 = sadd.s32 4294967295, %s5396_s15   ;;  %s5396_s15 = sphi %s5478_s15, %s30_s15   ;;  %s5392_s14 = sphi %s5476_s14, %s8017_s14   ;;  %s5388_s13 = sphi %s5474_s13, %s8016_s13   ;;  %s5384_s12 = sphi %s5472_s12, %s8015_s12   ;;  %s5380_s11 = sphi %s5470_s11, %s8014_s11   ;;  %s5376_s10 = sphi %s5468_s10, %s8013_s10   ;;  %s5372_s9 = sphi %s5466_s9, %s8012_s9   ;;  %s5368_s30 = sphi %s5464_s30, %s8011_s30   ;;  %s5364_s29 = sphi %s5462_s29, %s8010_s29   ;;  %s5360_s28 = sphi %s5460_s28, %s8009_s28   ;;  %s5356_s27 = sphi %s5458_s27, %s8007_s27  }
  0x19   : > { %7842 = sst [smem:[#allocation25_spill]] %s5360_s28  ;;  %p3670_p0 = scmp.ge.s32.totalorder %s5396_s15, 1 }
  0x1a   : > { %7843 = sst [smem:[#allocation26_spill]] %s5380_s11  ;;  %p7762_p1 = scmp.eq.s32.totalorder %s5514_s16, 0 }
  0x1b   : > { %7844 = sst [smem:[#allocation27_spill]] %s5384_s12  ;;  %p255_p2 = scmp.lt.s32.totalorder %s5396_s15, 5 }
  0x1c   : > { %s5398_s18 = smov [#allocation7]   ;;  %s5399_s21 = smov [#allocation8]  }
  0x1d   : > { %p5519_p3 = pnand %p3670_p0, %p255_p2  ;;  %s267_s19 = sshll.u32 %s5398_s18, 4  ;;  %s5523_s19 = int_to_ptr.vmem [resolvable:$true] %s267_s19 }
  0x1e   : > { %s281_s22 = sshll.u32 %s5399_s21, 4  ;;  %s5400_s23 = smov [#allocation11]   ;;  %s5533_s22 = int_to_ptr.vmem [resolvable:$true] %s281_s22 }
  0x1f   : > { %s7845_s17 = scalar_select %p5519_p3, 1, 0 }
  0x20   : > { %p4862_p4 = pneg %p5519_p3  ;;  %s5535_s24 = sshll.u32 %s5400_s23, 4  ;;  %s303_s24 = int_to_ptr.vmem [resolvable:$true] %s5535_s24 }
  0x21   : > { %7846 = sst [smem:[#allocation28_spill]] %s7845_s17  ;;  %s7848_s2 = sld [smem:[#allocation72_spill]] }
  0x22   : > { %p5529_p5 = pnand %p4862_p4, %p7762_p1 }
  0x24   : > { %p5545_p7 = pneg %p5529_p5 }
  0x27   : > { %s5026_s18 = scalar_lea.hbm %s7848_s2, 18432 }
  0x28   : > { %p5027_p6 = scmp.ne.s32.totalorder %s7848_s2, %s5026_s18  ;;  %p5033_p10 = scmp.lt.u32.totalorder %s5026_s18, %s7848_s2 }
  0x2a   : > { %p5029_p8 = pnand %p5545_p7, %p5027_p6 }
  0x2c   : > { %p5030_p9 = pneg %p5029_p8 }
  0x2e   : > { %p5035_p11 = pnand %p5033_p10, %p5030_p9 }
  0x30   : > { %5038 = shalt.err (!%p5035_p11)
}
  0x31   : > { %s5039_s8 = scalar_lea.vmem %s5523_s19, 18432  ;;  %p5047_p2 = scmp.lt.s32.totalorder %s5523_s19, %s5523_s19 }
  0x32   : > { %p5040_p12 = scmp.ne.s32.totalorder %s5523_s19, %s5039_s8  ;;  %p5048_p4 = scmp.lt.s32.totalorder %s5039_s8, %s5039_s8 }
  0x34   : > { %p5042_p13 = pnand %p5040_p12, %p5545_p7  ;;  %p5049_p6 = por %p5048_p4, %p5047_p2 }
  0x36   : > { %p5043_p0 = pneg %p5042_p13 }
  0x38   : > { %p5050_p8 = pnand %p5049_p6, %p5043_p0 }
  0x3a   : > { %5053 = shalt.err (!%p5050_p8)
}
  0x3b   : > { %s7764_s12 = smov 128   ;;  %s7766_s25 = smov 8  }
  0x3c   : > { %4865 = dma.hbm_to_vmem [thread:$0]  (!%p5529_p5), %s7848_s2, 18432, %s5523_s19, [#allocation6], %s7764_s12, %s7764_s12, %s7766_s25  }
  0x3d   : > { %s7850_s3 = sld [smem:[#allocation73_spill]] }
  0x43   : > { %s5054_s8 = scalar_lea.hbm %s7850_s3, 16 }
  0x44   : > { %p5055_p9 = scmp.ne.s32.totalorder %s7850_s3, %s5054_s8  ;;  %p5061_p12 = scmp.lt.u32.totalorder %s5054_s8, %s7850_s3 }
  0x46   : > { %p5057_p10 = pnand %p5055_p9, %p5545_p7 }
  0x48   : > { %p5058_p11 = pneg %p5057_p10 }
  0x4a   : > { %p5063_p13 = pnand %p5061_p12, %p5058_p11 }
  0x4c   : > { %5066 = shalt.err (!%p5063_p13)
}
  0x4d   : > { %s5067_s19 = scalar_lea.vmem %s5533_s22, 16  ;;  %s5074_s1 = scalar_lea.vmem %s5533_s22, 32 }
  0x4e   : > { %p5068_p0 = scmp.ne.s32.totalorder %s5533_s22, %s5067_s19  ;;  %p5075_p6 = scmp.lt.s32.totalorder %s5533_s22, %s5533_s22 }
  0x4f   : > { %p5076_p8 = scmp.lt.s32.totalorder %s5074_s1, %s5067_s19 }
  0x50   : > { %p5070_p2 = pnand %p5068_p0, %p5545_p7 }
  0x51   : > { %p5077_p9 = por %p5076_p8, %p5075_p6 }
  0x52   : > { %p5071_p4 = pneg %p5070_p2 }
  0x54   : > { %p5078_p10 = pnand %p5077_p9, %p5071_p4 }
  0x56   : > { %5081 = shalt.err (!%p5078_p10)
}
  0x57   : > { %4868 = dma.hbm_to_vmem [thread:$0]  (!%p5529_p5), %s7850_s3, 16, %s5533_s22, [#allocation9]  }
  0x58   : > { %s7851_s5 = sld [smem:[#allocation75_spill]] }
  0x5e   : > { %s5082_s18 = scalar_lea.hbm %s7851_s5, 18432 }
  0x5f   : > { %p5083_p11 = scmp.ne.s32.totalorder %s7851_s5, %s5082_s18  ;;  %p5089_p0 = scmp.lt.u32.totalorder %s5082_s18, %s7851_s5 }
  0x61   : > { %p5085_p12 = pnand %p5083_p11, %p5545_p7 }
  0x63   : > { %p5086_p13 = pneg %p5085_p12 }
  0x65   : > { %p5091_p2 = pnand %p5089_p0, %p5086_p13 }
  0x67   : > { %5094 = shalt.err (!%p5091_p2)
}
  0x68   : > { %s5095_s1 = scalar_lea.vmem %s303_s24, 18432  ;;  %p5103_p9 = scmp.lt.s32.totalorder %s303_s24, %s303_s24 }
  0x69   : > { %p5096_p4 = scmp.ne.s32.totalorder %s303_s24, %s5095_s1  ;;  %p5104_p10 = scmp.lt.s32.totalorder %s5095_s1, %s5095_s1 }
  0x6b   : > { %p5098_p6 = pnand %p5096_p4, %p5545_p7  ;;  %p5105_p1 = por %p5104_p10, %p5103_p9 }
  0x6d   : > { %p5099_p8 = pneg %p5098_p6 }
  0x6f   : > { %p5106_p3 = pnand %p5105_p1, %p5099_p8 }
  0x71   : > { %5109 = shalt.err (!%p5106_p3)
}
  0x72   : > { %4874 = dma.hbm_to_vmem [thread:$0]  (!%p5529_p5), %s7851_s5, 18432, %s303_s24, [#allocation12], %s7764_s12, %s7764_s12, %s7766_s25  }
  0x73   : > { %s5403_s28 = smov [#allocation10]   ;;  %s5404_s26 = smov [#allocation13]  }
  0x74   : > { %s292_s17 = sshll.u32 %s5403_s28, 4  ;;  %s316_s18 = sshll.u32 %s5404_s26, 4  ;;  %s293_s17 = int_to_ptr.vmem [resolvable:$true] %s292_s17  ;;  %s317_s18 = int_to_ptr.vmem [resolvable:$true] %s316_s18 }
  0x75   : > { %s7852_s4 = sld [smem:[#allocation74_spill]] }
  0x7b   : > { %s5110_s8 = scalar_lea.hbm %s7852_s4, 16 }
  0x7c   : > { %p5111_p1 = scmp.ne.s32.totalorder %s7852_s4, %s5110_s8  ;;  %p5117_p12 = scmp.lt.u32.totalorder %s5110_s8, %s7852_s4 }
  0x7e   : > { %p5113_p3 = pnand %p5111_p1, %p5545_p7 }
  0x80   : > { %p5114_p11 = pneg %p5113_p3 }
  0x82   : > { %p5119_p13 = pnand %p5117_p12, %p5114_p11 }
  0x84   : > { %5122 = shalt.err (!%p5119_p13)
}
  0x85   : > { %s5123_s24 = scalar_lea.vmem %s293_s17, 16  ;;  %s5130_s27 = scalar_lea.vmem %s293_s17, 32 }
  0x86   : > { %p5124_p0 = scmp.ne.s32.totalorder %s293_s17, %s5123_s24  ;;  %p5131_p6 = scmp.lt.s32.totalorder %s293_s17, %s293_s17 }
  0x87   : > { %p5132_p8 = scmp.lt.s32.totalorder %s5130_s27, %s5123_s24 }
  0x88   : > { %p5126_p2 = pnand %p5124_p0, %p5545_p7 }
  0x89   : > { %p5133_p9 = por %p5132_p8, %p5131_p6 }
  0x8a   : > { %p5127_p4 = pneg %p5126_p2 }
  0x8c   : > { %p5134_p10 = pnand %p5133_p9, %p5127_p4 }
  0x8e   : > { %5137 = shalt.err (!%p5134_p10)
}
  0x8f   : > { %4871 = dma.hbm_to_vmem [thread:$0]  (!%p5529_p5), %s7852_s4, 16, %s293_s17, [#allocation9]  }
  0x90   : > { %s7853_s6 = sld [smem:[#allocation76_spill]] }
  0x96   : > { %s5138_s23 = scalar_lea.hbm %s7853_s6, 16 }
  0x97   : > { %p5139_p1 = scmp.ne.s32.totalorder %s7853_s6, %s5138_s23  ;;  %p5145_p12 = scmp.lt.u32.totalorder %s5138_s23, %s7853_s6 }
  0x99   : > { %p5141_p3 = pnand %p5139_p1, %p5545_p7 }
  0x9b   : > { %p5142_p11 = pneg %p5141_p3 }
  0x9d   : > { %p5147_p13 = pnand %p5145_p12, %p5142_p11 }
  0x9f   : > { %5150 = shalt.err (!%p5147_p13)
}
  0xa0   : > { %s5151_s24 = scalar_lea.vmem %s317_s18, 16  ;;  %s5158_s17 = scalar_lea.vmem %s317_s18, 32 }
  0xa1   : > { %p5152_p0 = scmp.ne.s32.totalorder %s317_s18, %s5151_s24  ;;  %p5159_p6 = scmp.lt.s32.totalorder %s317_s18, %s317_s18 }
  0xa2   : > { %p5160_p8 = scmp.lt.s32.totalorder %s5158_s17, %s5151_s24 }
  0xa3   : > { %p5154_p2 = pnand %p5152_p0, %p5545_p7 }
  0xa4   : > { %p5161_p9 = por %p5160_p8, %p5159_p6 }
  0xa5   : > { %p5155_p4 = pneg %p5154_p2 }
  0xa7   : > { %p5162_p10 = pnand %p5161_p9, %p5155_p4 }
  0xa9   : > { %5165 = shalt.err (!%p5162_p10)
}
  0xaa   : > { %4877 = dma.hbm_to_vmem [thread:$0]  (!%p5529_p5), %s7853_s6, 16, %s317_s18, [#allocation12]  }
  0xab   : > { %s5405_s26 = smov [#allocation14]   ;;  %s7854_s7 = sld [smem:[#allocation77_spill]] }
  0xac   : > { %s327_s2 = sshll.u32 %s5405_s26, 4  ;;  %s328_s2 = int_to_ptr.vmem [resolvable:$true] %s327_s2 }
  0xb1   : > { %s5166_s8 = scalar_lea.hbm %s7854_s7, 16 }
  0xb2   : > { %p5167_p1 = scmp.ne.s32.totalorder %s7854_s7, %s5166_s8  ;;  %p5173_p12 = scmp.lt.u32.totalorder %s5166_s8, %s7854_s7 }
  0xb4   : > { %p5169_p3 = pnand %p5167_p1, %p5545_p7 }
  0xb6   : > { %p5170_p11 = pneg %p5169_p3 }
  0xb8   : > { %p5175_p13 = pnand %p5173_p12, %p5170_p11 }
  0xba   : > { %5178 = shalt.err (!%p5175_p13)
}
  0xbb   : > { %s5179_s18 = scalar_lea.vmem %s328_s2, 16  ;;  %s5186_s17 = scalar_lea.vmem %s328_s2, 32 }
  0xbc   : > { %p5180_p0 = scmp.ne.s32.totalorder %s328_s2, %s5179_s18  ;;  %p5187_p6 = scmp.lt.s32.totalorder %s328_s2, %s328_s2 }
  0xbd   : > { %p5188_p8 = scmp.lt.s32.totalorder %s5186_s17, %s5179_s18 }
  0xbe   : > { %p5182_p2 = pnand %p5180_p0, %p5545_p7 }
  0xbf   : > { %p5189_p9 = por %p5188_p8, %p5187_p6 }
  0xc0   : > { %p5183_p4 = pneg %p5182_p2 }
  0xc2   : > { %p5190_p10 = pnand %p5189_p9, %p5183_p4 }
  0xc4   : > { %5193 = shalt.err (!%p5190_p10)
}
  0xc5   : > { %4880 = dma.hbm_to_vmem [thread:$0]  (!%p5529_p5), %s7854_s7, 16, %s328_s2, [#allocation15]  }
  0xc6   : > { %s3669_s11 = sadd.s32 4294967294, %s5396_s15   ;;  %s39_s20 = sadd.s32 1, %s5388_s13 }
  0xc7   : > { %p40_p7 = scmp.ge.s32.totalorder %s39_s20, 2  ;;  %s42_s26 = sadd.s32 1, %s5392_s14 }
  0xc8   : > { %s51_s21 = sadd.s32 1, %s5376_s10  ;;  %p58_p1 = scmp.ne.s32.totalorder %s5376_s10, %s5372_s9 }
  0xc9   : > { %s8019_s20 = smov (%p40_p7, %s39_s20), 0  ;;  %s8021_s26 = smov (!%p40_p7, %s42_s26), %s5392_s14 }
  0xca   : > { %s5680_s23 = ssub.s32 %s5388_s13, %s8019_s20  ;;  %p7769_p5 = scmp.eq.s32.totalorder %s5396_s15, 0 }
  0xcb   : > { %p44_p3 = scmp.ge.s32.totalorder %s8021_s26, 2  ;;  %p64_p11 = scmp.ne.s32.totalorder %s5372_s9, %s5368_s30 }
  0xcc   : > { %p5690_p12 = por %p7769_p5, %p58_p1  ;;  %p7857_p0 = scmp.eq.s32.totalorder %s5514_s16, 0 }
  0xcd   : > { %s8023_s26 = smov (%p44_p3, %s8021_s26), 0  ;;  %p242_p4 = scmp.eq.s32.totalorder %s5514_s16, 3 }
  0xce   : > { %7856 = sst [smem:[#allocation29_spill]] %s8023_s26  ;;  %p5699_p2 = por %p7857_p0, %p64_p11 }
  0xcf   : > { %s46_s19 = ssub.s32 %s5392_s14, %s8023_s26  ;;  %p248_p6 = scmp.eq.s32.totalorder %s3669_s11, 3 }
  0xd0   : > { %s48_s1 = sor.u32 %s5680_s23, %s46_s19  ;;  %p5710_p8 = por %p242_p4, %p58_p1 }
  0xd1   : > { %p49_p9 = scmp.eq.s32.totalorder %s48_s1, 0  ;;  %p5714_p10 = por %p248_p6, %p64_p11 }
  0xd2   : > { %s7859_s22 = scalar_select %p5710_p8, 1, 0 }
  0xd3   : > { %s7860_s24 = scalar_select %p5714_p10, 1, 0 }
  0xd4   : > { %p7768_p7 = scmp.lt.s32.totalorder %s5396_s15, 4  ;;  %s338_s18 = sand.u32 1, %s5376_s10  }
  0xd5   : > { %s5721_s17 = scalar_select %p49_p9, %s5376_s10, %s51_s21  }
  0xd6   : > { %s4825_s27 = smul.u32 384, %s338_s18  ;;  %p5728_p3 = pnand %p7768_p7, %p5690_p12 }
  0xd7   : > { %s4826_s28 = smul.u32 48, %s5388_s13  ;;  %s7862_s0 = sld [smem:[#allocation70_spill]] }
  0xd8   : > { %s4827_s19 = smul.u32 96, %s5392_s14  ;;  %s342_s1 = scalar_lea.vmem [#allocation2], %s4825_s27 }
  0xd9   : > { %s351_s12 = sshll.u32 %s342_s1, 4  ;;  %s5740_s2 = scalar_lea.sflag [#allocation3], %s338_s18  ;;  %s5733_s12 = int_to_ptr.vmem [resolvable:$true] %s351_s12 }
  0xda   : > { %s348_s25 = sadd.s32 %s4827_s19, %s4826_s28  ;;  %p5196_p11 = pneg %p5728_p3 }
  0xdb   : > { %s3678_s3 = sshll.u32 %s348_s25, 7 }
  0xdd   : > { %s5738_s5 = scalar_lea.hbm %s7862_s0, %s3678_s3  ;;  %s5199_s4 = scalar_lea.hbm %s7862_s0, 24576 }
  0xde   : > { %s5194_s6 = scalar_lea.hbm %s5738_s5, 6144  ;;  %p5200_p4 = scmp.lt.u32.totalorder %s5738_s5, %s7862_s0 }
  0xdf   : > { %p5195_p1 = scmp.ne.s32.totalorder %s5738_s5, %s5194_s6  ;;  %p5201_p6 = scmp.lt.u32.totalorder %s5199_s4, %s5194_s6 }
  0xe0   : > { %p5203_p7 = scmp.lt.u32.totalorder %s5194_s6, %s5738_s5 }
  0xe1   : > { %p5197_p12 = pnand %p5196_p11, %p5195_p1  ;;  %p5202_p9 = por %p5201_p6, %p5200_p4 }
  0xe3   : > { %p5198_p0 = pneg %p5197_p12  ;;  %p5204_p5 = por %p5203_p7, %p5202_p9 }
  0xe5   : > { %p5205_p13 = pnand %p5204_p5, %p5198_p0 }
  0xe7   : > { %5208 = shalt.err (!%p5205_p13)
}
  0xe8   : > { %s5209_s18 = scalar_lea.vmem %s5733_s12, 6144  ;;  %s5406_s19 = smov [#allocation2]  }
  0xe9   : > { %p5210_p1 = scmp.ne.s32.totalorder %s5733_s12, %s5209_s18  ;;  %s5214_s1 = sshll.u32 %s5406_s19, 4  ;;  %s5215_s1 = int_to_ptr.vmem [resolvable:$false] %s5214_s1 }
  0xea   : > { %s5216_s21 = scalar_lea.vmem %s5215_s1, 12288  ;;  %p5217_p8 = scmp.lt.s32.totalorder %s5733_s12, %s5215_s1 }
  0xeb   : > { %p5212_p12 = pnand %p5210_p1, %p5196_p11  ;;  %p5218_p4 = scmp.lt.s32.totalorder %s5216_s21, %s5209_s18 }
  0xed   : > { %p5213_p10 = pneg %p5212_p12  ;;  %p5219_p6 = por %p5218_p4, %p5217_p8 }
  0xef   : > { %p5220_p7 = pnand %p5219_p6, %p5213_p10 }
  0xf1   : > { %5223 = shalt.err (!%p5220_p7)
}
  0xf2   : > { %s7863_s6 = smov 8   ;;  %s7864_s25 = smov 128  }
  0xf3   : > { %s7865_s27 = sld [smem:[#allocation25_spill]]  ;;  %s7866_s4 = sld [smem:[#allocation24_spill]] }
  0xf4   : > { %4884 = dma.hbm_to_vmem [thread:$0]  (!%p5728_p3), %s5738_s5, 6144, %s5733_s12, %s5740_s2, %s7864_s25, %s7864_s25, %s7863_s6  }
  0xf5   : > { %s77_s11 = sadd.s32 1, %s5364_s29  ;;  %p7867_p13 = scmp.eq.s32.totalorder %s5680_s23, 0 }
  0xf6   : > { %p7868_p8 = scmp.eq.s32.totalorder %s5396_s15, 0  ;;  %s361_s28 = sand.u32 1, %s5396_s15  }
  0xf7   : > { %s5777_s3 = scalar_select %p7867_p13, %s5364_s29, %s77_s11  }
  0xf8   : > { %s363_s18 = sand.u32 1, %s5364_s29   ;;  %p7869_p0 = scmp.eq.s32.totalorder %s5514_s16, 0 }
  0xf9   : > { %p84_p5 = scmp.ne.s32.totalorder %s5364_s29, %s7865_s27  ;;  %p90_p11 = scmp.ne.s32.totalorder %s7865_s27, %s7866_s4 }
  0xfa   : > { %s4828_s1 = smul.u32 240, %s363_s18  ;;  %p7871_p1 = scmp.lt.s32.totalorder %s5396_s15, 4 }
  0xfb   : > { %p86_p10 = por %p84_p5, %p7868_p8  ;;  %p5787_p9 = por %p90_p11, %p7869_p0 }
  0xfc   : > { %s4829_s5 = smul.u32 3840, %s5388_s13  ;;  %s7873_s2 = sld [smem:[#allocation71_spill]] }
  0xfd   : > { %s7870_s19 = scalar_select %p5787_p9, 1, 0 }
  0xfe   : > { %p5793_p12 = pnand %p7871_p1, %p86_p10  ;;  %s365_s4 = scalar_lea.vmem [#allocation5], %s4828_s1 }
  0xff   : > { %s372_s11 = sshll.u32 %s365_s4, 4  ;;  %s5805_s18 = scalar_lea.sflag [#allocation6], %s361_s28  ;;  %s5803_s11 = int_to_ptr.vmem [resolvable:$true] %s372_s11 }
 0x100   : > { %p5226_p4 = pneg %p5793_p12 }
 0x102   : > { %s5801_s27 = scalar_lea.hbm %s7873_s2, %s4829_s5  ;;  %s5229_s23 = scalar_lea.hbm %s7873_s2, 7680 }
 0x103   : > { %s5224_s0 = scalar_lea.hbm %s5801_s27, 3840  ;;  %p5230_p5 = scmp.lt.u32.totalorder %s5801_s27, %s7873_s2 }
 0x104   : > { %p5225_p3 = scmp.ne.s32.totalorder %s5801_s27, %s5224_s0  ;;  %p5231_p13 = scmp.lt.u32.totalorder %s5229_s23, %s5224_s0 }
 0x105   : > { %p5233_p10 = scmp.lt.u32.totalorder %s5224_s0, %s5801_s27 }
 0x106   : > { %p5227_p6 = pnand %p5226_p4, %p5225_p3  ;;  %p5232_p8 = por %p5231_p13, %p5230_p5 }
 0x108   : > { %p5228_p7 = pneg %p5227_p6  ;;  %p5234_p11 = por %p5233_p10, %p5232_p8 }
 0x10a   : > { %p5235_p0 = pnand %p5234_p11, %p5228_p7 }
 0x10c   : > { %5238 = shalt.err (!%p5235_p0)
}
 0x10d   : > { %s5239_s28 = scalar_lea.vmem %s5803_s11, 3840  ;;  %s5407_s1 = smov [#allocation5]  }
 0x10e   : > { %p5240_p1 = scmp.ne.s32.totalorder %s5803_s11, %s5239_s28  ;;  %s5244_s4 = sshll.u32 %s5407_s1, 4  ;;  %s5245_s4 = int_to_ptr.vmem [resolvable:$false] %s5244_s4 }
 0x10f   : > { %s5246_s7 = scalar_lea.vmem %s5245_s4, 7680  ;;  %p5247_p9 = scmp.lt.s32.totalorder %s5803_s11, %s5245_s4 }
 0x110   : > { %p5242_p3 = pnand %p5240_p1, %p5226_p4  ;;  %p5248_p5 = scmp.lt.s32.totalorder %s5246_s7, %s5239_s28 }
 0x112   : > { %p5243_p6 = pneg %p5242_p3  ;;  %p5249_p13 = por %p5248_p5, %p5247_p9 }
 0x114   : > { %p5250_p8 = pnand %p5249_p13, %p5243_p6 }
 0x116   : > { %5253 = shalt.err (!%p5250_p8)
}
 0x117   : > { %4887 = dma.hbm_to_vmem [thread:$0]  (!%p5793_p12), %s5801_s27, 3840, %s5803_s11, %s5805_s18, %s7864_s25, %s7864_s25, %s7863_s6  }
 0x118   : > { %s7874_s0 = sld [smem:[#allocation28_spill]] }
 0x11e   : > { %p7875_p4 = scmp.ne.s32.totalorder %s7874_s0, 0 }
 0x120   : > { %384 = sbr.rel (%p7875_p4) target bundleno = 1519 (0x5ef), region = 52 }
 0x127   : > { %s5839_s26 = sand.u32 1, %s5372_s9  }
 0x128   : > { %s4830_s5 = smul.u32 384, %s5839_s26  ;;  %s387_s12 = scalar_lea.sflag [#allocation3], %s5839_s26 }
 0x12a   : > { %s5843_s23 = scalar_lea.vmem [#allocation2], %s4830_s5 }
 0x12b   : > { %5327 = dma.done.wait (%p5699_p2), %s387_s12, 6144  }
 0x12c   : > { %5329 = vsyncadd (%p5699_p2), %s387_s12, 4294961152  ;;  %s7876_s6 = sld [smem:[#allocation25_spill]]  ;;  %s395_s25 = sand.u32 1, %s5514_s16  }
 0x12d   : > { %s396_s11 = scalar_lea.sflag [#allocation6], %s395_s25  ;;  %p7877_p9 = scmp.ne.s32.totalorder %s7870_s19, 0 }
 0x132   : > { %s397_s21 = sand.u32 1, %s7876_s6  }
 0x133   : > { %s4831_s27 = smul.u32 240, %s397_s21 }
 0x135   : > { %s5851_s18 = scalar_lea.vmem [#allocation5], %s4831_s27 }
 0x136   : > { %5331 = dma.done.wait (%p7877_p9), %s396_s11, 3840  }
 0x137   : > { %5333 = vsyncadd (%p7877_p9), %s396_s11, 4294963456  ;;  %p7878_p12 = scmp.eq.s32.totalorder %s5514_s16, 0 }
 0x139   : > { %5335 = dma.done.wait (%p7878_p12), [#allocation6], 18432   ;;  %p7879_p7 = pmov %p7878_p12 }
 0x13b   : > { %5337 = vsyncadd (%p7879_p7), [#allocation6], 4294948864  ;;  %p7880_p2 = pmov %p7879_p7 }
 0x13d   : > { %5339 = dma.done.wait (%p7880_p2), [#allocation9], 32   ;;  %p7881_p10 = pmov %p7880_p2 }
 0x13e   : > { %p7882_p11 = pmov %p7880_p2 }
 0x13f   : > { %5341 = vsyncadd (%p7881_p10), [#allocation9], 4294967264 }
 0x140   : > { %5343 = dma.done.wait (%p7882_p11), [#allocation12], 18448   ;;  %p7883_p0 = pmov %p7880_p2 }
 0x142   : > { %5345 = vsyncadd (%p7883_p0), [#allocation12], 4294948848  ;;  %p7884_p1 = pmov %p7883_p0 }
 0x143   : > { %p7885_p3 = pmov %p7883_p0 }
 0x144   : > { %5347 = dma.done.wait (%p7884_p1), [#allocation15], 16  }
 0x145   : > { %5349 = vsyncadd (%p7885_p3), [#allocation15], 4294967280  ;;  %v7780_v0 = vmov 0.0|0.0   ;;  %v799_v1 = vld [vmem:[#allocation7] sm:$0xff]  ;;  %v800_v2 = vld [vmem:[#allocation7 + $0x8] sm:$0xff]  ;;  %vm549_vm0 = vcmask 1046528  }
 0x146   : > { %4245 = vmatprep.subr.bf16.mxu0 %v7780_v0  ;;  %4629 = vmatprep.subr.bf16.mxu1 %v7780_v0  ;;  %v801_v3 = vld [vmem:[#allocation7 + $0x10] sm:$0xff]  ;;  %v4246_v4 = vpack.c.bf16 %v800_v2, %v799_v1  ;;  %v802_v5 = vld [vmem:[#allocation7 + $0x18] sm:$0xff]  ;;  %v803_v7 = vld [vmem:[#allocation7 + $0x20] sm:$0xff]  ;;  %vm650_vm1 = vcmask 1045504   ;;  %s3687_s16 = sshll.u32 %s5839_s26, 7  ;;  %s8002_s19 = sld [smem:[#allocation26_spill]] }
 0x147   : > { %v4249_v6 = vpack.c.bf16 %v802_v5, %v801_v3  ;;  %v804_v8 = vld [vmem:[#allocation7 + $0x28] sm:$0xff]  ;;  %v805_v10 = vld [vmem:[#allocation7 + $0x30] sm:$0xff]  ;;  %v806_v11 = vld [vmem:[#allocation7 + $0x38] sm:$0xff]  ;;  %s7614_s8 = scalar_lea.vmem [#allocation16], %s3687_s16  ;;  %s8003_s28 = sld [smem:[#allocation27_spill]] }
 0x148   : > { %4247 = vmatpush1.bf16.msra.mxu0 %v4246_v4  ;;  %v4252_v9 = vpack.c.bf16 %v804_v8, %v803_v7  ;;  %v5878_v12 = vld [vmem:[%s5843_s23] sm:$0xff]  ;;  %v4255_v13 = vpack.c.bf16 %v806_v11, %v805_v10  ;;  %v5881_v14 = vld [vmem:[%s5843_s23 + $0x8] sm:$0xff]  ;;  %v809_v21 = vld [vmem:[#allocation7 + $0x50] sm:$0xff]  ;;  %s3498_s5 = sshll.u32 %s7614_s8, 4  ;;  %s8004_s25 = sld [smem:[#allocation78_spill]]  ;;  %s7684_s5 = int_to_ptr.vmem [resolvable:$true] %s3498_s5 }
 0x149   : > { %4248 = vmatprep.subr.bf16.mxu0 %v7780_v0  ;;  %v550_v15 = vrot.slane %v5878_v12, 1  ;;  %v807_v16 = vld [vmem:[#allocation7 + $0x40] sm:$0xff]  ;;  %v808_v17 = vld [vmem:[#allocation7 + $0x48] sm:$0xff]  ;;  %v551_v18 = vrot.slane %v5881_v14, 1  ;;  %v810_v22 = vld [vmem:[#allocation7 + $0x58] sm:$0xff]  ;;  %v651_v55 = vrot.slane %v5878_v12, 2 }
 0x14a   : > { %v4258_v20 = vpack.c.bf16 %v808_v17, %v807_v16  ;;  %v4261_v23 = vpack.c.bf16 %v810_v22, %v809_v21  ;;  %v811_v24 = vld [vmem:[#allocation7 + $0x60] sm:$0xff]  ;;  %v812_v25 = vld [vmem:[#allocation7 + $0x68] sm:$0xff]  ;;  %v813_v27 = vld [vmem:[#allocation7 + $0x70] sm:$0xff]  ;;  %v652_v56 = vrot.slane %v5881_v14, 2  ;;  %s5254_s27 = scalar_lea.vmem %s7684_s5, 2048  ;;  %p8005_p5 = scmp.ne.s32.totalorder %s7859_s22, 0 }
 0x14b   : > { %v552_v19 = vsel %vm549_vm0, %v550_v15, %v551_v18  ;;  %v4264_v26 = vpack.c.bf16 %v812_v25, %v811_v24  ;;  %v814_v28 = vld [vmem:[#allocation7 + $0x78] sm:$0xff]  ;;  %v5893_v29 = vld [vmem:[%s5843_s23 + $0xd0] sm:$0xff]  ;;  %v815_v32 = vld [vmem:[#allocation7 + $0x80] sm:$0xff]  ;;  %p5255_p6 = scmp.ne.s32.totalorder %s7684_s5, %s5254_s27  ;;  %s5410_s11 = smov [#allocation16]  }
 0x14c   : > { %4250 = vmatpush1.bf16.msra.mxu0 %v4249_v6  ;;  %1007 = vmatprep.mubr.f32.mxu0 %v552_v19  ;;  %v4267_v30 = vpack.c.bf16 %v814_v28, %v813_v27  ;;  %v488_v31 = vld [vmem:[%s5843_s23 + $0xd8] sm:$0x3]  ;;  %v816_v33 = vld [vmem:[#allocation7 + $0x88] sm:$0xff]  ;;  %v7773_v34 = vrot.slane %v5893_v29, 1  ;;  %v817_v38 = vld [vmem:[#allocation7 + $0x90] sm:$0xff]  ;;  %v5914_v60 = vsel %vm650_vm1, %v651_v55, %v652_v56  ;;  %s3709_s1 = sshll.u32 %s8002_s19, 4 }
 0x14d   : > { %4251 = vmatprep.subr.bf16.mxu0 %v7780_v0  ;;  %v597_v35 = vrot.slane %v488_v31, 1  ;;  %v4270_v37 = vpack.c.bf16 %v816_v33, %v815_v32  ;;  %v818_v39 = vld [vmem:[#allocation7 + $0x98] sm:$0xff]  ;;  %v819_v41 = vld [vmem:[#allocation7 + $0xa0] sm:$0xff]  ;;  %v820_v42 = vld [vmem:[#allocation7 + $0xa8] sm:$0xff]  ;;  %s3710_s4 = sshll.u32 %s8003_s28, 5  ;;  %p5256_p13 = pnand %p5255_p6, %p8005_p5 }
 0x14e   : > { %v4273_v40 = vpack.c.bf16 %v818_v39, %v817_v38  ;;  %v4276_v43 = vpack.c.bf16 %v820_v42, %v819_v41  ;;  %v821_v44 = vld [vmem:[#allocation7 + $0xb0] sm:$0xff]  ;;  %v822_v45 = vld [vmem:[#allocation7 + $0xb8] sm:$0xff]  ;;  %v823_v47 = vld [vmem:[#allocation7 + $0xc0] sm:$0xff]  ;;  %s3495_s7 = sadd.s32 %s3710_s4, %s3709_s1 }
 0x14f   : > { %v5901_v36 = vsel %vm549_vm0, %v7773_v34, %v597_v35  ;;  %v4279_v46 = vpack.c.bf16 %v822_v45, %v821_v44  ;;  %v824_v48 = vld [vmem:[#allocation7 + $0xc8] sm:$0xff]  ;;  %v825_v50 = vld [vmem:[#allocation7 + $0xd0] sm:$0xff]  ;;  %v826_v51 = vld [vmem:[#allocation7 + $0xd8] sm:$0xff]  ;;  %s3711_s0 = sshll.u32 %s3495_s7, 7  ;;  %p5257_p8 = pneg %p5256_p13 }
 0x150   : > { %4253 = vmatpush1.bf16.msra.mxu0 %v4252_v9  ;;  %7886 = vst [vmem:[#allocation30_spill] sm:$0xff] %v5901_v36  ;;  %1722 = vmatprep.mubr.f32.mxu1 %v5901_v36  ;;  %v4282_v49 = vpack.c.bf16 %v824_v48, %v823_v47  ;;  %v4285_v52 = vpack.c.bf16 %v826_v51, %v825_v50  ;;  %v827_v53 = vld [vmem:[#allocation7 + $0xe0] sm:$0xff]  ;;  %v828_v54 = vld [vmem:[#allocation7 + $0xe8] sm:$0xff]  ;;  %v829_v58 = vld [vmem:[#allocation7 + $0xf0] sm:$0xff]  ;;  %s7682_s21 = scalar_lea.hbm %s8004_s25, %s3711_s0 }
 0x151   : > { %4254 = vmatprep.subr.bf16.mxu0 %v7780_v0  ;;  %v4288_v57 = vpack.c.bf16 %v828_v54, %v827_v53  ;;  %v830_v59 = vld [vmem:[#allocation7 + $0xf8] sm:$0xff]  ;;  %v463_v61 = vld [vmem:[%s5843_s23 + $0x10] sm:$0xff]  ;;  %v831_v1 = vld [vmem:[#allocation7 + $0x100] sm:$0xff] }
 0x152   : > { %v4291_v62 = vpack.c.bf16 %v830_v59, %v829_v58  ;;  %v654_v63 = vrot.slane %v463_v61, 2  ;;  %v832_v2 = vld [vmem:[#allocation7 + $0x108] sm:$0xff]  ;;  %v553_v3 = vrot.slane %v463_v61, 1  ;;  %v464_v4 = vld [vmem:[%s5843_s23 + $0x18] sm:$0x3]  ;;  %v833_v10 = vld [vmem:[#allocation7 + $0x110] sm:$0xff] }
 0x153   : > { %v4294_v6 = vpack.c.bf16 %v832_v2, %v831_v1  ;;  %v656_v7 = vrot.slane %v464_v4, 2  ;;  %v555_v9 = vrot.slane %v464_v4, 1  ;;  %v834_v11 = vld [vmem:[#allocation7 + $0x118] sm:$0xff]  ;;  %v5930_v15 = vld [vmem:[%s5843_s23 + $0x28] sm:$0xff]  ;;  %v835_v21 = vld [vmem:[#allocation7 + $0x120] sm:$0xff] }
 0x154   : > { %4256 = vmatpush1.bf16.msra.mxu0 %v4255_v13  ;;  %v5920_v5 = vsel %vm650_vm1, %v652_v56, %v654_v63  ;;  %v554_v8 = vsel %vm549_vm0, %v551_v18, %v553_v3  ;;  %v5927_v13 = vld [vmem:[%s5843_s23 + $0x20] sm:$0xff]  ;;  %v4297_v17 = vpack.c.bf16 %v834_v11, %v833_v10  ;;  %v836_v22 = vld [vmem:[#allocation7 + $0x128] sm:$0xff]  ;;  %v838_v27 = vld [vmem:[#allocation7 + $0x138] sm:$0xff] }
 0x155   : > { %4257 = vmatprep.subr.bf16.mxu0 %v7780_v0  ;;  %v5933_v16 = vsel %vm650_vm1, %v654_v63, %v656_v7  ;;  %v556_v19 = vsel %vm549_vm0, %v553_v3, %v555_v9  ;;  %v557_v18 = vrot.slane %v5927_v13, 1  ;;  %v5950_v28 = vld [vmem:[%s5843_s23 + $0x38] sm:$0x3]  ;;  %v5958_v32 = vld [vmem:[%s5843_s23 + $0x40] sm:$0xff]  ;;  %v840_v35 = vld [vmem:[#allocation7 + $0x148] sm:$0xff] }
 0x156   : > { %v562_v31 = vrot.slane %v5950_v28, 1  ;;  %v839_v33 = vld [vmem:[#allocation7 + $0x140] sm:$0xff]  ;;  %v896_v39 = vld [vmem:[#allocation7 + $0x308] sm:$0xff]  ;;  %v841_v45 = vld [vmem:[#allocation7 + $0x150] sm:$0xff] }
 0x157   : > { %v895_v38 = vld [vmem:[#allocation7 + $0x300] sm:$0xff]  ;;  %v4306_v41 = vpack.c.bf16 %v840_v35, %v839_v33  ;;  %v5976_v47 = vld [vmem:[%s5843_s23 + $0x50] sm:$0xff]  ;;  %v844_v55 = vld [vmem:[#allocation7 + $0x168] sm:$0xff] }
 0x158   : > { %4259 = vmatpush1.bf16.msra.mxu0 %v4258_v20  ;;  %v558_v20 = vrot.slane %v5930_v15, 1  ;;  %v897_v48 = vld [vmem:[#allocation7 + $0x310] sm:$0xff]  ;;  %v567_v53 = vrot.slane %v5976_v47, 1  ;;  %v843_v54 = vld [vmem:[#allocation7 + $0x160] sm:$0xff]  ;;  %v5990_v56 = vld [vmem:[%s5843_s23 + $0x58] sm:$0x3] }
 0x159   : > { %4260 = vmatprep.subr.bf16.mxu0 %v7780_v0  ;;  %v900_v58 = vld [vmem:[#allocation7 + $0x328] sm:$0xff]  ;;  %v569_v63 = vrot.slane %v5990_v56, 1  ;;  %v6002_v1 = vld [vmem:[%s5843_s23 + $0x60] sm:$0xff]  ;;  %v845_v2 = vld [vmem:[#allocation7 + $0x170] sm:$0xff] }
 0x15a   : > { %v5945_v24 = vsel %vm549_vm0, %v557_v18, %v558_v20  ;;  %v846_v3 = vld [vmem:[#allocation7 + $0x178] sm:$0xff]  ;;  %v6007_v4 = vld [vmem:[%s5843_s23 + $0x68] sm:$0xff]  ;;  %v571_v11 = vrot.slane %v6002_v1, 1  ;;  %v905_v35 = vld [vmem:[#allocation7 + $0x350] sm:$0xff] }
 0x15b   : > { %v902_v7 = vld [vmem:[#allocation7 + $0x338] sm:$0xff]  ;;  %v4315_v9 = vpack.c.bf16 %v846_v3, %v845_v2  ;;  %v6015_v10 = vsel %vm549_vm0, %v567_v53, %v569_v63  ;;  %v848_v18 = vld [vmem:[#allocation7 + $0x188] sm:$0xff]  ;;  %v853_v63 = vld [vmem:[#allocation7 + $0x1b0] sm:$0xff] }
 0x15c   : > { %4262 = vmatpush1.bf16.msra.mxu0 %v4261_v23  ;;  %v5941_v23 = vld [vmem:[%s5843_s23 + $0x30] sm:$0xff]  ;;  %7890 = vst [vmem:[#allocation34_spill] sm:$0xff] %v6015_v10  ;;  %v6036_v33 = vld [vmem:[%s5843_s23 + $0x78] sm:$0x3]  ;;  %v924_v34 = vld [vmem:[#allocation7 + $0x3e8] sm:$0xff] }
 0x15d   : > { %4263 = vmatprep.subr.bf16.mxu0 %v7780_v0  ;;  %v560_v25 = vrot.slane %v5941_v23, 1  ;;  %v854_v2 = vld [vmem:[#allocation7 + $0x1b8] sm:$0xff]  ;;  %v6068_v3 = vld [vmem:[%s5843_s23 + $0x90] sm:$0xff] }
 0x15f   : > { %v5969_v42 = vsel %vm549_vm0, %v560_v25, %v562_v31  ;;  %v850_v31 = vld [vmem:[#allocation7 + $0x198] sm:$0xff] }
 0x160   : > { %4265 = vmatpush1.bf16.msra.mxu0 %v4264_v26  ;;  %v837_v26 = vld [vmem:[#allocation7 + $0x130] sm:$0xff] }
 0x161   : > { %4266 = vmatprep.subr.bf16.mxu0 %v7780_v0 }
 0x164   : > { %4268 = vmatpush1.bf16.msra.mxu0 %v4267_v30  ;;  %v5954_v30 = vsel %vm549_vm0, %v558_v20, %v560_v25  ;;  %v6022_v20 = vld [vmem:[%s5843_s23 + $0x70] sm:$0xff] }
 0x165   : > { %4269 = vmatprep.subr.bf16.mxu0 %v7780_v0 }
 0x168   : > { %4271 = vmatpush1.bf16.msra.mxu0 %v4270_v37  ;;  %v5962_v37 = vld [vmem:[%s5843_s23 + $0x48] sm:$0xff] }
 0x169   : > { %4272 = vmatprep.subr.bf16.mxu0 %v7780_v0  ;;  %v565_v44 = vrot.slane %v5962_v37, 1 }
 0x16c   : > { %4274 = vmatpush1.bf16.msra.mxu0 %v4273_v40  ;;  %v5965_v40 = vpack.c.bf16 %v896_v39, %v895_v38  ;;  %v906_v38 = vld [vmem:[#allocation7 + $0x358] sm:$0xff] }
 0x16d   : > { %4275 = vmatprep.subr.bf16.mxu0 %v7780_v0  ;;  %v6040_v39 = vpack.c.bf16 %v906_v38, %v905_v35 }
 0x16e   : > { %4645 = vmatpush1.bf16.msra.mxu1 %v5965_v40 }
 0x16f   : > { %4630 = vmatprep.subr.bf16.mxu1 %v7780_v0  ;;  %7893 = vst [vmem:[#allocation37_spill] sm:$0xff] %v6040_v39 }
 0x170   : > { %4277 = vmatpush1.bf16.msra.mxu0 %v4276_v43  ;;  %v564_v43 = vrot.slane %v5958_v32, 1 }
 0x171   : > { %4278 = vmatprep.subr.bf16.mxu0 %v7780_v0 }
 0x174   : > { %4280 = vmatpush1.bf16.msra.mxu0 %v4279_v46  ;;  %v842_v46 = vld [vmem:[#allocation7 + $0x158] sm:$0xff] }
 0x175   : > { %4281 = vmatprep.subr.bf16.mxu0 %v7780_v0  ;;  %v4309_v51 = vpack.c.bf16 %v842_v46, %v841_v45  ;;  %v6048_v45 = vld [vmem:[%s5843_s23 + $0x80] sm:$0xff] }
 0x176   : > { %v851_v46 = vld [vmem:[#allocation7 + $0x1a0] sm:$0xff] }
 0x178   : > { %4283 = vmatpush1.bf16.msra.mxu0 %v4282_v49  ;;  %v898_v49 = vld [vmem:[#allocation7 + $0x318] sm:$0xff] }
 0x179   : > { %4284 = vmatprep.subr.bf16.mxu0 %v7780_v0  ;;  %v5980_v50 = vpack.c.bf16 %v898_v49, %v897_v48  ;;  %v852_v48 = vld [vmem:[#allocation7 + $0x1a8] sm:$0xff] }
 0x17a   : > { %v6053_v49 = vld [vmem:[%s5843_s23 + $0x88] sm:$0xff] }
 0x17b   : > { %4646 = vmatpush1.bf16.msra.mxu1 %v5980_v50 }
 0x17c   : > { %4286 = vmatpush1.bf16.msra.mxu0 %v4285_v52  ;;  %v5984_v52 = vsel %vm549_vm0, %v564_v43, %v565_v44  ;;  %4631 = vmatprep.subr.bf16.mxu1 %v7780_v0 }
 0x17d   : > { %4287 = vmatprep.subr.bf16.mxu0 %v7780_v0  ;;  %7887 = vst [vmem:[#allocation31_spill] sm:$0xff] %v5984_v52 }
 0x180   : > { %4289 = vmatpush1.bf16.msra.mxu0 %v4288_v57  ;;  %v899_v57 = vld [vmem:[#allocation7 + $0x320] sm:$0xff] }
 0x181   : > { %4290 = vmatprep.subr.bf16.mxu0 %v7780_v0  ;;  %v5994_v59 = vpack.c.bf16 %v900_v58, %v899_v57  ;;  %v578_v58 = vrot.slane %v6048_v45, 1 }
 0x183   : > { %4647 = vmatpush1.bf16.msra.mxu1 %v5994_v59 }
 0x184   : > { %4292 = vmatpush1.bf16.msra.mxu0 %v4291_v62  ;;  %v5998_v62 = vsel %vm549_vm0, %v565_v44, %v567_v53  ;;  %4632 = vmatprep.subr.bf16.mxu1 %v7780_v0  ;;  %v576_v44 = vrot.slane %v6036_v33, 1  ;;  %v908_v53 = vld [vmem:[#allocation7 + $0x368] sm:$0xff] }
 0x185   : > { %4293 = vmatprep.subr.bf16.mxu0 %v7780_v0  ;;  %7888 = vst [vmem:[#allocation32_spill] sm:$0xff] %v5998_v62 }
 0x187   : > { %1008 = vmatmul.mubr.f32.vlgmr.msra.gmra.mrb[0].mxu0 %v5878_v12  ;;  %v4300_v12 = vpack.c.bf16 %v836_v22, %v835_v21  ;;  %v903_v21 = vld [vmem:[#allocation7 + $0x340] sm:$0xff]  ;;  %v904_v22 = vld [vmem:[#allocation7 + $0x348] sm:$0xff] }
 0x188   : > { %4295 = vmatpush1.bf16.msra.mxu0 %v4294_v6  ;;  %1012 = vmatprep.mubr.f32.mxu0 %v554_v8  ;;  %v901_v6 = vld [vmem:[#allocation7 + $0x330] sm:$0xff] }
 0x189   : > { %4296 = vmatprep.subr.bf16.mxu0 %v7780_v0  ;;  %v6011_v8 = vpack.c.bf16 %v902_v7, %v901_v6  ;;  %v909_v6 = vld [vmem:[#allocation7 + $0x370] sm:$0xff]  ;;  %v910_v7 = vld [vmem:[#allocation7 + $0x378] sm:$0xff] }
 0x18b   : > { %1013 = vmatmul.mubr.f32.gmra.mrb[2].mxu0 %v5881_v14  ;;  %v4303_v14 = vpack.c.bf16 %v838_v27, %v837_v26  ;;  %7889 = vst [vmem:[#allocation33_spill] sm:$0xff] %v6011_v8  ;;  %4648 = vmatpush1.bf16.msra.mxu1 %v6011_v8  ;;  %v574_v27 = vrot.slane %v6022_v20, 1  ;;  %v869_v8 = vld [vmem:[#allocation7 + $0x230] sm:$0xff] }
 0x18c   : > { %1017 = vmatprep.mubr.f32.mxu0 %v556_v19  ;;  %4298 = vmatpush1.bf16.msra.mxu0 %v4297_v17  ;;  %v572_v17 = vrot.slane %v6007_v4, 1  ;;  %v847_v19 = vld [vmem:[#allocation7 + $0x180] sm:$0xff] }
 0x18d   : > { %4299 = vmatprep.subr.bf16.mxu0 %v7780_v0  ;;  %4633 = vmatprep.subr.bf16.mxu1 %v7780_v0  ;;  %v4318_v25 = vpack.c.bf16 %v848_v18, %v847_v19  ;;  %v6061_v57 = vsel %vm549_vm0, %v574_v27, %v576_v44  ;;  %v581_v19 = vrot.slane %v6068_v3, 1  ;;  %v855_v18 = vld [vmem:[#allocation7 + $0x1c0] sm:$0xff]  ;;  %v857_v44 = vld [vmem:[#allocation7 + $0x1d0] sm:$0xff] }
 0x18e   : > { %v6030_v26 = vsel %vm549_vm0, %v571_v11, %v572_v17  ;;  %v6044_v43 = vsel %vm549_vm0, %v572_v17, %v574_v27  ;;  %7896 = vst [vmem:[#allocation40_spill] sm:$0xff] %v6061_v57  ;;  %v4327_v11 = vpack.c.bf16 %v854_v2, %v853_v63  ;;  %v912_v27 = vld [vmem:[#allocation7 + $0x388] sm:$0xff] }
 0x18f   : > { %1018 = vmatmul.mubr.f32.gmra.mrb[4].mxu0 %v463_v61  ;;  %v4312_v61 = vpack.c.bf16 %v844_v55, %v843_v54  ;;  %7892 = vst [vmem:[#allocation36_spill] sm:$0xff] %v6030_v26  ;;  %7894 = vst [vmem:[#allocation38_spill] sm:$0xff] %v6044_v43  ;;  %v4324_v55 = vpack.c.bf16 %v852_v48, %v851_v46  ;;  %v858_v46 = vld [vmem:[#allocation7 + $0x1d8] sm:$0xff]  ;;  %v6099_v48 = vld [vmem:[%s5843_s23 + $0xa8] sm:$0xff] }
 0x190   : > { %1022 = vmatprep.mubr.f32.mxu0 %v5945_v24  ;;  %4301 = vmatpush1.bf16.msra.mxu0 %v4300_v12  ;;  %v6026_v12 = vpack.c.bf16 %v904_v22, %v903_v21  ;;  %v856_v21 = vld [vmem:[#allocation7 + $0x1c8] sm:$0xff]  ;;  %v6082_v22 = vld [vmem:[%s5843_s23 + $0x98] sm:$0x3]  ;;  %v586_v2 = vrot.slane %v6099_v48, 1 }
 0x191   : > { %4302 = vmatprep.subr.bf16.mxu0 %v7780_v0  ;;  %v583_v38 = vrot.slane %v6082_v22, 1 }
 0x192   : > { %7891 = vst [vmem:[#allocation35_spill] sm:$0xff] %v6026_v12  ;;  %4649 = vmatpush1.bf16.msra.mxu1 %v6026_v12  ;;  %v659_v12 = vrot.slane %v5930_v15, 2 }
 0x193   : > { %1023 = vmatmul.mubr.f32.gmra.mrb[6].mxu0 %v5927_v13  ;;  %4634 = vmatprep.subr.bf16.mxu1 %v7780_v0 }
 0x194   : > { %1027 = vmatprep.mubr.f32.mxu0 %v5954_v30  ;;  %4304 = vmatpush1.bf16.msra.mxu0 %v4303_v14  ;;  %v849_v14 = vld [vmem:[#allocation7 + $0x190] sm:$0xff] }
 0x195   : > { %4305 = vmatprep.subr.bf16.mxu0 %v7780_v0 }
 0x196   : > { %4650 = vmatpush1.bf16.msra.mxu1 %v6040_v39  ;;  %v934_v39 = vld [vmem:[#allocation7 + $0x438] sm:$0xff] }
 0x197   : > { %1028 = vmatmul.mubr.f32.gmra.mrb[8].mxu0 %v5930_v15  ;;  %4635 = vmatprep.subr.bf16.mxu1 %v7780_v0 }
 0x198   : > { %1032 = vmatprep.mubr.f32.mxu0 %v5969_v42  ;;  %4307 = vmatpush1.bf16.msra.mxu0 %v4306_v41  ;;  %v4321_v41 = vpack.c.bf16 %v850_v31, %v849_v14  ;;  %v4330_v31 = vpack.c.bf16 %v856_v21, %v855_v18  ;;  %v915_v18 = vld [vmem:[#allocation7 + $0x3a0] sm:$0xff]  ;;  %v916_v21 = vld [vmem:[#allocation7 + $0x3a8] sm:$0xff] }
 0x199   : > { %4308 = vmatprep.subr.bf16.mxu0 %v7780_v0 }
 0x19b   : > { %1033 = vmatmul.mubr.f32.gmra.mrb[10].mxu0 %v5941_v23 }
 0x19c   : > { %1037 = vmatprep.mubr.f32.mxu0 %v5984_v52  ;;  %4310 = vmatpush1.bf16.msra.mxu0 %v4309_v51  ;;  %v907_v51 = vld [vmem:[#allocation7 + $0x360] sm:$0xff] }
 0x19d   : > { %4311 = vmatprep.subr.bf16.mxu0 %v7780_v0  ;;  %v6057_v54 = vpack.c.bf16 %v908_v53, %v907_v51  ;;  %v913_v51 = vld [vmem:[#allocation7 + $0x390] sm:$0xff]  ;;  %v914_v53 = vld [vmem:[#allocation7 + $0x398] sm:$0xff] }
 0x19f   : > { %1038 = vmatmul.mubr.f32.gmra.mrb[12].mxu0 %v5958_v32  ;;  %7895 = vst [vmem:[#allocation39_spill] sm:$0xff] %v6057_v54  ;;  %4651 = vmatpush1.bf16.msra.mxu1 %v6057_v54  ;;  %v865_v54 = vld [vmem:[#allocation7 + $0x210] sm:$0xff] }
 0x1a0   : > { %1042 = vmatprep.mubr.f32.mxu0 %v5998_v62  ;;  %4313 = vmatpush1.bf16.msra.mxu0 %v4312_v61  ;;  %v579_v61 = vrot.slane %v6053_v49, 1 }
 0x1a1   : > { %4314 = vmatprep.subr.bf16.mxu0 %v7780_v0  ;;  %4636 = vmatprep.subr.bf16.mxu1 %v7780_v0 }
 0x1a2   : > { %v6076_v17 = vsel %vm549_vm0, %v578_v58, %v579_v61  ;;  %v6090_v35 = vsel %vm549_vm0, %v579_v61, %v581_v19  ;;  %v4333_v58 = vpack.c.bf16 %v858_v46, %v857_v44  ;;  %v6107_v61 = vsel %vm549_vm0, %v581_v19, %v583_v38  ;;  %v861_v38 = vld [vmem:[#allocation7 + $0x1f0] sm:$0xff]  ;;  %v862_v44 = vld [vmem:[#allocation7 + $0x1f8] sm:$0xff] }
 0x1a3   : > { %1043 = vmatmul.mubr.f32.gmra.mrb[14].mxu0 %v5962_v37  ;;  %7898 = vst [vmem:[#allocation42_spill] sm:$0xff] %v6076_v17  ;;  %7900 = vst [vmem:[#allocation44_spill] sm:$0xff] %v6090_v35  ;;  %v6118_v19 = vpack.c.bf16 %v916_v21, %v915_v18  ;;  %v6128_v46 = vld [vmem:[%s5843_s23 + $0xb8] sm:$0x3]  ;;  %v6140_v18 = vld [vmem:[%s5843_s23 + $0xc0] sm:$0xff] }
 0x1a4   : > { %1047 = vmatprep.mubr.f32.mxu0 %v6015_v10  ;;  %4316 = vmatpush1.bf16.msra.mxu0 %v4315_v9  ;;  %v6072_v9 = vpack.c.bf16 %v910_v7, %v909_v6  ;;  %7902 = vst [vmem:[#allocation46_spill] sm:$0xff] %v6107_v61  ;;  %v859_v6 = vld [vmem:[#allocation7 + $0x1e0] sm:$0xff]  ;;  %v860_v7 = vld [vmem:[#allocation7 + $0x1e8] sm:$0xff] }
 0x1a5   : > { %4317 = vmatprep.subr.bf16.mxu0 %v7780_v0  ;;  %7903 = vst [vmem:[#allocation47_spill] sm:$0xff] %v6118_v19  ;;  %v6145_v21 = vld [vmem:[%s5843_s23 + $0xc8] sm:$0xff] }
 0x1a6   : > { %7897 = vst [vmem:[#allocation41_spill] sm:$0xff] %v6072_v9  ;;  %4652 = vmatpush1.bf16.msra.mxu1 %v6072_v9 }
 0x1a7   : > { %1048 = vmatmul.mubr.f32.gmra.mrb[16].mxu0 %v5976_v47  ;;  %4637 = vmatprep.subr.bf16.mxu1 %v7780_v0 }
 0x1a8   : > { %1052 = vmatprep.mubr.f32.mxu0 %v6030_v26  ;;  %4319 = vmatpush1.bf16.msra.mxu0 %v4318_v25  ;;  %v911_v25 = vld [vmem:[#allocation7 + $0x380] sm:$0xff] }
 0x1a9   : > { %4320 = vmatprep.subr.bf16.mxu0 %v7780_v0  ;;  %v6086_v14 = vpack.c.bf16 %v912_v27, %v911_v25  ;;  %v4336_v25 = vpack.c.bf16 %v860_v7, %v859_v6  ;;  %v590_v7 = vrot.slane %v6128_v46, 1 }
 0x1ab   : > { %1053 = vmatmul.mubr.f32.gmra.mrb[18].mxu0 %v6002_v1  ;;  %7899 = vst [vmem:[#allocation43_spill] sm:$0xff] %v6086_v14  ;;  %4653 = vmatpush1.bf16.msra.mxu1 %v6086_v14 }
 0x1ac   : > { %1057 = vmatprep.mubr.f32.mxu0 %v6044_v43  ;;  %4322 = vmatpush1.bf16.msra.mxu0 %v4321_v41  ;;  %v6094_v41 = vld [vmem:[%s5843_s23 + $0xa0] sm:$0xff]  ;;  %v6312_v43 = vld [vmem:[%s5843_s23 + $0x150] sm:$0xff] }
 0x1ad   : > { %4323 = vmatprep.subr.bf16.mxu0 %v7780_v0  ;;  %4638 = vmatprep.subr.bf16.mxu1 %v7780_v0  ;;  %v585_v63 = vrot.slane %v6094_v41, 1  ;;  %v758_v26 = vrot.slane %v6312_v43, 1 }
 0x1af   : > { %1058 = vmatmul.mubr.f32.gmra.mrb[20].mxu0 %v6007_v4  ;;  %v6122_v27 = vsel %vm549_vm0, %v585_v63, %v586_v2  ;;  %v4339_v63 = vpack.c.bf16 %v862_v44, %v861_v38  ;;  %v592_v38 = vrot.slane %v6140_v18, 1  ;;  %v593_v44 = vrot.slane %v6145_v21, 1 }
 0x1b0   : > { %1062 = vmatprep.mubr.f32.mxu0 %v6061_v57  ;;  %4325 = vmatpush1.bf16.msra.mxu0 %v4324_v55  ;;  %v6103_v55 = vpack.c.bf16 %v914_v53, %v913_v51  ;;  %7904 = vst [vmem:[#allocation48_spill] sm:$0xff] %v6122_v27  ;;  %v917_v51 = vld [vmem:[#allocation7 + $0x3b0] sm:$0xff]  ;;  %v918_v53 = vld [vmem:[#allocation7 + $0x3b8] sm:$0xff]  ;;  %v864_v57 = vld [vmem:[#allocation7 + $0x208] sm:$0xff] }
 0x1b1   : > { %4326 = vmatprep.subr.bf16.mxu0 %v7780_v0 }
 0x1b2   : > { %7901 = vst [vmem:[#allocation45_spill] sm:$0xff] %v6103_v55  ;;  %4654 = vmatpush1.bf16.msra.mxu1 %v6103_v55 }
 0x1b3   : > { %1063 = vmatmul.mubr.f32.gmra.mrb[22].mxu0 %v6022_v20  ;;  %4639 = vmatprep.subr.bf16.mxu1 %v7780_v0 }
 0x1b4   : > { %1067 = vmatprep.mubr.f32.mxu0 %v6076_v17  ;;  %4328 = vmatpush1.bf16.msra.mxu0 %v4327_v11  ;;  %v6114_v11 = vld [vmem:[%s5843_s23 + $0xb0] sm:$0xff]  ;;  %v930_v17 = vld [vmem:[#allocation7 + $0x418] sm:$0xff] }
 0x1b5   : > { %4329 = vmatprep.subr.bf16.mxu0 %v7780_v0 }
 0x1b6   : > { %4655 = vmatpush1.bf16.msra.mxu1 %v6118_v19 }
 0x1b7   : > { %1068 = vmatmul.mubr.f32.gmra.mrb[24].mxu0 %v6048_v45  ;;  %4640 = vmatprep.subr.bf16.mxu1 %v7780_v0 }
 0x1b8   : > { %1072 = vmatprep.mubr.f32.mxu0 %v6090_v35  ;;  %4331 = vmatpush1.bf16.msra.mxu0 %v4330_v31  ;;  %v588_v31 = vrot.slane %v6114_v11, 1  ;;  %v928_v35 = vld [vmem:[#allocation7 + $0x408] sm:$0xff] }
 0x1b9   : > { %4332 = vmatprep.subr.bf16.mxu0 %v7780_v0 }
 0x1ba   : > { %v6136_v6 = vsel %vm549_vm0, %v586_v2, %v588_v31  ;;  %v6153_v2 = vsel %vm549_vm0, %v588_v31, %v590_v7  ;;  %v6165_v31 = vsel %vm549_vm0, %v592_v38, %v593_v44  ;;  %v923_v7 = vld [vmem:[#allocation7 + $0x3e0] sm:$0xff] }
 0x1bb   : > { %1073 = vmatmul.mubr.f32.gmra.mrb[26].mxu0 %v6053_v49  ;;  %7906 = vst [vmem:[#allocation50_spill] sm:$0xff] %v6136_v6  ;;  %7908 = vst [vmem:[#allocation52_spill] sm:$0xff] %v6153_v2  ;;  %v6179_v38 = vld [vmem:[%s5843_s23 + $0xe0] sm:$0xff] }
 0x1bc   : > { %1077 = vmatprep.mubr.f32.mxu0 %v6107_v61  ;;  %4334 = vmatpush1.bf16.msra.mxu0 %v4333_v58  ;;  %v6132_v58 = vpack.c.bf16 %v918_v53, %v917_v51  ;;  %v919_v51 = vld [vmem:[#allocation7 + $0x3c0] sm:$0xff]  ;;  %v920_v53 = vld [vmem:[#allocation7 + $0x3c8] sm:$0xff]  ;;  %7910 = vst [vmem:[#allocation54_spill] sm:$0xff] %v6165_v31  ;;  %v6267_v61 = vld [vmem:[%s5843_s23 + $0x130] sm:$0xff] }
 0x1bd   : > { %4335 = vmatprep.subr.bf16.mxu0 %v7780_v0 }
 0x1be   : > { %7905 = vst [vmem:[#allocation49_spill] sm:$0xff] %v6132_v58  ;;  %4656 = vmatpush1.bf16.msra.mxu1 %v6132_v58 }
 0x1bf   : > { %1078 = vmatmul.mubr.f32.gmra.mrb[28].mxu0 %v6068_v3  ;;  %4641 = vmatprep.subr.bf16.mxu1 %v7780_v0 }
 0x1c0   : > { %1082 = vmatprep.mubr.f32.mxu0 %v6122_v27  ;;  %4337 = vmatpush1.bf16.msra.mxu0 %v4336_v25  ;;  %v6149_v25 = vpack.c.bf16 %v920_v53, %v919_v51  ;;  %v921_v51 = vld [vmem:[#allocation7 + $0x3d0] sm:$0xff]  ;;  %v922_v53 = vld [vmem:[#allocation7 + $0x3d8] sm:$0xff]  ;;  %v6255_v27 = vld [vmem:[%s5843_s23 + $0x128] sm:$0xff] }
 0x1c1   : > { %4338 = vmatprep.subr.bf16.mxu0 %v7780_v0  ;;  %v614_v58 = vrot.slane %v6255_v27, 1 }
 0x1c2   : > { %7907 = vst [vmem:[#allocation51_spill] sm:$0xff] %v6149_v25  ;;  %4657 = vmatpush1.bf16.msra.mxu1 %v6149_v25  ;;  %v926_v25 = vld [vmem:[#allocation7 + $0x3f8] sm:$0xff] }
 0x1c3   : > { %1083 = vmatmul.mubr.f32.gmra.mrb[30].mxu0 %v6094_v41  ;;  %4642 = vmatprep.subr.bf16.mxu1 %v7780_v0 }
 0x1c4   : > { %1087 = vmatprep.mubr.f32.mxu0 %v6136_v6  ;;  %4340 = vmatpush1.bf16.msra.mxu0 %v4339_v63  ;;  %v6161_v63 = vpack.c.bf16 %v922_v53, %v921_v51  ;;  %v6170_v6 = vpack.c.bf16 %v924_v34, %v923_v7  ;;  %v7912_v51 = vrot.slane %v5893_v29, 1 }
 0x1c5   : > { %4341 = vmatprep.subr.bf16.mxu0 %v7780_v0 }
 0x1c6   : > { %7909 = vst [vmem:[#allocation53_spill] sm:$0xff] %v6161_v63  ;;  %4658 = vmatpush1.bf16.msra.mxu1 %v6161_v63  ;;  %7911 = vst [vmem:[#allocation55_spill] sm:$0xff] %v6170_v6  ;;  %v6176_v53 = vsel %vm549_vm0, %v593_v44, %v7912_v51  ;;  %v925_v63 = vld [vmem:[#allocation7 + $0x3f0] sm:$0xff]  ;;  %v599_v44 = vrot.slane %v6179_v38, 1 }
 0x1c7   : > { %1088 = vmatmul.mubr.f32.gmra.mrb[32].mxu0 %v6099_v48  ;;  %4643 = vmatprep.subr.bf16.mxu1 %v7780_v0  ;;  %7913 = vst [vmem:[#allocation56_spill] sm:$0xff] %v6176_v53  ;;  %v6187_v34 = vpack.c.bf16 %v926_v25, %v925_v63  ;;  %v6193_v51 = vld [vmem:[%s5843_s23 + $0xf0] sm:$0xff]  ;;  %v6204_v63 = vld [vmem:[%s5843_s23 + $0xf8] sm:$0x3] }
 0x1c8   : > { %1092 = vmatprep.mubr.f32.mxu0 %v6153_v2  ;;  %v6182_v2 = vld [vmem:[%s5843_s23 + $0xe8] sm:$0xff]  ;;  %v602_v25 = vrot.slane %v6193_v51, 1 }
 0x1c9   : > { %7914 = vst [vmem:[#allocation57_spill] sm:$0xff] %v6187_v34  ;;  %v600_v7 = vrot.slane %v6182_v2, 1 }
 0x1ca   : > { %4659 = vmatpush1.bf16.msra.mxu1 %v6170_v6 }
 0x1cb   : > { %1093 = vmatmul.mubr.f32.gmra.mrb[34].mxu0 %v6114_v11  ;;  %4644 = vmatprep.subr.bf16.mxu1 %v7780_v0  ;;  %v6199_v0 = vsel %vm549_vm0, %v599_v44, %v600_v7  ;;  %v6215_v44 = vld [vmem:[%s5843_s23 + $0x100] sm:$0xff] }
 0x1cc   : > { %1097 = vmatprep.mubr.f32.mxu0 %v6165_v31  ;;  %7915 = vst [vmem:[#allocation58_spill] sm:$0xff] %v6199_v0  ;;  %v6230_v31 = vld [vmem:[%s5843_s23 + $0x110] sm:$0xff] }
 0x1ce   : > { %4660 = vmatpush1.bf16.msra.mxu1 %v6187_v34  ;;  %v6218_v34 = vld [vmem:[%s5843_s23 + $0x108] sm:$0xff] }
 0x1cf   : > { %1098 = vmatmul.mubr.f32.gmra.mrb[36].mxu0 %v6140_v18 }
 0x1d0   : > { %1102 = vmatprep.mubr.f32.mxu0 %v6176_v53  ;;  %v6210_v53 = vsel %vm549_vm0, %v600_v7, %v602_v25  ;;  %v606_v7 = vrot.slane %v6215_v44, 1 }
 0x1d1   : > { %1723 = vmatmul.mubr.f32.vlgmr.msra.gmra.mrb[0].mxu1 %v5893_v29  ;;  %7916 = vst [vmem:[#allocation59_spill] sm:$0xff] %v6210_v53 }
 0x1d2   : > { %1727 = vmatprep.mubr.f32.mxu1 %v6199_v0 }
 0x1d3   : > { %1103 = vmatmul.mubr.f32.gmra.mrb[38].mxu0 %v6145_v21 }
 0x1d4   : > { %1107 = vmatprep.mubr.f32.mxu0 %v5901_v36  ;;  %v604_v36 = vrot.slane %v6204_v63, 1 }
 0x1d5   : > { %1728 = vmatmul.mubr.f32.gmra.mrb[2].mxu1 %v6179_v38 }
 0x1d6   : > { %1732 = vmatprep.mubr.f32.mxu1 %v6210_v53 }
 0x1d7   : > { %1108 = vmatmul.mubr.f32.gmra.mrb[40].mxu0 %v5893_v29  ;;  %v6224_v29 = vsel %vm549_vm0, %v602_v25, %v604_v36  ;;  %v609_v36 = vrot.slane %v6230_v31, 1  ;;  %v6241_v25 = vld [vmem:[%s5843_s23 + $0x118] sm:$0x3] }
 0x1d8   : > { %1112 = vmatprep.mubr.f32.mxu0 %v6199_v0  ;;  %7917 = vst [vmem:[#allocation60_spill] sm:$0xff] %v6224_v29  ;;  %v607_v0 = vrot.slane %v6218_v34, 1 }
 0x1d9   : > { %1733 = vmatmul.mubr.f32.gmra.mrb[4].mxu1 %v6182_v2 }
 0x1da   : > { %1737 = vmatprep.mubr.f32.mxu1 %v6224_v29  ;;  %v6247_v6 = vsel %vm549_vm0, %v607_v0, %v609_v36 }
 0x1db   : > { %1113 = vmatmul.mubr.f32.gmra.mrb[42].mxu0 %v6179_v38  ;;  %7919 = vst [vmem:[#allocation62_spill] sm:$0xff] %v6247_v6 }
 0x1dc   : > { %1117 = vmatprep.mubr.f32.mxu0 %v6210_v53  ;;  %v6236_v53 = vsel %vm549_vm0, %v606_v7, %v607_v0  ;;  %v6252_v7 = vld [vmem:[%s5843_s23 + $0x120] sm:$0xff] }
 0x1dd   : > { %7918 = vst [vmem:[#allocation61_spill] sm:$0xff] %v6236_v53  ;;  %1738 = vmatmul.mubr.f32.gmra.mrb[6].mxu1 %v6193_v51  ;;  %v613_v0 = vrot.slane %v6252_v7, 1 }
 0x1de   : > { %1742 = vmatprep.mubr.f32.mxu1 %v6236_v53 }
 0x1df   : > { %1118 = vmatmul.mubr.f32.gmra.mrb[44].mxu0 %v6182_v2  ;;  %v6273_v19 = vsel %vm549_vm0, %v613_v0, %v614_v58  ;;  %v927_v0 = vld [vmem:[#allocation7 + $0x400] sm:$0xff] }
 0x1e0   : > { %1122 = vmatprep.mubr.f32.mxu0 %v6224_v29  ;;  %v611_v29 = vrot.slane %v6241_v25, 1  ;;  %7921 = vst [vmem:[#allocation64_spill] sm:$0xff] %v6273_v19  ;;  %v4437_v55 = vpack.c.bf16 %v928_v35, %v927_v0  ;;  %v6298_v35 = vld [vmem:[%s5843_s23 + $0x140] sm:$0xff]  ;;  %v6301_v0 = vld [vmem:[%s5843_s23 + $0x148] sm:$0xff] }
 0x1e1   : > { %1743 = vmatmul.mubr.f32.gmra.mrb[8].mxu1 %v6215_v44 }
 0x1e2   : > { %1747 = vmatprep.mubr.f32.mxu1 %v6247_v6  ;;  %4438 = vmatprep.subr.bf16.mxu1 %v4437_v55 }
 0x1e3   : > { %1123 = vmatmul.mubr.f32.gmra.mrb[46].mxu0 %v6193_v51  ;;  %4440 = vmatpush3.bf16.msra.mxu1 %v4437_v55  ;;  %v931_v55 = vld [vmem:[#allocation7 + $0x420] sm:$0xff] }
 0x1e4   : > { %1127 = vmatprep.mubr.f32.mxu0 %v6236_v53  ;;  %v6261_v53 = vsel %vm549_vm0, %v609_v36, %v611_v29  ;;  %v616_v29 = vrot.slane %v6267_v61, 1  ;;  %v6278_v36 = vld [vmem:[%s5843_s23 + $0x138] sm:$0x3] }
 0x1e5   : > { %7920 = vst [vmem:[#allocation63_spill] sm:$0xff] %v6261_v53  ;;  %1748 = vmatmul.mubr.f32.gmra.mrb[10].mxu1 %v6218_v34 }
 0x1e6   : > { %1752 = vmatprep.mubr.f32.mxu1 %v6261_v53 }
 0x1e7   : > { %1128 = vmatmul.mubr.f32.gmra.mrb[48].mxu0 %v6215_v44 }
 0x1e8   : > { %1132 = vmatprep.mubr.f32.mxu0 %v6247_v6  ;;  %v6284_v6 = vsel %vm549_vm0, %v614_v58, %v616_v29  ;;  %v929_v58 = vld [vmem:[#allocation7 + $0x410] sm:$0xff] }
 0x1e9   : > { %1753 = vmatmul.mubr.f32.gmra.mrb[12].mxu1 %v6230_v31  ;;  %7922 = vst [vmem:[#allocation65_spill] sm:$0xff] %v6284_v6  ;;  %v4441_v14 = vpack.c.bf16 %v930_v17, %v929_v58  ;;  %v932_v17 = vld [vmem:[#allocation7 + $0x428] sm:$0xff] }
 0x1ea   : > { %1757 = vmatprep.mubr.f32.mxu1 %v6273_v19  ;;  %v4445_v9 = vpack.c.bf16 %v932_v17, %v931_v55 }
 0x1eb   : > { %1133 = vmatmul.mubr.f32.gmra.mrb[50].mxu0 %v6218_v34  ;;  %4442 = vmatprep.subr.bf16.mxu1 %v4441_v14 }
 0x1ec   : > { %1137 = vmatprep.mubr.f32.mxu0 %v6261_v53  ;;  %v618_v53 = vrot.slane %v6278_v36, 1  ;;  %4444 = vmatpush3.bf16.msra.mxu1 %v4441_v14  ;;  %v866_v14 = vld [vmem:[#allocation7 + $0x218] sm:$0xff] }
 0x1ed   : > { %1758 = vmatmul.mubr.f32.gmra.mrb[14].mxu1 %v6252_v7  ;;  %4446 = vmatprep.subr.bf16.mxu1 %v4445_v9 }
 0x1ee   : > { %1762 = vmatprep.mubr.f32.mxu1 %v6284_v6 }
 0x1ef   : > { %1138 = vmatmul.mubr.f32.gmra.mrb[52].mxu0 %v6230_v31 }
 0x1f0   : > { %1142 = vmatprep.mubr.f32.mxu0 %v6273_v19  ;;  %v6292_v19 = vsel %vm549_vm0, %v616_v29, %v618_v53  ;;  %v863_v53 = vld [vmem:[#allocation7 + $0x200] sm:$0xff]  ;;  %v755_v29 = vrot.slane %v6298_v35, 1  ;;  %4448 = vmatpush3.bf16.msra.mxu1 %v4445_v9  ;;  %v7926_v9 = vmov 0.0|0.0  }
 0x1f1   : > { %7923 = vst [vmem:[#allocation66_spill] sm:$0xff] %v6292_v19  ;;  %1763 = vmatmul.mubr.f32.gmra.mrb[16].mxu1 %v6255_v27 }
 0x1f2   : > { %1767 = vmatprep.mubr.f32.mxu1 %v6292_v19 }
 0x1f3   : > { %1143 = vmatmul.mubr.f32.gmra.mrb[54].mxu0 %v6252_v7 }
 0x1f4   : > { %1147 = vmatprep.mubr.f32.mxu0 %v6284_v6  ;;  %v756_v6 = vrot.slane %v6301_v0, 1 }
 0x1f5   : > { %1768 = vmatmul.mubr.f32.gmra.mrb[18].mxu1 %v6267_v61 }
 0x1f6   : > { %v6308_v58 = vsel %vm549_vm0, %v755_v29, %v756_v6  ;;  %v933_v29 = vld [vmem:[#allocation7 + $0x430] sm:$0xff]  ;;  %v6319_v55 = vsel %vm549_vm0, %v756_v6, %v758_v26  ;;  %v868_v6 = vld [vmem:[#allocation7 + $0x228] sm:$0xff] }
 0x1f7   : > { %1148 = vmatmul.mubr.f32.gmra.mrb[56].mxu0 %v6255_v27  ;;  %7924 = vst [vmem:[#allocation67_spill] sm:$0xff] %v6308_v58  ;;  %1772 = vmatprep.mubr.f32.mxu1 %v6308_v58  ;;  %7925 = vst [vmem:[#allocation68_spill] sm:$0xff] %v6319_v55  ;;  %v4449_v17 = vpack.c.bf16 %v934_v39, %v933_v29  ;;  %v6324_v58 = vld [vmem:[%s5843_s23 + $0x158] sm:$0x3]  ;;  %v935_v39 = vld [vmem:[#allocation7 + $0x440] sm:$0xff] }
 0x1f8   : > { %1152 = vmatprep.mubr.f32.mxu0 %v6292_v19  ;;  %v4342_v19 = vpack.c.bf16 %v864_v57, %v863_v53  ;;  %v4345_v57 = vpack.c.bf16 %v866_v14, %v865_v54  ;;  %v867_v53 = vld [vmem:[#allocation7 + $0x220] sm:$0xff]  ;;  %v760_v10 = vrot.slane %v6324_v58, 1  ;;  %v6339_v14 = vld [vmem:[%s5843_s23 + $0x168] sm:$0xff] }
 0x1f9   : > { %1773 = vmatmul.mubr.f32.gmra.mrb[20].mxu1 %v6298_v35  ;;  %4450 = vmatprep.subr.bf16.mxu1 %v4449_v17  ;;  %v6336_v54 = vld [vmem:[%s5843_s23 + $0x160] sm:$0xff]  ;;  %v4348_v62 = vpack.c.bf16 %v868_v6, %v867_v53  ;;  %v6351_v53 = vld [vmem:[%s5843_s23 + $0x170] sm:$0xff] }
 0x1fa   : > { %1777 = vmatprep.mubr.f32.mxu1 %v6319_v55  ;;  %v6331_v29 = vsel %vm549_vm0, %v758_v26, %v760_v10  ;;  %v658_v55 = vrot.slane %v5927_v13, 2  ;;  %4452 = vmatpush3.bf16.msra.mxu1 %v4449_v17  ;;  %v779_v10 = vrot.slane %v6336_v54, 1  ;;  %v780_v26 = vrot.slane %v6339_v14, 1  ;;  %v938_v17 = vld [vmem:[#allocation7 + $0x458] sm:$0xff] }
 0x1fb   : > { %1153 = vmatmul.mubr.f32.gmra.mrb[58].mxu0 %v6267_v61  ;;  %7927 = vst [vmem:[#allocation69_spill] sm:$0xff] %v6331_v29  ;;  %v782_v52 = vrot.slane %v6351_v53, 1 }
 0x1fc   : > { %1222 = vmatprep.mubr.f32.mxu0 %v5927_v13  ;;  %v937_v13 = vld [vmem:[#allocation7 + $0x450] sm:$0xff]  ;;  %v6355_v6 = vsel %vm650_vm1, %v658_v55, %v659_v12 }
 0x1fd   : > { %1778 = vmatmul.mubr.f32.gmra.mrb[22].mxu1 %v6301_v0  ;;  %v783_v55 = vsel %vm549_vm0, %v780_v26, %v782_v52 }
 0x1fe   : > { %1782 = vmatprep.mubr.f32.mxu1 %v6331_v29  ;;  %v871_v29 = vld [vmem:[#allocation7 + $0x240] sm:$0xff] }
 0x1ff   : > { %1223 = vmatmul.mubr.f32.vlgmr.msra.gmra.mrb[0].mxu0 %v5914_v60  ;;  %v936_v60 = vld [vmem:[#allocation7 + $0x448] sm:$0xff] }
 0x200   : > { %4343 = vmatpush1.bf16.msra.mxu0 %v4342_v19  ;;  %1227 = vmatprep.mubr.f32.mxu0 %v5930_v15  ;;  %v4453_v19 = vpack.c.bf16 %v936_v60, %v935_v39  ;;  %v4457_v15 = vpack.c.bf16 %v938_v17, %v937_v13  ;;  %v661_v39 = vrot.slane %v5941_v23, 2  ;;  %v873_v17 = vld [vmem:[#allocation7 + $0x250] sm:$0xff] }
 0x201   : > { %4344 = vmatprep.subr.bf16.mxu0 %v7926_v9  ;;  %1783 = vmatmul.mubr.f32.gmra.mrb[24].mxu1 %v6312_v43 }
 0x202   : > { %4454 = vmatprep.subr.bf16.mxu1 %v4453_v19 }
 0x203   : > { %1228 = vmatmul.mubr.f32.gmra.mrb[2].mxu0 %v5920_v5  ;;  %v870_v5 = vld [vmem:[#allocation7 + $0x238] sm:$0xff]  ;;  %4456 = vmatpush3.bf16.msra.mxu1 %v4453_v19  ;;  %v940_v19 = vld [vmem:[#allocation7 + $0x468] sm:$0xff] }
 0x204   : > { %1232 = vmatprep.mubr.f32.mxu0 %v5941_v23  ;;  %4346 = vmatpush1.bf16.msra.mxu0 %v4345_v57  ;;  %v781_v57 = vsel %vm549_vm0, %v779_v10, %v780_v26  ;;  %v4351_v60 = vpack.c.bf16 %v870_v5, %v869_v8  ;;  %v872_v10 = vld [vmem:[#allocation7 + $0x248] sm:$0xff]  ;;  %v6364_v23 = vld [vmem:[%s5843_s23 + $0x178] sm:$0x3]  ;;  %v663_v8 = vrot.slane %v5950_v28, 2 }
 0x205   : > { %4347 = vmatprep.subr.bf16.mxu0 %v7926_v9  ;;  %1787 = vmatprep.mubr.f32.mxu1 %v781_v57  ;;  %v4354_v5 = vpack.c.bf16 %v872_v10, %v871_v29  ;;  %v784_v57 = vrot.slane %v6364_v23, 1  ;;  %v874_v26 = vld [vmem:[#allocation7 + $0x258] sm:$0xff]  ;;  %v665_v29 = vrot.slane %v5958_v32, 2 }
 0x206   : > { %1788 = vmatmul.mubr.f32.gmra.mrb[26].mxu1 %v6336_v54  ;;  %4458 = vmatprep.subr.bf16.mxu1 %v4457_v15  ;;  %v6378_v28 = vsel %vm650_vm1, %v661_v39, %v663_v8  ;;  %v4357_v10 = vpack.c.bf16 %v874_v26, %v873_v17  ;;  %v877_v8 = vld [vmem:[#allocation7 + $0x270] sm:$0xff]  ;;  %v675_v26 = vrot.slane %v6022_v20, 2 }
 0x207   : > { %1233 = vmatmul.mubr.f32.gmra.mrb[4].mxu0 %v5933_v16  ;;  %v939_v16 = vld [vmem:[#allocation7 + $0x460] sm:$0xff]  ;;  %4460 = vmatpush3.bf16.msra.mxu1 %v4457_v15  ;;  %v942_v15 = vld [vmem:[#allocation7 + $0x478] sm:$0xff] }
 0x208   : > { %1237 = vmatprep.mubr.f32.mxu0 %v5958_v32  ;;  %4349 = vmatpush1.bf16.msra.mxu0 %v4348_v62  ;;  %v4461_v13 = vpack.c.bf16 %v940_v19, %v939_v16  ;;  %v6368_v62 = vsel %vm650_vm1, %v659_v12, %v661_v39  ;;  %v941_v16 = vld [vmem:[#allocation7 + $0x470] sm:$0xff]  ;;  %v785_v19 = vsel %vm549_vm0, %v782_v52, %v784_v57  ;;  %v875_v52 = vld [vmem:[#allocation7 + $0x260] sm:$0xff]  ;;  %v876_v57 = vld [vmem:[#allocation7 + $0x268] sm:$0xff]  ;;  %v672_v39 = vrot.slane %v6002_v1, 2 }
 0x209   : > { %4350 = vmatprep.subr.bf16.mxu0 %v7926_v9  ;;  %1792 = vmatprep.mubr.f32.mxu1 %v783_v55  ;;  %v4465_v12 = vpack.c.bf16 %v942_v15, %v941_v16  ;;  %v668_v55 = vrot.slane %v5976_v47, 2  ;;  %v677_v15 = vrot.slane %v6036_v33, 2 }
 0x20a   : > { %1793 = vmatmul.mubr.f32.gmra.mrb[28].mxu1 %v6339_v14  ;;  %4462 = vmatprep.subr.bf16.mxu1 %v4461_v13 }
 0x20b   : > { %1238 = vmatmul.mubr.f32.gmra.mrb[6].mxu0 %v6355_v6  ;;  %4464 = vmatpush3.bf16.msra.mxu1 %v4461_v13  ;;  %v670_v13 = vrot.slane %v5990_v56, 2  ;;  %v673_v56 = vrot.slane %v6007_v4, 2  ;;  %v6421_v33 = vsel %vm650_vm1, %v675_v26, %v677_v15 }
 0x20c   : > { %1242 = vmatprep.mubr.f32.mxu0 %v5962_v37  ;;  %4352 = vmatpush1.bf16.msra.mxu0 %v4351_v60  ;;  %v666_v60 = vrot.slane %v5962_v37, 2  ;;  %v4360_v37 = vpack.c.bf16 %v876_v57, %v875_v52  ;;  %v881_v52 = vld [vmem:[#allocation7 + $0x290] sm:$0xff]  ;;  %v882_v57 = vld [vmem:[#allocation7 + $0x298] sm:$0xff] }
 0x20d   : > { %4353 = vmatprep.subr.bf16.mxu0 %v7926_v9  ;;  %1797 = vmatprep.mubr.f32.mxu1 %v785_v19  ;;  %v6399_v17 = vsel %vm650_vm1, %v668_v55, %v670_v13  ;;  %v6407_v16 = vsel %vm650_vm1, %v672_v39, %v673_v56  ;;  %v879_v19 = vld [vmem:[#allocation7 + $0x280] sm:$0xff] }
 0x20e   : > { %1798 = vmatmul.mubr.f32.gmra.mrb[30].mxu1 %v6351_v53  ;;  %4466 = vmatprep.subr.bf16.mxu1 %v4465_v12  ;;  %v6389_v32 = vsel %vm650_vm1, %v665_v29, %v666_v60  ;;  %v6412_v29 = vsel %vm650_vm1, %v673_v56, %v675_v26  ;;  %v686_v56 = vrot.slane %v6094_v41, 2 }
 0x20f   : > { %1243 = vmatmul.mubr.f32.gmra.mrb[8].mxu0 %v6368_v62  ;;  %4468 = vmatpush3.bf16.msra.mxu1 %v4465_v12  ;;  %v880_v12 = vld [vmem:[#allocation7 + $0x288] sm:$0xff] }
 0x210   : > { %1247 = vmatprep.mubr.f32.mxu0 %v5976_v47  ;;  %4355 = vmatpush1.bf16.msra.mxu0 %v4354_v5  ;;  %v6392_v47 = vsel %vm650_vm1, %v666_v60, %v668_v55  ;;  %v878_v5 = vld [vmem:[#allocation7 + $0x278] sm:$0xff]  ;;  %v679_v60 = vrot.slane %v6048_v45, 2  ;;  %v682_v55 = vrot.slane %v6068_v3, 2 }
 0x211   : > { %4356 = vmatprep.subr.bf16.mxu0 %v7926_v9  ;;  %4144 = vmatprep.mubr.f32.mxu1 %v6389_v32 }
 0x212   : > { %4145 = vmatmul.mubr.f32.vlgmr.msra.gmra.mrb[32].mxu1 %v6392_v47 }
 0x213   : > { %1248 = vmatmul.mubr.f32.gmra.mrb[10].mxu0 %v6378_v28  ;;  %4147 = vmatprep.mubr.f32.mxu1 %v6399_v17 }
 0x214   : > { %1252 = vmatprep.mubr.f32.mxu0 %v6002_v1  ;;  %4358 = vmatpush1.bf16.msra.mxu0 %v4357_v10  ;;  %v4363_v1 = vpack.c.bf16 %v878_v5, %v877_v8  ;;  %v680_v10 = vrot.slane %v6053_v49, 2  ;;  %v687_v8 = vrot.slane %v6099_v48, 2  ;;  %v884_v5 = vld [vmem:[#allocation7 + $0x2a8] sm:$0xff] }
 0x215   : > { %4359 = vmatprep.subr.bf16.mxu0 %v7926_v9 }
 0x216   : > { %4148 = vmatmul.mubr.f32.gmra.mrb[34].mxu1 %v6407_v16  ;;  %v6426_v13 = vsel %vm650_vm1, %v679_v60, %v680_v10  ;;  %v6434_v39 = vsel %vm650_vm1, %v680_v10, %v682_v55  ;;  %v6448_v15 = vsel %vm650_vm1, %v686_v56, %v687_v8  ;;  %v886_v60 = vld [vmem:[#allocation7 + $0x2b8] sm:$0xff] }
 0x217   : > { %1253 = vmatmul.mubr.f32.gmra.mrb[12].mxu0 %v6389_v32  ;;  %4150 = vmatprep.mubr.f32.mxu1 %v6412_v29 }
 0x218   : > { %1257 = vmatprep.mubr.f32.mxu0 %v6007_v4  ;;  %4361 = vmatpush1.bf16.msra.mxu0 %v4360_v37  ;;  %v4366_v4 = vpack.c.bf16 %v880_v12, %v879_v19  ;;  %v684_v37 = vrot.slane %v6082_v22, 2  ;;  %v883_v22 = vld [vmem:[#allocation7 + $0x2a0] sm:$0xff]  ;;  %v691_v19 = vrot.slane %v6128_v46, 2  ;;  %v885_v12 = vld [vmem:[#allocation7 + $0x2b0] sm:$0xff] }
 0x219   : > { %4362 = vmatprep.subr.bf16.mxu0 %v7926_v9  ;;  %v4375_v46 = vpack.c.bf16 %v886_v60, %v885_v12  ;;  %v890_v12 = vld [vmem:[#allocation7 + $0x2d8] sm:$0xff] }
 0x21a   : > { %4151 = vmatmul.mubr.f32.gmra.mrb[36].mxu1 %v6421_v33  ;;  %v6440_v26 = vsel %vm650_vm1, %v682_v55, %v684_v37  ;;  %v887_v37 = vld [vmem:[#allocation7 + $0x2c0] sm:$0xff] }
 0x21b   : > { %1258 = vmatmul.mubr.f32.gmra.mrb[14].mxu0 %v6392_v47  ;;  %4153 = vmatprep.mubr.f32.mxu1 %v6426_v13 }
 0x21c   : > { %1262 = vmatprep.mubr.f32.mxu0 %v6022_v20  ;;  %4364 = vmatpush1.bf16.msra.mxu0 %v4363_v1  ;;  %v4369_v20 = vpack.c.bf16 %v882_v57, %v881_v52  ;;  %v689_v1 = vrot.slane %v6114_v11, 2  ;;  %v6465_v52 = vld [vmem:[%s5843_s23 + $0xd0] sm:$0xff] }
 0x21d   : > { %4365 = vmatprep.subr.bf16.mxu0 %v7926_v9  ;;  %v696_v57 = vrot.slane %v6465_v52, 2 }
 0x21e   : > { %4154 = vmatmul.mubr.f32.gmra.mrb[38].mxu1 %v6434_v39  ;;  %v6453_v10 = vsel %vm650_vm1, %v687_v8, %v689_v1  ;;  %v6462_v55 = vsel %vm650_vm1, %v689_v1, %v691_v19  ;;  %v5009_v8 = vld [vmem:[%s5843_s23 + $0xd8] sm:$0x3]  ;;  %v700_v1 = vrot.slane %v6179_v38, 2  ;;  %v889_v19 = vld [vmem:[#allocation7 + $0x2d0] sm:$0xff] }
 0x21f   : > { %1263 = vmatmul.mubr.f32.gmra.mrb[16].mxu0 %v6399_v17  ;;  %4156 = vmatprep.mubr.f32.mxu1 %v6440_v26 }
 0x220   : > { %1267 = vmatprep.mubr.f32.mxu0 %v6048_v45  ;;  %4367 = vmatpush1.bf16.msra.mxu0 %v4366_v4  ;;  %v4372_v45 = vpack.c.bf16 %v884_v5, %v883_v22  ;;  %v693_v4 = vrot.slane %v6140_v18, 2  ;;  %v698_v22 = vrot.slane %v5009_v8, 2  ;;  %v707_v8 = vrot.slane %v6215_v44, 2 }
 0x221   : > { %4368 = vmatprep.subr.bf16.mxu0 %v7926_v9 }
 0x222   : > { %4157 = vmatmul.mubr.f32.gmra.mrb[40].mxu1 %v6448_v15  ;;  %v6484_v60 = vsel %vm650_vm1, %v696_v57, %v698_v22  ;;  %v708_v22 = vrot.slane %v6218_v34, 2 }
 0x223   : > { %1268 = vmatmul.mubr.f32.gmra.mrb[18].mxu0 %v6407_v16  ;;  %4159 = vmatprep.mubr.f32.mxu1 %v6453_v10 }
 0x224   : > { %1272 = vmatprep.mubr.f32.mxu0 %v6053_v49  ;;  %4370 = vmatpush1.bf16.msra.mxu0 %v4369_v20  ;;  %v694_v49 = vrot.slane %v6145_v21, 2  ;;  %v888_v20 = vld [vmem:[#allocation7 + $0x2c8] sm:$0xff] }
 0x225   : > { %4371 = vmatprep.subr.bf16.mxu0 %v7926_v9 }
 0x226   : > { %v6470_v56 = vsel %vm650_vm1, %v693_v4, %v694_v49  ;;  %4160 = vmatmul.mubr.f32.gmra.mrb[42].mxu1 %v6462_v55  ;;  %v6478_v5 = vsel %vm650_vm1, %v694_v49, %v696_v57  ;;  %v703_v4 = vrot.slane %v6193_v51, 2  ;;  %v891_v57 = vld [vmem:[#allocation7 + $0x2e0] sm:$0xff] }
 0x227   : > { %1273 = vmatmul.mubr.f32.gmra.mrb[20].mxu0 %v6412_v29  ;;  %4162 = vmatprep.mubr.f32.mxu1 %v6470_v56 }
 0x228   : > { %1277 = vmatprep.mubr.f32.mxu0 %v6068_v3  ;;  %4373 = vmatpush1.bf16.msra.mxu0 %v4372_v45  ;;  %v4378_v3 = vpack.c.bf16 %v888_v20, %v887_v37  ;;  %v701_v45 = vrot.slane %v6182_v2, 2  ;;  %v892_v37 = vld [vmem:[#allocation7 + $0x2e8] sm:$0xff] }
 0x229   : > { %4374 = vmatprep.subr.bf16.mxu0 %v7926_v9 }
 0x22a   : > { %4163 = vmatmul.mubr.f32.gmra.mrb[44].mxu1 %v6478_v5  ;;  %v6492_v49 = vsel %vm650_vm1, %v700_v1, %v701_v45  ;;  %v6497_v20 = vsel %vm650_vm1, %v701_v45, %v703_v4  ;;  %v893_v1 = vld [vmem:[#allocation7 + $0x2f0] sm:$0xff]  ;;  %v894_v45 = vld [vmem:[#allocation7 + $0x2f8] sm:$0xff] }
 0x22b   : > { %1278 = vmatmul.mubr.f32.gmra.mrb[22].mxu0 %v6421_v33  ;;  %4165 = vmatprep.mubr.f32.mxu1 %v6484_v60 }
 0x22c   : > { %1282 = vmatprep.mubr.f32.mxu0 %v6094_v41  ;;  %4376 = vmatpush1.bf16.msra.mxu0 %v4375_v46  ;;  %v4381_v41 = vpack.c.bf16 %v890_v12, %v889_v19  ;;  %v705_v46 = vrot.slane %v6204_v63, 2  ;;  %v6511_v19 = vsel %vm650_vm1, %v707_v8, %v708_v22  ;;  %v712_v12 = vrot.slane %v6241_v25, 2 }
 0x22d   : > { %4377 = vmatprep.subr.bf16.mxu0 %v7926_v9 }
 0x22e   : > { %4166 = vmatmul.mubr.f32.gmra.mrb[46].mxu1 %v6492_v49  ;;  %v6506_v63 = vsel %vm650_vm1, %v703_v4, %v705_v46  ;;  %v715_v46 = vrot.slane %v6255_v27, 2 }
 0x22f   : > { %1283 = vmatmul.mubr.f32.gmra.mrb[24].mxu0 %v6426_v13  ;;  %4168 = vmatprep.mubr.f32.mxu1 %v6497_v20 }
 0x230   : > { %1287 = vmatprep.mubr.f32.mxu0 %v6099_v48  ;;  %4379 = vmatpush1.bf16.msra.mxu0 %v4378_v3  ;;  %v4384_v48 = vpack.c.bf16 %v892_v37, %v891_v57  ;;  %v710_v3 = vrot.slane %v6230_v31, 2  ;;  %v717_v57 = vrot.slane %v6267_v61, 2  ;;  %v719_v37 = vrot.slane %v6278_v36, 2 }
 0x231   : > { %4380 = vmatprep.subr.bf16.mxu0 %v7926_v9  ;;  %v765_v36 = vrot.slane %v6298_v35, 2 }
 0x232   : > { %4169 = vmatmul.mubr.f32.gmra.mrb[48].mxu1 %v6506_v63  ;;  %v6519_v4 = vsel %vm650_vm1, %v708_v22, %v710_v3  ;;  %v6525_v25 = vsel %vm650_vm1, %v710_v3, %v712_v12  ;;  %v6538_v8 = vsel %vm650_vm1, %v715_v46, %v717_v57  ;;  %v790_v22 = vrot.slane %v6339_v14, 2  ;;  %v7931_v3 = vld [vmem:[#allocation35_spill] sm:$0xff]  ;;  %v7933_v12 = vld [vmem:[#allocation37_spill] sm:$0xff] }
 0x233   : > { %1288 = vmatmul.mubr.f32.gmra.mrb[26].mxu0 %v6434_v39  ;;  %4171 = vmatprep.mubr.f32.mxu1 %v6511_v19 }
 0x234   : > { %1292 = vmatprep.mubr.f32.mxu0 %v6114_v11  ;;  %4382 = vmatpush1.bf16.msra.mxu0 %v4381_v41  ;;  %v4387_v11 = vpack.c.bf16 %v894_v45, %v893_v1  ;;  %v714_v41 = vrot.slane %v6252_v7, 2  ;;  %v2135_v1 = vld [vmem:[%s5851_s18 + $0x68] sm:$0xff]  ;;  %v2136_v45 = vld [vmem:[%s5851_s18 + $0x70] sm:$0xff] }
 0x235   : > { %4383 = vmatprep.subr.bf16.mxu0 %v7926_v9 }
 0x236   : > { %4172 = vmatmul.mubr.f32.gmra.mrb[50].mxu1 %v6519_v4 }
 0x237   : > { %1293 = vmatmul.mubr.f32.gmra.mrb[28].mxu0 %v6440_v26  ;;  %4174 = vmatprep.mubr.f32.mxu1 %v6525_v25 }
 0x238   : > { %1297 = vmatprep.mubr.f32.mxu0 %v6140_v18  ;;  %4385 = vmatpush1.bf16.msra.mxu0 %v4384_v48  ;;  %v6533_v18 = vsel %vm650_vm1, %v714_v41, %v715_v46  ;;  %v7935_v41 = vld [vmem:[#allocation39_spill] sm:$0xff]  ;;  %v7936_v46 = vld [vmem:[#allocation38_spill] sm:$0xff] }
 0x239   : > { %4386 = vmatprep.subr.bf16.mxu0 %v7926_v9 }
 0x23a   : > { %4175 = vmatmul.mubr.f32.gmra.mrb[52].mxu1 %v6533_v18 }
 0x23b   : > { %1298 = vmatmul.mubr.f32.gmra.mrb[30].mxu0 %v6448_v15  ;;  %4177 = vmatprep.mubr.f32.mxu1 %v6538_v8 }
 0x23c   : > { %1302 = vmatprep.mubr.f32.mxu0 %v6145_v21  ;;  %4388 = vmatpush1.bf16.msra.mxu0 %v4387_v11  ;;  %v6545_v21 = vsel %vm650_vm1, %v717_v57, %v719_v37  ;;  %v2137_v11 = vld [vmem:[%s5851_s18 + $0x78] sm:$0xff]  ;;  %v7937_v57 = vld [vmem:[#allocation41_spill] sm:$0xff] }
 0x23d   : > { %4389 = vmatprep.subr.bf16.mxu0 %v7926_v9  ;;  %v7938_v37 = vld [vmem:[#allocation40_spill] sm:$0xff] }
 0x23e   : > { %4178 = vmatmul.mubr.f32.gmra.mrb[54].mxu1 %v6545_v21 }
 0x23f   : > { %1303 = vmatmul.mubr.f32.gmra.mrb[32].mxu0 %v6453_v10 }
 0x240   : > { %1307 = vmatprep.mubr.f32.mxu0 %v6465_v52  ;;  %v768_v52 = vrot.slane %v6312_v43, 2 }
 0x243   : > { %1308 = vmatmul.mubr.f32.gmra.mrb[34].mxu0 %v6462_v55 }
 0x244   : > { %1312 = vmatprep.mubr.f32.mxu0 %v6179_v38  ;;  %v766_v38 = vrot.slane %v6301_v0, 2 }
 0x247   : > { %1313 = vmatmul.mubr.f32.gmra.mrb[36].mxu0 %v6470_v56 }
 0x248   : > { %1317 = vmatprep.mubr.f32.mxu0 %v6182_v2  ;;  %v6562_v2 = vsel %vm650_vm1, %v765_v36, %v766_v38  ;;  %v7939_v36 = vld [vmem:[#allocation43_spill] sm:$0xff] }
 0x249   : > { %4180 = vmatprep.mubr.f32.mxu1 %v6562_v2 }
 0x24b   : > { %1318 = vmatmul.mubr.f32.gmra.mrb[38].mxu0 %v6478_v5 }
 0x24c   : > { %1322 = vmatprep.mubr.f32.mxu0 %v6193_v51  ;;  %v6567_v51 = vsel %vm650_vm1, %v766_v38, %v768_v52  ;;  %v7940_v38 = vld [vmem:[#allocation42_spill] sm:$0xff] }
 0x24d   : > { %4181 = vmatmul.mubr.f32.gmra.mrb[56].mxu1 %v6567_v51 }
 0x24f   : > { %1323 = vmatmul.mubr.f32.gmra.mrb[40].mxu0 %v6484_v60 }
 0x250   : > { %1327 = vmatprep.mubr.f32.mxu0 %v6215_v44  ;;  %v789_v44 = vrot.slane %v6336_v54, 2 }
 0x253   : > { %1328 = vmatmul.mubr.f32.gmra.mrb[42].mxu0 %v6492_v49 }
 0x254   : > { %1332 = vmatprep.mubr.f32.mxu0 %v6218_v34  ;;  %v770_v34 = vrot.slane %v6324_v58, 2  ;;  %v794_v58 = vrot.slane %v6364_v23, 2  ;;  %v2126_v23 = vld [vmem:[%s5851_s18 + $0x20] sm:$0xff] }
 0x256   : > { %v6577_v48 = vsel %vm650_vm1, %v768_v52, %v770_v34  ;;  %v7941_v52 = vld [vmem:[#allocation45_spill] sm:$0xff]  ;;  %v7942_v34 = vld [vmem:[#allocation44_spill] sm:$0xff] }
 0x257   : > { %1333 = vmatmul.mubr.f32.gmra.mrb[44].mxu0 %v6497_v20  ;;  %4183 = vmatprep.mubr.f32.mxu1 %v6577_v48 }
 0x258   : > { %1337 = vmatprep.mubr.f32.mxu0 %v6230_v31  ;;  %v791_v31 = vsel %vm650_vm1, %v789_v44, %v790_v22  ;;  %v7943_v44 = vld [vmem:[#allocation47_spill] sm:$0xff] }
 0x259   : > { %4184 = vmatmul.mubr.f32.gmra.mrb[58].mxu1 %v791_v31  ;;  %v2143_v31 = vld [vmem:[%s5851_s18 + $0xa8] sm:$0xff] }
 0x25b   : > { %1338 = vmatmul.mubr.f32.gmra.mrb[46].mxu0 %v6506_v63 }
 0x25c   : > { %1342 = vmatprep.mubr.f32.mxu0 %v6252_v7  ;;  %v792_v7 = vrot.slane %v6351_v53, 2  ;;  %v2123_v53 = vld [vmem:[%s5851_s18 + $0x8] sm:$0xff] }
 0x25e   : > { %v793_v54 = vsel %vm650_vm1, %v790_v22, %v792_v7  ;;  %v795_v14 = vsel %vm650_vm1, %v792_v7, %v794_v58  ;;  %v7944_v22 = vld [vmem:[#allocation46_spill] sm:$0xff]  ;;  %v7945_v7 = vld [vmem:[#allocation49_spill] sm:$0xff]  ;;  %v7946_v58 = vld [vmem:[#allocation48_spill] sm:$0xff] }
 0x25f   : > { %1343 = vmatmul.mubr.f32.gmra.mrb[48].mxu0 %v6511_v19  ;;  %4186 = vmatprep.mubr.f32.mxu1 %v793_v54  ;;  %v2145_v54 = vld [vmem:[%s5851_s18 + $0xb8] sm:$0xff] }
 0x260   : > { %1347 = vmatprep.mubr.f32.mxu0 %v6255_v27  ;;  %4187 = vmatmul.mubr.f32.gmra.mrb[60].mxu1 %v795_v14  ;;  %v5409_v27 = vmov 0  }
 0x261   : > { %5006 = vset.pattern.permute.xlu0 %v5409_v27  ;;  %5007 = vset.pattern.permute.xlu1 %v5409_v27 }
 0x263   : > { %1348 = vmatmul.mubr.f32.gmra.mrb[50].mxu0 %v6519_v4 }
 0x264   : > { %1352 = vmatprep.mubr.f32.mxu0 %v6267_v61  ;;  %v2122_v61 = vld [vmem:[%s5851_s18] sm:$0xff] }
 0x265   : > { %2154 = vperm.xlu0 %5006, %v2122_v61   ;;  %v7947_v61 = vld [vmem:[#allocation51_spill] sm:$0xff] }
 0x267   : > { %1353 = vmatmul.mubr.f32.gmra.mrb[52].mxu0 %v6525_v25 }
 0x268   : > { %1357 = vmatprep.mubr.f32.mxu0 %v6298_v35  ;;  %v2124_v35 = vld [vmem:[%s5851_s18 + $0x10] sm:$0xff] }
 0x269   : > { %2164 = vperm.xlu1 %5007, %v2124_v35   ;;  %2159 = vperm.xlu0 %5006, %v2123_v53   ;;  %v7948_v35 = vld [vmem:[#allocation50_spill] sm:$0xff] }
 0x26a   : > { %v2147_v53 = vld [vmem:[%s5851_s18 + $0xc8] sm:$0xff] }
 0x26b   : > { %1358 = vmatmul.mubr.f32.gmra.mrb[54].mxu0 %v6533_v18 }
 0x26c   : > { %1362 = vmatprep.mubr.f32.mxu0 %v6301_v0  ;;  %v2125_v0 = vld [vmem:[%s5851_s18 + $0x18] sm:$0xff] }
 0x26d   : > { %2169 = vperm.xlu1 %5007, %v2125_v0   ;;  %2174 = vperm.xlu0 %5006, %v2126_v23   ;;  %v7949_v23 = vld [vmem:[#allocation53_spill] sm:$0xff] }
 0x26f   : > { %1363 = vmatmul.mubr.f32.gmra.mrb[56].mxu0 %v6538_v8 }
 0x270   : > { %1367 = vmatprep.mubr.f32.mxu0 %v6312_v43  ;;  %v2127_v43 = vld [vmem:[%s5851_s18 + $0x28] sm:$0xff] }
 0x271   : > { %2179 = vperm.xlu1 %5007, %v2127_v43   ;;  %v2148_v43 = vld [vmem:[%s5851_s18 + $0xd0] sm:$0xff] }
 0x273   : > { %1368 = vmatmul.mubr.f32.gmra.mrb[58].mxu0 %v6545_v21 }
 0x274   : > { %1437 = vmatprep.mubr.f32.mxu0 %v6355_v6  ;;  %v2128_v6 = vld [vmem:[%s5851_s18 + $0x30] sm:$0xff] }
 0x275   : > { %2184 = vperm.xlu0 %5006, %v2128_v6   ;;  %v7950_v6 = vld [vmem:[#allocation52_spill] sm:$0xff] }
 0x277   : > { %1438 = vmatmul.mubr.f32.vlgmr.msra.gmra.mrb[0].mxu0 %v5945_v24  ;;  %v2129_v24 = vld [vmem:[%s5851_s18 + $0x38] sm:$0xff] }
 0x278   : > { %4391 = vmatpush1.bf16.msra.mxu0 %v5965_v40  ;;  %1442 = vmatprep.mubr.f32.mxu0 %v6368_v62  ;;  %v2130_v40 = vld [vmem:[%s5851_s18 + $0x40] sm:$0xff]  ;;  %v2132_v62 = vld [vmem:[%s5851_s18 + $0x50] sm:$0xff] }
 0x279   : > { %4392 = vmatprep.subr.bf16.mxu0 %v7926_v9  ;;  %2189 = vperm.xlu1 %5007, %v2129_v24   ;;  %v2149_v24 = vld [vmem:[%s5851_s18 + $0xd8] sm:$0xff] }
 0x27a   : > { %2194 = vperm.xlu0 %5006, %v2130_v40  }
 0x27b   : > { %1443 = vmatmul.mubr.f32.gmra.mrb[2].mxu0 %v5954_v30  ;;  %v7928_v30 = vld [vmem:[#allocation31_spill] sm:$0xff] }
 0x27c   : > { %1447 = vmatprep.mubr.f32.mxu0 %v6378_v28  ;;  %4394 = vmatpush1.bf16.msra.mxu0 %v5980_v50  ;;  %v2131_v50 = vld [vmem:[%s5851_s18 + $0x48] sm:$0xff] }
 0x27d   : > { %4395 = vmatprep.subr.bf16.mxu0 %v7926_v9  ;;  %2199 = vperm.xlu1 %5007, %v2131_v50   ;;  %v7930_v28 = vld [vmem:[#allocation32_spill] sm:$0xff]  ;;  %v7951_v50 = vld [vmem:[#allocation55_spill] sm:$0xff] }
 0x27e   : > { %2204 = vperm.xlu0 %5006, %v2132_v62   ;;  %v2150_v62 = vld [vmem:[%s5851_s18 + $0xe0] sm:$0xff] }
 0x27f   : > { %1448 = vmatmul.mubr.f32.gmra.mrb[4].mxu0 %v5969_v42  ;;  %v7929_v42 = vld [vmem:[#allocation33_spill] sm:$0xff] }
 0x280   : > { %1452 = vmatprep.mubr.f32.mxu0 %v6389_v32  ;;  %4397 = vmatpush1.bf16.msra.mxu0 %v5994_v59  ;;  %v2133_v59 = vld [vmem:[%s5851_s18 + $0x58] sm:$0xff]  ;;  %v2134_v32 = vld [vmem:[%s5851_s18 + $0x60] sm:$0xff] }
 0x281   : > { %4398 = vmatprep.subr.bf16.mxu0 %v7926_v9  ;;  %2209 = vperm.xlu1 %5007, %v2133_v59   ;;  %v2151_v59 = vld [vmem:[%s5851_s18 + $0xe8] sm:$0xff] }
 0x282   : > { %2214 = vperm.xlu0 %5006, %v2134_v32  }
 0x283   : > { %1453 = vmatmul.mubr.f32.gmra.mrb[6].mxu0 %v7928_v30 }
 0x284   : > { %1457 = vmatprep.mubr.f32.mxu0 %v6392_v47  ;;  %4400 = vmatpush1.bf16.msra.mxu0 %v7929_v42  ;;  %v7932_v47 = vld [vmem:[#allocation34_spill] sm:$0xff] }
 0x285   : > { %4401 = vmatprep.subr.bf16.mxu0 %v7926_v9  ;;  %2219 = vperm.xlu1 %5007, %v2135_v1   ;;  %v7952_v42 = vld [vmem:[#allocation54_spill] sm:$0xff] }
 0x286   : > { %2224 = vperm.xlu0 %5006, %v2136_v45  }
 0x287   : > { %1458 = vmatmul.mubr.f32.gmra.mrb[8].mxu0 %v7930_v28 }
 0x288   : > { %1462 = vmatprep.mubr.f32.mxu0 %v6399_v17  ;;  %4403 = vmatpush1.bf16.msra.mxu0 %v7931_v3  ;;  %v7934_v17 = vld [vmem:[#allocation36_spill] sm:$0xff]  ;;  %v7953_v3 = vld [vmem:[#allocation57_spill] sm:$0xff] }
 0x289   : > { %4404 = vmatprep.subr.bf16.mxu0 %v7926_v9  ;;  %2229 = vperm.xlu1 %5007, %v2137_v11  }
 0x28b   : > { %1463 = vmatmul.mubr.f32.gmra.mrb[10].mxu0 %v7932_v47 }
 0x28c   : > { %1467 = vmatprep.mubr.f32.mxu0 %v6407_v16  ;;  %4406 = vmatpush1.bf16.msra.mxu0 %v7933_v12  ;;  %v2138_v16 = vld [vmem:[%s5851_s18 + $0x80] sm:$0xff]  ;;  %v7955_v12 = vld [vmem:[#allocation30_spill] sm:$0xff] }
 0x28d   : > { %4407 = vmatprep.subr.bf16.mxu0 %v7926_v9  ;;  %2234 = vperm.xlu0 %5006, %v2138_v16  }
 0x28f   : > { %1468 = vmatmul.mubr.f32.gmra.mrb[12].mxu0 %v7934_v17 }
 0x290   : > { %1472 = vmatprep.mubr.f32.mxu0 %v6412_v29  ;;  %4409 = vmatpush1.bf16.msra.mxu0 %v7935_v41  ;;  %v2139_v29 = vld [vmem:[%s5851_s18 + $0x88] sm:$0xff] }
 0x291   : > { %4410 = vmatprep.subr.bf16.mxu0 %v7926_v9  ;;  %2239 = vperm.xlu1 %5007, %v2139_v29   ;;  %v7957_v29 = vld [vmem:[#allocation59_spill] sm:$0xff] }
 0x293   : > { %1473 = vmatmul.mubr.f32.gmra.mrb[14].mxu0 %v7936_v46 }
 0x294   : > { %1477 = vmatprep.mubr.f32.mxu0 %v6421_v33  ;;  %4412 = vmatpush1.bf16.msra.mxu0 %v7937_v57  ;;  %v2140_v33 = vld [vmem:[%s5851_s18 + $0x90] sm:$0xff] }
 0x295   : > { %4413 = vmatprep.subr.bf16.mxu0 %v7926_v9  ;;  %2244 = vperm.xlu0 %5006, %v2140_v33   ;;  %v7958_v33 = vld [vmem:[#allocation60_spill] sm:$0xff] }
 0x297   : > { %1478 = vmatmul.mubr.f32.gmra.mrb[16].mxu0 %v7938_v37 }
 0x298   : > { %1482 = vmatprep.mubr.f32.mxu0 %v6426_v13  ;;  %4415 = vmatpush1.bf16.msra.mxu0 %v7939_v36  ;;  %v2141_v13 = vld [vmem:[%s5851_s18 + $0x98] sm:$0xff] }
 0x299   : > { %4416 = vmatprep.subr.bf16.mxu0 %v7926_v9  ;;  %2249 = vperm.xlu1 %5007, %v2141_v13   ;;  %v7959_v13 = vld [vmem:[#allocation61_spill] sm:$0xff] }
 0x29b   : > { %1483 = vmatmul.mubr.f32.gmra.mrb[18].mxu0 %v7940_v38 }
 0x29c   : > { %1487 = vmatprep.mubr.f32.mxu0 %v6434_v39  ;;  %4418 = vmatpush1.bf16.msra.mxu0 %v7941_v52  ;;  %v2142_v39 = vld [vmem:[%s5851_s18 + $0xa0] sm:$0xff] }
 0x29d   : > { %4419 = vmatprep.subr.bf16.mxu0 %v7926_v9  ;;  %2254 = vperm.xlu0 %5006, %v2142_v39   ;;  %v7960_v39 = vld [vmem:[#allocation62_spill] sm:$0xff] }
 0x29e   : > { %2259 = vperm.xlu1 %5007, %v2143_v31  }
 0x29f   : > { %1488 = vmatmul.mubr.f32.gmra.mrb[20].mxu0 %v7942_v34 }
 0x2a0   : > { %1492 = vmatprep.mubr.f32.mxu0 %v6440_v26  ;;  %4421 = vmatpush1.bf16.msra.mxu0 %v7943_v44  ;;  %v2144_v26 = vld [vmem:[%s5851_s18 + $0xb0] sm:$0xff] }
 0x2a1   : > { %4422 = vmatprep.subr.bf16.mxu0 %v7926_v9  ;;  %2264 = vperm.xlu0 %5006, %v2144_v26  }
 0x2a2   : > { %2269 = vperm.xlu1 %5007, %v2145_v54   ;;  %v7962_v54 = vld [vmem:[#allocation64_spill] sm:$0xff] }
 0x2a3   : > { %1493 = vmatmul.mubr.f32.gmra.mrb[22].mxu0 %v7944_v22 }
 0x2a4   : > { %1497 = vmatprep.mubr.f32.mxu0 %v6448_v15  ;;  %4424 = vmatpush1.bf16.msra.mxu0 %v7945_v7  ;;  %v6670_v14 = vpop.f32.mrb[0].mxu1  ;;  %v2146_v15 = vld [vmem:[%s5851_s18 + $0xc0] sm:$0xff]  ;;  %s5258_s18 = sshll.u32 %s5410_s11, 4  ;;  %s5259_s18 = int_to_ptr.vmem [resolvable:$false] %s5258_s18 }
 0x2a5   : > { %4425 = vmatprep.subr.bf16.mxu0 %v7926_v9  ;;  %v1726_v27 = vpop.f32.mrb[1].mxu1  ;;  %2274 = vperm.xlu0 %5006, %v2146_v15   ;;  %v7961_v7 = vld [vmem:[#allocation63_spill] sm:$0xff]  ;;  %s5260_s16 = scalar_lea.vmem %s5259_s18, 4096  ;;  %p5261_p4 = scmp.lt.s32.totalorder %s7684_s5, %s5259_s18 }
 0x2a6   : > { %2279 = vperm.xlu1 %5007, %v2147_v53   ;;  %v7963_v27 = vld [vmem:[#allocation65_spill] sm:$0xff]  ;;  %v7964_v53 = vld [vmem:[#allocation66_spill] sm:$0xff]  ;;  %p5262_p9 = scmp.lt.s32.totalorder %s5260_s16, %s5254_s27 }
 0x2a7   : > { %1498 = vmatmul.mubr.f32.gmra.mrb[24].mxu0 %v7946_v58 }
 0x2a8   : > { %1502 = vmatprep.mubr.f32.mxu0 %v6453_v10  ;;  %4427 = vmatpush1.bf16.msra.mxu0 %v7947_v61  ;;  %v6678_v0 = vpop.f32.mrb[2].mxu1  ;;  %p5263_p12 = por %p5262_p9, %p5261_p4 }
 0x2a9   : > { %4428 = vmatprep.subr.bf16.mxu0 %v7926_v9  ;;  %v1731_v10 = vpop.f32.mrb[3].mxu1  ;;  %2284 = vperm.xlu0 %5006, %v2148_v43  }
 0x2aa   : > { %2289 = vperm.xlu1 %5007, %v2149_v24   ;;  %v7965_v10 = vld [vmem:[#allocation67_spill] sm:$0xff]  ;;  %p5264_p7 = pnand %p5263_p12, %p5257_p8 }
 0x2ab   : > { %1503 = vmatmul.mubr.f32.gmra.mrb[26].mxu0 %v7948_v35 }
 0x2ac   : > { %1507 = vmatprep.mubr.f32.mxu0 %v6462_v55  ;;  %4430 = vmatpush1.bf16.msra.mxu0 %v7949_v23  ;;  %v6686_v40 = vpop.f32.mrb[4].mxu1 }
 0x2ad   : > { %4431 = vmatprep.subr.bf16.mxu0 %v7926_v9  ;;  %v1736_v55 = vpop.f32.mrb[5].mxu1  ;;  %2294 = vperm.xlu0 %5006, %v2150_v62   ;;  %v5010_v62 = vld [vmem:[%s5843_s23 + $0x40] sm:$0xff] }
 0x2ae   : > { %2299 = vperm.xlu1 %5007, %v2151_v59  }
 0x2af   : > { %1508 = vmatmul.mubr.f32.gmra.mrb[28].mxu0 %v7950_v6 }
 0x2b0   : > { %1512 = vmatprep.mubr.f32.mxu0 %v6470_v56  ;;  %4433 = vmatpush1.bf16.msra.mxu0 %v7951_v50  ;;  %v6694_v32 = vpop.f32.mrb[6].mxu1  ;;  %v7954_v56 = vld [vmem:[#allocation56_spill] sm:$0xff] }
 0x2b1   : > { %4434 = vmatprep.subr.bf16.mxu0 %v7926_v9  ;;  %v1741_v1 = vpop.f32.mrb[7].mxu1 }
 0x2b3   : > { %1513 = vmatmul.mubr.f32.gmra.mrb[30].mxu0 %v7952_v42 }
 0x2b4   : > { %1517 = vmatprep.mubr.f32.mxu0 %v6478_v5  ;;  %4436 = vmatpush1.bf16.msra.mxu0 %v7953_v3  ;;  %v6699_v45 = vpop.f32.mrb[8].mxu1  ;;  %v7956_v5 = vld [vmem:[#allocation58_spill] sm:$0xff] }
 0x2b5   : > { %v1746_v9 = vpop.f32.mrb[9].mxu1  ;;  %v5011_v3 = vld [vmem:[%s5843_s23 + $0x48] sm:$0xff] }
 0x2b6   : > { %v5012_v9 = vld [vmem:[%s5843_s23 + $0x50] sm:$0xff] }
 0x2b7   : > { %1518 = vmatmul.mubr.f32.gmra.mrb[32].mxu0 %v7954_v56 }
 0x2b8   : > { %1522 = vmatprep.mubr.f32.mxu0 %v6484_v60  ;;  %v6703_v11 = vpop.f32.mrb[10].mxu1 }
 0x2b9   : > { %v1751_v41 = vpop.f32.mrb[11].mxu1 }
 0x2ba   : > { %v5013_v41 = vld [vmem:[%s5843_s23 + $0x60] sm:$0xff] }
 0x2bb   : > { %1523 = vmatmul.mubr.f32.gmra.mrb[34].mxu0 %v7955_v12 }
 0x2bc   : > { %1527 = vmatprep.mubr.f32.mxu0 %v6492_v49  ;;  %v6707_v16 = vpop.f32.mrb[12].mxu1 }
 0x2bd   : > { %v1756_v57 = vpop.f32.mrb[13].mxu1 }
 0x2be   : > { %v5014_v57 = vld [vmem:[%s5843_s23 + $0x68] sm:$0xff] }
 0x2bf   : > { %1528 = vmatmul.mubr.f32.gmra.mrb[36].mxu0 %v7956_v5 }
 0x2c0   : > { %1532 = vmatprep.mubr.f32.mxu0 %v6497_v20  ;;  %v6711_v36 = vpop.f32.mrb[14].mxu1 }
 0x2c1   : > { %v1761_v60 = vpop.f32.mrb[15].mxu1 }
 0x2c2   : > { %v5015_v60 = vld [vmem:[%s5843_s23 + $0x70] sm:$0xff] }
 0x2c3   : > { %1533 = vmatmul.mubr.f32.gmra.mrb[38].mxu0 %v7957_v29 }
 0x2c4   : > { %1537 = vmatprep.mubr.f32.mxu0 %v6506_v63  ;;  %v6715_v52 = vpop.f32.mrb[16].mxu1 }
 0x2c5   : > { %v1766_v49 = vpop.f32.mrb[17].mxu1 }
 0x2c6   : > { %v5016_v49 = vld [vmem:[%s5843_s23 + $0x80] sm:$0xff] }
 0x2c7   : > { %1538 = vmatmul.mubr.f32.gmra.mrb[40].mxu0 %v7958_v33 }
 0x2c8   : > { %1542 = vmatprep.mubr.f32.mxu0 %v6511_v19  ;;  %v6719_v44 = vpop.f32.mrb[18].mxu1 }
 0x2c9   : > { %v1771_v20 = vpop.f32.mrb[19].mxu1 }
 0x2cb   : > { %1543 = vmatmul.mubr.f32.gmra.mrb[42].mxu0 %v7959_v13 }
 0x2cc   : > { %1547 = vmatprep.mubr.f32.mxu0 %v6519_v4  ;;  %v6723_v31 = vpop.f32.mrb[20].mxu1 }
 0x2cd   : > { %v1776_v63 = vpop.f32.mrb[21].mxu1 }
 0x2cf   : > { %1548 = vmatmul.mubr.f32.gmra.mrb[44].mxu0 %v7960_v39  ;;  %v5018_v39 = vld [vmem:[%s5843_s23 + $0x90] sm:$0xff] }
 0x2d0   : > { %1552 = vmatprep.mubr.f32.mxu0 %v6525_v25  ;;  %v6728_v19 = vpop.f32.mrb[22].mxu1 }
 0x2d1   : > { %v1781_v26 = vpop.f32.mrb[23].mxu1 }
 0x2d3   : > { %1553 = vmatmul.mubr.f32.gmra.mrb[46].mxu0 %v7961_v7  ;;  %v5020_v7 = vld [vmem:[%s5843_s23 + $0xa8] sm:$0xff] }
 0x2d4   : > { %1557 = vmatprep.mubr.f32.mxu0 %v6533_v18  ;;  %v6732_v4 = vpop.f32.mrb[24].mxu1 }
 0x2d5   : > { %v1786_v61 = vpop.f32.mrb[25].mxu1 }
 0x2d6   : > { %v5023_v61 = vld [vmem:[%s5843_s23 + $0xc8] sm:$0xff] }
 0x2d7   : > { %1558 = vmatmul.mubr.f32.gmra.mrb[48].mxu0 %v7962_v54  ;;  %v5022_v54 = vld [vmem:[%s5843_s23 + $0xc0] sm:$0xff] }
 0x2d8   : > { %1562 = vmatprep.mubr.f32.mxu0 %v6538_v8 }
 0x2d9   : > { %v6736_v25 = vpop.f32.mrb[26].mxu1 }
 0x2da   : > { %v1791_v15 = vpop.f32.mrb[27].mxu1 }
 0x2db   : > { %1563 = vmatmul.mubr.f32.gmra.mrb[50].mxu0 %v7963_v27  ;;  %v2518_v15 = vld [vmem:[#allocation11 + $0x80] sm:$0xff] }
 0x2dc   : > { %1567 = vmatprep.mubr.f32.mxu0 %v6545_v21  ;;  %v7966_v21 = vld [vmem:[#allocation68_spill] sm:$0xff] }
 0x2dd   : > { %v6740_v18 = vpop.f32.mrb[28].mxu1 }
 0x2de   : > { %v1796_v23 = vpop.f32.mrb[29].mxu1 }
 0x2df   : > { %1568 = vmatmul.mubr.f32.gmra.mrb[52].mxu0 %v7964_v53  ;;  %v2502_v53 = vld [vmem:[#allocation11] sm:$0xff] }
 0x2e0   : > { %1572 = vmatprep.mubr.f32.mxu0 %v6562_v2  ;;  %v7967_v2 = vld [vmem:[#allocation69_spill] sm:$0xff] }
 0x2e1   : > { %v6744_v8 = vpop.f32.mrb[30].mxu1 }
 0x2e2   : > { %v1801_v43 = vpop.f32.mrb[31].mxu1 }
 0x2e3   : > { %1573 = vmatmul.mubr.f32.gmra.mrb[54].mxu0 %v7965_v10  ;;  %v2503_v43 = vld [vmem:[#allocation11 + $0x8] sm:$0xff] }
 0x2e4   : > { %1577 = vmatprep.mubr.f32.mxu0 %v6567_v51 }
 0x2e5   : > { %v6748_v24 = vpop.f32.mrb[32].mxu1 }
 0x2e6   : > { %v6750_v50 = vpop.f32.mrb[33].mxu1 }
 0x2e7   : > { %1578 = vmatmul.mubr.f32.gmra.mrb[56].mxu0 %v7966_v21 }
 0x2e8   : > { %1582 = vmatprep.mubr.f32.mxu0 %v6577_v48 }
 0x2e9   : > { %v6754_v55 = vpop.f32.mrb[34].mxu1 }
 0x2ea   : > { %v6756_v51 = vpop.f32.mrb[35].mxu1 }
 0x2eb   : > { %1583 = vmatmul.mubr.f32.gmra.mrb[58].mxu0 %v7967_v2  ;;  %v2520_v2 = vld [vmem:[#allocation11 + $0x90] sm:$0xff] }
 0x2ec   : > { %1652 = vmatprep.mubr.f32.mxu0 %v7928_v30 }
 0x2ed   : > { %v6760_v59 = vpop.f32.mrb[36].mxu1 }
 0x2ee   : > { %v6762_v48 = vpop.f32.mrb[37].mxu1 }
 0x2ef   : > { %1653 = vmatmul.mubr.f32.vlgmr.msra.gmra.mrb[0].mxu0 %v5010_v62  ;;  %v2504_v62 = vld [vmem:[#allocation11 + $0x10] sm:$0xff] }
 0x2f0   : > { %1657 = vmatprep.mubr.f32.mxu0 %v7930_v28 }
 0x2f1   : > { %v6766_v1 = vpop.f32.mrb[38].mxu1 }
 0x2f2   : > { %v6768_v30 = vpop.f32.mrb[39].mxu1 }
 0x2f3   : > { %1658 = vmatmul.mubr.f32.gmra.mrb[2].mxu0 %v5011_v3 }
 0x2f4   : > { %1662 = vmatprep.mubr.f32.mxu0 %v7932_v47 }
 0x2f5   : > { %v6772_v12 = vpop.f32.mrb[40].mxu1 }
 0x2f6   : > { %v6774_v28 = vpop.f32.mrb[41].mxu1 }
 0x2f7   : > { %1663 = vmatmul.mubr.f32.gmra.mrb[4].mxu0 %v5012_v9 }
 0x2f8   : > { %1667 = vmatprep.mubr.f32.mxu0 %v7934_v17 }
 0x2f9   : > { %v6778_v47 = vpop.f32.mrb[42].mxu1 }
 0x2fa   : > { %v6780_v5 = vpop.f32.mrb[43].mxu1 }
 0x2fb   : > { %1668 = vmatmul.mubr.f32.gmra.mrb[6].mxu0 %v5013_v41  ;;  %v2505_v41 = vld [vmem:[#allocation11 + $0x18] sm:$0xff] }
 0x2fc   : > { %1672 = vmatprep.mubr.f32.mxu0 %v7936_v46 }
 0x2fd   : > { %v6784_v17 = vpop.f32.mrb[44].mxu1 }
 0x2fe   : > { %v6786_v29 = vpop.f32.mrb[45].mxu1 }
 0x2ff   : > { %1673 = vmatmul.mubr.f32.gmra.mrb[8].mxu0 %v5014_v57  ;;  %v4475_v57 = vpack.c.bf16 %v2505_v41, %v2504_v62  ;;  %v2511_v41 = vld [vmem:[#allocation11 + $0x48] sm:$0xff] }
 0x300   : > { %1677 = vmatprep.mubr.f32.mxu0 %v7938_v37  ;;  %v5017_v37 = vld [vmem:[%s5843_s23 + $0x88] sm:$0xff] }
 0x301   : > { %v6790_v46 = vpop.f32.mrb[46].mxu1 }
 0x302   : > { %v6792_v33 = vpop.f32.mrb[47].mxu1 }
 0x303   : > { %1678 = vmatmul.mubr.f32.gmra.mrb[10].mxu0 %v5015_v60 }
 0x304   : > { %1682 = vmatprep.mubr.f32.mxu0 %v7940_v38  ;;  %v5019_v38 = vld [vmem:[%s5843_s23 + $0xa0] sm:$0xff] }
 0x305   : > { %v6797_v13 = vpop.f32.mrb[48].mxu1 }
 0x306   : > { %v6800_v20 = vpop.f32.mrb[49].mxu1 }
 0x307   : > { %1683 = vmatmul.mubr.f32.gmra.mrb[12].mxu0 %v5016_v49  ;;  %v2522_v49 = vld [vmem:[#allocation11 + $0xa0] sm:$0xff] }
 0x308   : > { %1687 = vmatprep.mubr.f32.mxu0 %v7942_v34 }
 0x309   : > { %v6805_v63 = vpop.f32.mrb[50].mxu1 }
 0x30a   : > { %v6808_v34 = vpop.f32.mrb[51].mxu1 }
 0x30b   : > { %1688 = vmatmul.mubr.f32.gmra.mrb[14].mxu0 %v5017_v37  ;;  %v2523_v37 = vld [vmem:[#allocation11 + $0xa8] sm:$0xff] }
 0x30c   : > { %1692 = vmatprep.mubr.f32.mxu0 %v7944_v22  ;;  %v5021_v22 = vld [vmem:[%s5843_s23 + $0xb0] sm:$0xff] }
 0x30d   : > { %v6813_v26 = vpop.f32.mrb[52].mxu1 }
 0x30f   : > { %1693 = vmatmul.mubr.f32.gmra.mrb[16].mxu0 %v5018_v39  ;;  %v2506_v39 = vld [vmem:[#allocation11 + $0x20] sm:$0xff] }
 0x310   : > { %1697 = vmatprep.mubr.f32.mxu0 %v7946_v58  ;;  %v6816_v58 = vpop.f32.mrb[53].mxu1 }
 0x313   : > { %1698 = vmatmul.mubr.f32.gmra.mrb[18].mxu0 %v5019_v38 }
 0x314   : > { %1702 = vmatprep.mubr.f32.mxu0 %v7948_v35  ;;  %v6821_v35 = vpop.f32.mrb[54].mxu1 }
 0x315   : > { %v6823_v27 = vpop.f32.mrb[55].mxu1 }
 0x317   : > { %1703 = vmatmul.mubr.f32.gmra.mrb[20].mxu0 %v5020_v7  ;;  %v4477_v7 = vpack.c.bf16 %v2523_v37, %v2522_v49  ;;  %v2528_v49 = vld [vmem:[#allocation11 + $0xd0] sm:$0xff]  ;;  %v2529_v37 = vld [vmem:[#allocation11 + $0xd8] sm:$0xff] }
 0x318   : > { %1707 = vmatprep.mubr.f32.mxu0 %v7950_v6  ;;  %v2519_v6 = vld [vmem:[#allocation11 + $0x88] sm:$0xff] }
 0x319   : > { %v4469_v10 = vpack.c.bf16 %v2519_v6, %v2518_v15  ;;  %v2524_v15 = vld [vmem:[#allocation11 + $0xb0] sm:$0xff]  ;;  %v2525_v6 = vld [vmem:[#allocation11 + $0xb8] sm:$0xff] }
 0x31b   : > { %1708 = vmatmul.mubr.f32.gmra.mrb[22].mxu0 %v5021_v22  ;;  %4470 = vmatprep.subr.bf16.mxu1 %v4469_v10  ;;  %v2507_v22 = vld [vmem:[#allocation11 + $0x28] sm:$0xff]  ;;  %v2508_v10 = vld [vmem:[#allocation11 + $0x30] sm:$0xff] }
 0x31c   : > { %1712 = vmatprep.mubr.f32.mxu0 %v7952_v42  ;;  %v4471_v42 = vpack.c.bf16 %v2503_v43, %v2502_v53  ;;  %v4481_v53 = vpack.c.bf16 %v2525_v6, %v2524_v15  ;;  %v2509_v43 = vld [vmem:[#allocation11 + $0x38] sm:$0xff]  ;;  %v2530_v15 = vld [vmem:[#allocation11 + $0xe0] sm:$0xff]  ;;  %v2531_v6 = vld [vmem:[#allocation11 + $0xe8] sm:$0xff] }
 0x31e   : > { %4472 = vmatpush3.bf16.msra.mxu1 %v4471_v42  ;;  %v4483_v42 = vpack.c.bf16 %v2509_v43, %v2508_v10  ;;  %v2514_v10 = vld [vmem:[#allocation11 + $0x60] sm:$0xff]  ;;  %v2515_v43 = vld [vmem:[#allocation11 + $0x68] sm:$0xff] }
 0x31f   : > { %1713 = vmatmul.mubr.f32.gmra.mrb[24].mxu0 %v5022_v54  ;;  %v4479_v54 = vpack.c.bf16 %v2507_v22, %v2506_v39  ;;  %v4489_v39 = vpack.c.bf16 %v2529_v37, %v2528_v49  ;;  %v2513_v22 = vld [vmem:[#allocation11 + $0x58] sm:$0xff]  ;;  %v2550_v49 = vld [vmem:[#allocation11 + $0x180] sm:$0xff]  ;;  %v2551_v37 = vld [vmem:[#allocation11 + $0x188] sm:$0xff] }
 0x320   : > { %1717 = vmatprep.mubr.f32.mxu0 %v7954_v56  ;;  %v6825_v23 = vpop.f32.mrb[56].mxu1  ;;  %v2521_v56 = vld [vmem:[#allocation11 + $0x98] sm:$0xff] }
 0x321   : > { %v6827_v21 = vpop.f32.mrb[57].mxu1  ;;  %v4473_v9 = vpack.c.bf16 %v2521_v56, %v2520_v2  ;;  %v2526_v2 = vld [vmem:[#allocation11 + $0xc0] sm:$0xff]  ;;  %v2527_v56 = vld [vmem:[#allocation11 + $0xc8] sm:$0xff] }
 0x322   : > { %v4485_v62 = vpack.c.bf16 %v2527_v56, %v2526_v2  ;;  %v2532_v2 = vld [vmem:[#allocation11 + $0xf0] sm:$0xff]  ;;  %v2533_v56 = vld [vmem:[#allocation11 + $0xf8] sm:$0xff] }
 0x323   : > { %1718 = vmatmul.mubr.f32.gmra.mrb[26].mxu0 %v5023_v61  ;;  %4474 = vmatprep.subr.bf16.mxu1 %v4473_v9  ;;  %v2510_v9 = vld [vmem:[#allocation11 + $0x40] sm:$0xff] }
 0x324   : > { %4476 = vmatpush3.bf16.msra.mxu1 %v4475_v57  ;;  %v4487_v57 = vpack.c.bf16 %v2511_v41, %v2510_v9  ;;  %v2516_v9 = vld [vmem:[#allocation11 + $0x70] sm:$0xff]  ;;  %v2517_v41 = vld [vmem:[#allocation11 + $0x78] sm:$0xff] }
 0x325   : > { %4478 = vmatprep.subr.bf16.mxu1 %v4477_v7  ;;  %v2512_v7 = vld [vmem:[#allocation11 + $0x50] sm:$0xff] }
 0x328   : > { %4480 = vmatpush3.bf16.msra.mxu1 %v4479_v54  ;;  %v4491_v54 = vpack.c.bf16 %v2513_v22, %v2512_v7  ;;  %v6837_v7 = vpop.permute.xlu0 %2154  ;;  %v6839_v22 = vpop.permute.xlu1 %2164 }
 0x329   : > { %4482 = vmatprep.subr.bf16.mxu1 %v4481_v53  ;;  %v4493_v53 = vpack.c.bf16 %v2531_v6, %v2530_v15 }
 0x32c   : > { %v6829_v3 = vpop.f32.mrb[58].mxu1  ;;  %4484 = vmatpush3.bf16.msra.mxu1 %v4483_v42  ;;  %v4495_v42 = vpack.c.bf16 %v2515_v43, %v2514_v10  ;;  %v6843_v6 = vpop.permute.xlu1 %2169 }
 0x32d   : > { %v6831_v60 = vpop.f32.mrb[59].mxu1  ;;  %4486 = vmatprep.subr.bf16.mxu1 %v4485_v62  ;;  %v4497_v62 = vpack.c.bf16 %v2533_v56, %v2532_v2 }
 0x330   : > { %4488 = vmatpush3.bf16.msra.mxu1 %v4487_v57  ;;  %v4499_v57 = vpack.c.bf16 %v2517_v41, %v2516_v9  ;;  %v6852_v9 = vpop.permute.xlu1 %2179 }
 0x331   : > { %4490 = vmatprep.subr.bf16.mxu1 %v4489_v39  ;;  %v4501_v39 = vpack.c.bf16 %v2551_v37, %v2550_v49 }
 0x333   : > { %v6833_v38 = vpop.f32.mrb[60].mxu1 }
 0x334   : > { %v6835_v61 = vpop.f32.mrb[61].mxu1  ;;  %4492 = vmatpush3.bf16.msra.mxu1 %v4491_v54  ;;  %v6841_v54 = vpop.permute.xlu0 %2159 }
 0x335   : > { %4494 = vmatprep.subr.bf16.mxu1 %v4493_v53 }
 0x338   : > { %4496 = vmatpush3.bf16.msra.mxu1 %v4495_v42 }
 0x339   : > { %4498 = vmatprep.subr.bf16.mxu1 %v4497_v62  ;;  %v6850_v62 = vpop.permute.xlu0 %2174 }
 0x33c   : > { %4500 = vmatpush3.bf16.msra.mxu1 %v4499_v57 }
 0x33d   : > { %4502 = vmatprep.subr.bf16.mxu1 %v4501_v39 }
 0x382   : > { %v1509_v15 = vpop.f32.mrb[28].mxu0 }
 0x383   : > { %v4661_v53 = vadd.f32 %v6670_v14, %v1509_v15  ;;  %v1511_v10 = vpop.f32.mrb[29].mxu0  ;;  %v6863_v15 = vpop.permute.xlu1 %2189 }
 0x385   : > { %v6847_v43 = vadd.f32 %v4661_v53, %v6792_v33  ;;  %v6861_v33 = vpop.permute.xlu0 %2184 }
 0x386   : > { %v1514_v42 = vpop.f32.mrb[30].mxu0 }
 0x387   : > { %v4662_v2 = vadd.f32 %v6678_v0, %v1514_v42  ;;  %v1516_v56 = vpop.f32.mrb[31].mxu0 }
 0x388   : > { %v6872_v56 = vpop.permute.xlu1 %2199 }
 0x389   : > { %v6855_v41 = vadd.f32 %v4662_v2, %v6790_v46 }
 0x38a   : > { %v1519_v57 = vpop.f32.mrb[32].mxu0 }
 0x38b   : > { %v4663_v49 = vadd.f32 %v6686_v40, %v1519_v57  ;;  %v1521_v37 = vpop.f32.mrb[33].mxu0  ;;  %v6870_v40 = vpop.permute.xlu0 %2194 }
 0x38d   : > { %v6859_v14 = vadd.f32 %v4663_v49, %v6800_v20 }
 0x38e   : > { %v1524_v39 = vpop.f32.mrb[34].mxu0 }
 0x38f   : > { %v4664_v0 = vadd.f32 %v6694_v32, %v1524_v39  ;;  %v1526_v53 = vpop.f32.mrb[35].mxu0 }
 0x391   : > { %v6867_v10 = vadd.f32 %v4664_v0, %v6797_v13  ;;  %v6881_v13 = vpop.permute.xlu0 %2204  ;;  %v6883_v0 = vpop.permute.xlu1 %2209 }
 0x392   : > { %v1529_v46 = vpop.f32.mrb[36].mxu0 }
 0x393   : > { %v4665_v42 = vadd.f32 %v6699_v45, %v1529_v46  ;;  %v1531_v2 = vpop.f32.mrb[37].mxu0 }
 0x395   : > { %v6875_v20 = vadd.f32 %v4665_v42, %v6808_v34 }
 0x396   : > { %v1534_v57 = vpop.f32.mrb[38].mxu0 }
 0x397   : > { %7968 = vst [vmem:[#allocation31_spill] sm:$0xff] %v6875_v20  ;;  %v4666_v49 = vadd.f32 %v6703_v11, %v1534_v57  ;;  %v1536_v37 = vpop.f32.mrb[39].mxu0  ;;  %v6890_v11 = vpop.permute.xlu0 %2214 }
 0x398   : > { %v6892_v57 = vpop.permute.xlu1 %2219 }
 0x399   : > { %v6879_v32 = vadd.f32 %v4666_v49, %v6805_v63 }
 0x39a   : > { %v1539_v39 = vpop.f32.mrb[40].mxu0 }
 0x39b   : > { %v4667_v45 = vadd.f32 %v6707_v16, %v1539_v39  ;;  %v1541_v53 = vpop.f32.mrb[41].mxu0 }
 0x39d   : > { %v6887_v46 = vadd.f32 %v4667_v45, %v6816_v58  ;;  %v6901_v58 = vpop.permute.xlu0 %2224  ;;  %v6903_v45 = vpop.permute.xlu1 %2229 }
 0x39e   : > { %v1544_v34 = vpop.f32.mrb[42].mxu0 }
 0x39f   : > { %v4668_v42 = vadd.f32 %v6711_v36, %v1544_v34  ;;  %v1546_v2 = vpop.f32.mrb[43].mxu0 }
 0x3a1   : > { %v6895_v63 = vadd.f32 %v4668_v42, %v6813_v26  ;;  %v6909_v26 = vpop.permute.xlu0 %2234  ;;  %v6911_v2 = vpop.permute.xlu1 %2239 }
 0x3a2   : > { %v1549_v49 = vpop.f32.mrb[44].mxu0 }
 0x3a3   : > { %7969 = vst [vmem:[#allocation33_spill] sm:$0xff] %v6895_v63  ;;  %v4669_v37 = vadd.f32 %v6715_v52, %v1549_v49  ;;  %v1551_v20 = vpop.f32.mrb[45].mxu0 }
 0x3a5   : > { %v6899_v16 = vadd.f32 %v4669_v37, %v6823_v27  ;;  %v6917_v49 = vpop.permute.xlu0 %2244  ;;  %v6919_v63 = vpop.permute.xlu1 %2249 }
 0x3a6   : > { %v1554_v39 = vpop.f32.mrb[46].mxu0 }
 0x3a7   : > { %v4670_v36 = vadd.f32 %v6719_v44, %v1554_v39  ;;  %v1556_v53 = vpop.f32.mrb[47].mxu0 }
 0x3a9   : > { %v6907_v34 = vadd.f32 %v4670_v36, %v6821_v35  ;;  %v6925_v36 = vpop.permute.xlu0 %2254 }
 0x3aa   : > { %v1559_v42 = vpop.f32.mrb[48].mxu0 }
 0x3ab   : > { %7970 = vst [vmem:[#allocation32_spill] sm:$0xff] %v6907_v34  ;;  %v4671_v52 = vadd.f32 %v6723_v31, %v1559_v42  ;;  %v1561_v27 = vpop.f32.mrb[49].mxu0  ;;  %v6927_v34 = vpop.permute.xlu1 %2259 }
 0x3ac   : > { %7973 = vst [vmem:[#allocation37_spill] sm:$0xff] %v6927_v34 }
 0x3ad   : > { %v6915_v20 = vadd.f32 %v4671_v52, %v6827_v21  ;;  %v6933_v52 = vpop.permute.xlu0 %2264 }
 0x3ae   : > { %v1564_v37 = vpop.f32.mrb[50].mxu0 }
 0x3af   : > { %7971 = vst [vmem:[#allocation35_spill] sm:$0xff] %v6915_v20  ;;  %v4672_v44 = vadd.f32 %v6728_v19, %v1564_v37  ;;  %v1566_v35 = vpop.f32.mrb[51].mxu0  ;;  %v6935_v20 = vpop.permute.xlu1 %2269 }
 0x3b0   : > { %7975 = vst [vmem:[#allocation39_spill] sm:$0xff] %v6935_v20 }
 0x3b1   : > { %v6923_v39 = vadd.f32 %v4672_v44, %v6825_v23  ;;  %v6939_v44 = vld [vmem:[#allocation8] ss:$0 sm:$0xff]  ;;  %v6941_v35 = vpop.permute.xlu0 %2274 }
 0x3b2   : > { %v1569_v53 = vpop.f32.mrb[52].mxu0  ;;  %7976 = vst [vmem:[#allocation38_spill] sm:$0xff] %v6941_v35 }
 0x3b3   : > { %7972 = vst [vmem:[#allocation34_spill] sm:$0xff] %v6923_v39  ;;  %v4673_v31 = vadd.f32 %v6732_v4, %v1569_v53  ;;  %v1571_v21 = vpop.f32.mrb[53].mxu0  ;;  %v6944_v53 = vpop.permute.xlu1 %2279 }
 0x3b4   : > { %7977 = vst [vmem:[#allocation41_spill] sm:$0xff] %v6944_v53  ;;  %v6947_v21 = vld [vmem:[#allocation10] ss:$0 sm:$0xff] }
 0x3b5   : > { %v6931_v42 = vadd.f32 %v4673_v31, %v6831_v60 }
 0x3b6   : > { %v1574_v27 = vpop.f32.mrb[54].mxu0 }
 0x3b7   : > { %7974 = vst [vmem:[#allocation36_spill] sm:$0xff] %v6931_v42  ;;  %v4674_v19 = vadd.f32 %v6736_v25, %v1574_v27  ;;  %v1576_v23 = vpop.f32.mrb[55].mxu0  ;;  %v6951_v27 = vpop.permute.xlu0 %2284 }
 0x3b8   : > { %7978 = vst [vmem:[#allocation40_spill] sm:$0xff] %v6951_v27 }
 0x3b9   : > { %v2005_v37 = vadd.f32 %v4674_v19, %v6829_v3 }
 0x3ba   : > { %v1579_v39 = vpop.f32.mrb[56].mxu0 }
 0x3bb   : > { %v2052_v4 = vmul.f32 %v6939_v44, %v2005_v37  ;;  %v4675_v60 = vadd.f32 %v6740_v18, %v1579_v39  ;;  %v1581_v31 = vpop.f32.mrb[57].mxu0  ;;  %v2290_v37 = vpop.permute.xlu1 %2289 }
 0x3bd   : > { %v2010_v42 = vadd.f32 %v4675_v60, %v6835_v61  ;;  %v2089_v25 = vadd.f32 %v6947_v21, %v2052_v4  ;;  %v2295_v61 = vpop.permute.xlu0 %2294 }
 0x3be   : > { %v1584_v3 = vpop.f32.mrb[58].mxu0 }
 0x3bf   : > { %v2053_v19 = vmul.f32 %v6939_v44, %v2010_v42  ;;  %v4676_v23 = vadd.f32 %v6744_v8, %v1584_v3  ;;  %v1586_v35 = vpop.f32.mrb[59].mxu0  ;;  %v2119_v20 = vmax.f32 %v2089_v25, 0.0 }
 0x3c1   : > { %v2015_v53 = vadd.f32 %v4676_v23, %v6833_v38  ;;  %v2090_v18 = vadd.f32 %v6947_v21, %v2053_v19  ;;  %v6957_v39 = vmul.f32 %v2290_v37, %v2119_v20  ;;  %v2300_v23 = vpop.permute.xlu1 %2299 }
 0x3c2   : > { %v1654_v31 = vpop.f32.mrb[0].mxu0 }
 0x3c3   : > { %7979 = vst [vmem:[#allocation43_spill] sm:$0xff] %v6957_v39  ;;  %v2054_v4 = vmul.f32 %v6939_v44, %v2015_v53  ;;  %v1870_v60 = vadd.f32 %v6750_v50, %v1654_v31  ;;  %v1656_v27 = vpop.f32.mrb[1].mxu0  ;;  %v2120_v34 = vmax.f32 %v2090_v18, 0.0  ;;  %v2488_v38 = vrot.slane %v6957_v39, 1 }
 0x3c4   : > { %v2495_v25 = vrot.slane %v6957_v39, 2 }
 0x3c5   : > { %v2025_v42 = vmul.f32 %v6939_v44, %v1870_v60  ;;  %v6962_v8 = vmul.f32 %v2295_v61, %v2120_v34  ;;  %v2091_v35 = vadd.f32 %v6947_v21, %v2054_v4 }
 0x3c6   : > { %v1659_v20 = vpop.f32.mrb[2].mxu0 }
 0x3c7   : > { %7980 = vst [vmem:[#allocation42_spill] sm:$0xff] %v6962_v8  ;;  %v2062_v3 = vadd.f32 %v6947_v21, %v2025_v42  ;;  %v2489_v19 = vrot.slane %v6962_v8, 1  ;;  %v2496_v53 = vrot.slane %v6962_v8, 2  ;;  %v1875_v50 = vadd.f32 %v6748_v24, %v1659_v20  ;;  %v1661_v27 = vpop.f32.mrb[3].mxu0 }
 0x3c8   : > { %v2121_v37 = vmax.f32 %v2091_v35, 0.0 }
 0x3c9   : > { %v2092_v34 = vmax.f32 %v2062_v3, 0.0  ;;  %v2026_v18 = vmul.f32 %v6939_v44, %v1875_v50  ;;  %v6973_v31 = vsel %vm549_vm0, %v2488_v38, %v2489_v19  ;;  %v6976_v61 = vsel %vm650_vm1, %v2495_v25, %v2496_v53  ;;  %v2534_v38 = vld [vmem:[#allocation11 + $0x100] sm:$0xff] }
 0x3ca   : > { %7981 = vst [vmem:[#allocation45_spill] sm:$0xff] %v6973_v31  ;;  %7982 = vst [vmem:[#allocation44_spill] sm:$0xff] %v6976_v61  ;;  %v2331_v4 = vmul.f32 %v2300_v23, %v2121_v37  ;;  %v1664_v60 = vpop.f32.mrb[4].mxu0  ;;  %v2535_v37 = vld [vmem:[#allocation11 + $0x108] sm:$0xff] }
 0x3cb   : > { %v2063_v42 = vadd.f32 %v6947_v21, %v2026_v18  ;;  %v1880_v8 = vadd.f32 %v6756_v51, %v1664_v60  ;;  %v1666_v39 = vpop.f32.mrb[5].mxu0  ;;  %v2302_v24 = vmul.f32 %v6837_v7, %v2092_v34  ;;  %v2552_v34 = vld [vmem:[#allocation11 + $0x190] sm:$0xff]  ;;  %v2553_v18 = vld [vmem:[#allocation11 + $0x198] sm:$0xff]  ;;  %v4503_v61 = vpack.c.bf16 %v2535_v37, %v2534_v38 }
 0x3cc   : > { %v2491_v20 = vrot.slane %v2331_v4, 1  ;;  %v2498_v35 = vrot.slane %v2331_v4, 2 }
 0x3cd   : > { %v2093_v3 = vmax.f32 %v2063_v42, 0.0  ;;  %v2027_v50 = vmul.f32 %v6939_v44, %v1880_v8  ;;  %v2356_v4 = vrot.slane %v2302_v24, 1 }
 0x3ce   : > { %v1669_v27 = vpop.f32.mrb[6].mxu0  ;;  %v6983_v31 = vsel %vm549_vm0, %v2489_v19, %v2491_v20  ;;  %v6986_v25 = vsel %vm650_vm1, %v2496_v53, %v2498_v35  ;;  %v4505_v53 = vpack.c.bf16 %v2553_v18, %v2552_v34  ;;  %v2412_v35 = vrot.slane %v2302_v24, 2 }
 0x3cf   : > { %7983 = vst [vmem:[#allocation47_spill] sm:$0xff] %v6983_v31  ;;  %7984 = vst [vmem:[#allocation46_spill] sm:$0xff] %v6986_v25  ;;  %v2303_v23 = vmul.f32 %v6841_v54, %v2093_v3  ;;  %v2064_v51 = vadd.f32 %v6947_v21, %v2027_v50  ;;  %v1885_v39 = vadd.f32 %v6754_v55, %v1669_v27  ;;  %v1671_v7 = vpop.f32.mrb[7].mxu0  ;;  %v2537_v25 = vld [vmem:[#allocation11 + $0x118] sm:$0xff] }
 0x3d0   : > { %v2536_v7 = vld [vmem:[#allocation11 + $0x110] sm:$0xff] }
 0x3d1   : > { %v2094_v8 = vmax.f32 %v2064_v51, 0.0  ;;  %v2028_v60 = vmul.f32 %v6939_v44, %v1885_v39  ;;  %v2357_v42 = vrot.slane %v2303_v23, 1  ;;  %v2413_v19 = vrot.slane %v2303_v23, 2  ;;  %v2554_v51 = vld [vmem:[#allocation11 + $0x1a0] sm:$0xff]  ;;  %v2555_v39 = vld [vmem:[#allocation11 + $0x1a8] sm:$0xff] }
 0x3d2   : > { %v1674_v20 = vpop.f32.mrb[8].mxu0 }
 0x3d3   : > { %v2304_v54 = vmul.f32 %v6839_v22, %v2094_v8  ;;  %v2065_v3 = vadd.f32 %v6947_v21, %v2028_v60  ;;  %v1890_v55 = vadd.f32 %v6762_v48, %v1674_v20  ;;  %v1676_v50 = vpop.f32.mrb[9].mxu0  ;;  %v2358_v27 = vsel %vm549_vm0, %v2356_v4, %v2357_v42 }
 0x3d4   : > { %2710 = vmatprep.mubr.f32.mxu1 %v2358_v27  ;;  %v6997_v31 = vsel %vm650_vm1, %v2412_v35, %v2413_v19  ;;  %v4507_v48 = vpack.c.bf16 %v2537_v25, %v2536_v7  ;;  %v4509_v50 = vpack.c.bf16 %v2555_v39, %v2554_v51  ;;  %v2538_v35 = vld [vmem:[#allocation11 + $0x120] sm:$0xff]  ;;  %v2539_v27 = vld [vmem:[#allocation11 + $0x128] sm:$0xff] }
 0x3d5   : > { %v2095_v38 = vmax.f32 %v2065_v3, 0.0  ;;  %v2029_v37 = vmul.f32 %v6939_v44, %v1890_v55  ;;  %2711 = vmatmul.mubr.f32.vlgmr.msra.gmra.mrb[62].mxu1 %v2302_v24  ;;  %v2359_v22 = vrot.slane %v2304_v54, 1  ;;  %v2415_v34 = vrot.slane %v2304_v54, 2  ;;  %v2556_v3 = vld [vmem:[#allocation11 + $0x1b0] sm:$0xff]  ;;  %v2557_v55 = vld [vmem:[#allocation11 + $0x1b8] sm:$0xff] }
 0x3d6   : > { %v1679_v18 = vpop.f32.mrb[10].mxu0  ;;  %4504 = vmatpush3.bf16.msra.mxu1 %v4503_v61 }
 0x3d7   : > { %v2066_v8 = vadd.f32 %v6947_v21, %v2029_v37  ;;  %v1895_v4 = vadd.f32 %v6760_v59, %v1679_v18  ;;  %v1681_v60 = vpop.f32.mrb[11].mxu0  ;;  %v2360_v20 = vsel %vm549_vm0, %v2357_v42, %v2359_v22  ;;  %4506 = vmatprep.subr.bf16.mxu1 %v4505_v53  ;;  %v7004_v24 = vsel %vm650_vm1, %v2413_v19, %v2415_v34  ;;  %v2540_v53 = vld [vmem:[#allocation11 + $0x130] sm:$0xff]  ;;  %v2559_v22 = vld [vmem:[#allocation11 + $0x1c8] sm:$0xff] }
 0x3d8   : > { %2715 = vmatprep.mubr.f32.mxu1 %v2360_v20  ;;  %v7007_v61 = vmul.f32 %v6843_v6, %v2095_v38  ;;  %v4511_v42 = vpack.c.bf16 %v2539_v27, %v2538_v35  ;;  %v4513_v37 = vpack.c.bf16 %v2557_v55, %v2556_v3  ;;  %v2541_v6 = vld [vmem:[#allocation11 + $0x138] sm:$0xff]  ;;  %v2558_v38 = vld [vmem:[#allocation11 + $0x1c0] sm:$0xff]  ;;  %v2543_v3 = vld [vmem:[#allocation11 + $0x148] sm:$0xff] }
 0x3d9   : > { %v2096_v25 = vmax.f32 %v2066_v8, 0.0  ;;  %v2030_v54 = vmul.f32 %v6939_v44, %v1895_v4  ;;  %2716 = vmatmul.mubr.f32.gmra.mrb[64].mxu1 %v2303_v23  ;;  %v4517_v4 = vpack.c.bf16 %v2559_v22, %v2558_v38  ;;  %v2542_v27 = vld [vmem:[#allocation11 + $0x140] sm:$0xff]  ;;  %v2560_v55 = vld [vmem:[#allocation11 + $0x1d0] sm:$0xff]  ;;  %v2545_v38 = vld [vmem:[#allocation11 + $0x158] sm:$0xff] }
 0x3da   : > { %v1684_v59 = vpop.f32.mrb[12].mxu0  ;;  %4508 = vmatpush3.bf16.msra.mxu1 %v4507_v48  ;;  %v2361_v18 = vrot.slane %v7007_v61, 1  ;;  %v2562_v22 = vld [vmem:[#allocation11 + $0x1e0] sm:$0xff] }
 0x3db   : > { %v7011_v7 = vmul.f32 %v6850_v62, %v2096_v25  ;;  %v2067_v51 = vadd.f32 %v6947_v21, %v2030_v54  ;;  %v1900_v39 = vadd.f32 %v6768_v30, %v1684_v59  ;;  %v1686_v19 = vpop.f32.mrb[13].mxu0  ;;  %4510 = vmatprep.subr.bf16.mxu1 %v4509_v50  ;;  %v4515_v62 = vpack.c.bf16 %v2541_v6, %v2540_v53  ;;  %v2561_v25 = vld [vmem:[#allocation11 + $0x1d8] sm:$0xff]  ;;  %v2544_v6 = vld [vmem:[#allocation11 + $0x150] sm:$0xff] }
 0x3dd   : > { %v2097_v34 = vmax.f32 %v2067_v51, 0.0  ;;  %v2031_v23 = vmul.f32 %v6939_v44, %v1900_v39  ;;  %v2362_v48 = vrot.slane %v7011_v7, 1 }
 0x3de   : > { %v1689_v8 = vpop.f32.mrb[14].mxu0  ;;  %4512 = vmatpush3.bf16.msra.mxu1 %v4511_v42 }
 0x3df   : > { %v7019_v60 = vmul.f32 %v6852_v9, %v2097_v34  ;;  %v2068_v30 = vadd.f32 %v6947_v21, %v2031_v23  ;;  %v1905_v20 = vadd.f32 %v6766_v1, %v1689_v8  ;;  %v1691_v50 = vpop.f32.mrb[15].mxu0  ;;  %v7024_v35 = vsel %vm549_vm0, %v2361_v18, %v2362_v48  ;;  %4514 = vmatprep.subr.bf16.mxu1 %v4513_v37  ;;  %v2563_v34 = vld [vmem:[#allocation11 + $0x1e8] sm:$0xff] }
 0x3e0   : > { %2720 = vmatprep.mubr.f32.mxu1 %v7024_v35  ;;  %v4519_v1 = vpack.c.bf16 %v2543_v3, %v2542_v27  ;;  %v4521_v37 = vpack.c.bf16 %v2561_v25, %v2560_v55  ;;  %v2547_v27 = vld [vmem:[#allocation11 + $0x168] sm:$0xff]  ;;  %v2564_v3 = vld [vmem:[#allocation11 + $0x1f0] sm:$0xff]  ;;  %v2565_v55 = vld [vmem:[#allocation11 + $0x1f8] sm:$0xff] }
 0x3e1   : > { %v2098_v54 = vmax.f32 %v2068_v30, 0.0  ;;  %v2032_v59 = vmul.f32 %v6939_v44, %v1905_v20  ;;  %2721 = vmatmul.mubr.f32.gmra.mrb[66].mxu1 %v7007_v61  ;;  %v2364_v9 = vrot.slane %v7019_v60, 1 }
 0x3e2   : > { %v1694_v42 = vpop.f32.mrb[16].mxu0  ;;  %4516 = vmatpush3.bf16.msra.mxu1 %v4515_v62  ;;  %v2546_v62 = vld [vmem:[#allocation11 + $0x160] sm:$0xff] }
 0x3e3   : > { %v2069_v53 = vadd.f32 %v6947_v21, %v2032_v59  ;;  %v1910_v51 = vadd.f32 %v6774_v28, %v1694_v42  ;;  %v1696_v39 = vpop.f32.mrb[17].mxu0  ;;  %v7033_v19 = vsel %vm549_vm0, %v2362_v48, %v2364_v9  ;;  %4518 = vmatprep.subr.bf16.mxu1 %v4517_v4  ;;  %v7037_v23 = vmul.f32 %v6861_v33, %v2098_v54 }
 0x3e4   : > { %2725 = vmatprep.mubr.f32.mxu1 %v7033_v19  ;;  %v4523_v48 = vpack.c.bf16 %v2545_v38, %v2544_v6  ;;  %v4525_v33 = vpack.c.bf16 %v2563_v34, %v2562_v22  ;;  %v2548_v6 = vld [vmem:[#allocation11 + $0x170] sm:$0xff]  ;;  %v2549_v38 = vld [vmem:[#allocation11 + $0x178] sm:$0xff]  ;;  %v2582_v22 = vld [vmem:[#allocation11 + $0x280] sm:$0xff] }
 0x3e5   : > { %v2099_v18 = vmax.f32 %v2069_v53, 0.0  ;;  %v2033_v8 = vmul.f32 %v6939_v44, %v1910_v51  ;;  %2726 = vmatmul.mubr.f32.gmra.mrb[68].mxu1 %v7011_v7  ;;  %v2366_v59 = vrot.slane %v7037_v23, 1  ;;  %v2583_v34 = vld [vmem:[#allocation11 + $0x288] sm:$0xff] }
 0x3e6   : > { %v1699_v28 = vpop.f32.mrb[18].mxu0  ;;  %4520 = vmatpush3.bf16.msra.mxu1 %v4519_v1  ;;  %v4529_v1 = vpack.c.bf16 %v2565_v55, %v2564_v3  ;;  %v2039_v55 = vmul.f32 %v6939_v44, %v6847_v43 }
 0x3e7   : > { %v7042_v4 = vmul.f32 %v6863_v15, %v2099_v18  ;;  %v2070_v30 = vadd.f32 %v6947_v21, %v2033_v8  ;;  %v1915_v20 = vadd.f32 %v6772_v12, %v1699_v28  ;;  %v1701_v50 = vpop.f32.mrb[19].mxu0  ;;  %4522 = vmatprep.subr.bf16.mxu1 %v4521_v37  ;;  %v4527_v15 = vpack.c.bf16 %v2547_v27, %v2546_v62 }
 0x3e8   : > { %v4533_v50 = vpack.c.bf16 %v2583_v34, %v2582_v22  ;;  %v2042_v22 = vmul.f32 %v6939_v44, %v6867_v10 }
 0x3e9   : > { %v2100_v25 = vmax.f32 %v2070_v30, 0.0  ;;  %v2034_v54 = vmul.f32 %v6939_v44, %v1915_v20  ;;  %v2367_v9 = vrot.slane %v7042_v4, 1 }
 0x3ea   : > { %v1704_v42 = vpop.f32.mrb[20].mxu0  ;;  %4524 = vmatpush3.bf16.msra.mxu1 %v4523_v48 }
 0x3eb   : > { %v7050_v53 = vmul.f32 %v6870_v40, %v2100_v25  ;;  %v2071_v12 = vadd.f32 %v6947_v21, %v2034_v54  ;;  %v1920_v51 = vadd.f32 %v6780_v5, %v1704_v42  ;;  %v1706_v39 = vpop.f32.mrb[21].mxu0  ;;  %v7055_v37 = vsel %vm549_vm0, %v2366_v59, %v2367_v9  ;;  %4526 = vmatprep.subr.bf16.mxu1 %v4525_v33 }
 0x3ec   : > { %2730 = vmatprep.mubr.f32.mxu1 %v7055_v37  ;;  %v4531_v5 = vpack.c.bf16 %v2549_v38, %v2548_v6 }
 0x3ed   : > { %v2101_v18 = vmax.f32 %v2071_v12, 0.0  ;;  %v2035_v8 = vmul.f32 %v6939_v44, %v1920_v51  ;;  %2731 = vmatmul.mubr.f32.gmra.mrb[70].mxu1 %v7037_v23  ;;  %v2369_v40 = vrot.slane %v7050_v53, 1  ;;  %v2076_v12 = vadd.f32 %v6947_v21, %v2039_v55 }
 0x3ee   : > { %v1709_v28 = vpop.f32.mrb[22].mxu0  ;;  %4528 = vmatpush3.bf16.msra.mxu1 %v4527_v15 }
 0x3ef   : > { %v2072_v48 = vadd.f32 %v6947_v21, %v2035_v8  ;;  %v1925_v62 = vadd.f32 %v6778_v47, %v1709_v28  ;;  %v1711_v30 = vpop.f32.mrb[23].mxu0  ;;  %v7064_v20 = vsel %vm549_vm0, %v2367_v9, %v2369_v40  ;;  %4530 = vmatprep.subr.bf16.mxu1 %v4529_v1  ;;  %v7068_v33 = vmul.f32 %v6872_v56, %v2101_v18 }
 0x3f0   : > { %2735 = vmatprep.mubr.f32.mxu1 %v7064_v20  ;;  %v2041_v56 = vmul.f32 %v6939_v44, %v6859_v14  ;;  %v2106_v8 = vmax.f32 %v2076_v12, 0.0 }
 0x3f1   : > { %v2102_v27 = vmax.f32 %v2072_v48, 0.0  ;;  %v2036_v3 = vmul.f32 %v6939_v44, %v1925_v62  ;;  %2736 = vmatmul.mubr.f32.gmra.mrb[72].mxu1 %v7042_v4  ;;  %v2371_v1 = vrot.slane %v7068_v33, 1  ;;  %v2044_v48 = vmul.f32 %v6939_v44, %v6879_v32 }
 0x3f2   : > { %v1714_v47 = vpop.f32.mrb[24].mxu0  ;;  %4532 = vmatpush3.bf16.msra.mxu1 %v4531_v5  ;;  %v2078_v34 = vadd.f32 %v6947_v21, %v2041_v56  ;;  %v2079_v5 = vadd.f32 %v6947_v21, %v2042_v22 }
 0x3f3   : > { %v7075_v25 = vmul.f32 %v6881_v13, %v2102_v27  ;;  %v2073_v54 = vadd.f32 %v6947_v21, %v2036_v3  ;;  %v1930_v59 = vadd.f32 %v6786_v29, %v1714_v47  ;;  %v1716_v9 = vpop.f32.mrb[25].mxu0  ;;  %4534 = vmatprep.subr.bf16.mxu1 %v4533_v50  ;;  %v2040_v13 = vmul.f32 %v6939_v44, %v6855_v41  ;;  %v7985_v3 = vld [vmem:[#allocation31_spill] sm:$0xff] }
 0x3f4   : > { %v2108_v10 = vmax.f32 %v2078_v34, 0.0  ;;  %v7116_v27 = vmul.f32 %v6901_v58, %v2106_v8  ;;  %v2043_v55 = vmul.f32 %v6939_v44, %v7985_v3  ;;  %v2109_v32 = vmax.f32 %v2079_v5, 0.0  ;;  %v7987_v34 = vld [vmem:[#allocation32_spill] sm:$0xff] }
 0x3f5   : > { %v2103_v42 = vmax.f32 %v2073_v54, 0.0  ;;  %v2037_v15 = vmul.f32 %v6939_v44, %v1930_v59  ;;  %v2372_v43 = vrot.slane %v7075_v25, 1  ;;  %v2081_v59 = vadd.f32 %v6947_v21, %v2044_v48 }
 0x3f6   : > { %v1719_v51 = vpop.f32.mrb[26].mxu0  ;;  %v7124_v54 = vmul.f32 %v6909_v26, %v2108_v10 }
 0x3f7   : > { %v7088_v29 = vmul.f32 %v6883_v0, %v2103_v42  ;;  %v2074_v39 = vadd.f32 %v6947_v21, %v2037_v15  ;;  %v1935_v14 = vadd.f32 %v6784_v17, %v1719_v51  ;;  %v1721_v6 = vpop.f32.mrb[27].mxu0  ;;  %v7093_v38 = vsel %vm549_vm0, %v2371_v1, %v2372_v43  ;;  %v7986_v51 = vld [vmem:[#allocation33_spill] sm:$0xff] }
 0x3f8   : > { %2740 = vmatprep.mubr.f32.mxu1 %v7093_v38  ;;  %v2077_v17 = vadd.f32 %v6947_v21, %v2040_v13  ;;  %v2379_v42 = vrot.slane %v7116_v27, 1  ;;  %v7140_v15 = vmul.f32 %v6911_v2, %v2109_v32  ;;  %v2111_v1 = vmax.f32 %v2081_v59, 0.0 }
 0x3f9   : > { %v2104_v41 = vmax.f32 %v2074_v39, 0.0  ;;  %v2038_v18 = vmul.f32 %v6939_v44, %v1935_v14  ;;  %2741 = vmatmul.mubr.f32.gmra.mrb[74].mxu1 %v7068_v33  ;;  %v2374_v0 = vrot.slane %v7088_v29, 1  ;;  %v2046_v39 = vmul.f32 %v6939_v44, %v7986_v51 }
 0x3fa   : > { %v2107_v50 = vmax.f32 %v2077_v17, 0.0  ;;  %v2384_v14 = vrot.slane %v7140_v15, 1 }
 0x3fb   : > { %v2075_v40 = vadd.f32 %v6947_v21, %v2038_v18  ;;  %v7105_v28 = vsel %vm549_vm0, %v2372_v43, %v2374_v0  ;;  %v7112_v62 = vmul.f32 %v6890_v11, %v2104_v41  ;;  %v2045_v11 = vmul.f32 %v6939_v44, %v6887_v46 }
 0x3fc   : > { %2745 = vmatprep.mubr.f32.mxu1 %v7105_v28  ;;  %v7132_v56 = vmul.f32 %v6903_v45, %v2107_v50  ;;  %v2382_v46 = vrot.slane %v7124_v54, 1  ;;  %v2047_v45 = vmul.f32 %v6939_v44, %v6899_v16  ;;  %v7160_v16 = vmul.f32 %v6919_v63, %v2111_v1  ;;  %v2566_v1 = vld [vmem:[#allocation11 + $0x200] sm:$0xff] }
 0x3fd   : > { %v2105_v30 = vmax.f32 %v2075_v40, 0.0  ;;  %2746 = vmatmul.mubr.f32.gmra.mrb[76].mxu1 %v7075_v25  ;;  %v2376_v9 = vrot.slane %v7112_v62, 1  ;;  %v2082_v43 = vadd.f32 %v6947_v21, %v2045_v11  ;;  %v2048_v41 = vmul.f32 %v6939_v44, %v7987_v34  ;;  %v7989_v11 = vld [vmem:[#allocation39_spill] sm:$0xff] }
 0x3fe   : > { %v2381_v2 = vrot.slane %v7132_v56, 1  ;;  %v2084_v18 = vadd.f32 %v6947_v21, %v2047_v45  ;;  %v2083_v17 = vadd.f32 %v6947_v21, %v2046_v39  ;;  %v7172_v8 = vsel %vm549_vm0, %v2382_v46, %v2384_v14  ;;  %v2584_v45 = vld [vmem:[#allocation11 + $0x290] sm:$0xff]  ;;  %v2569_v14 = vld [vmem:[#allocation11 + $0x218] sm:$0xff]  ;;  %v2587_v34 = vld [vmem:[#allocation11 + $0x2a8] sm:$0xff] }
 0x3ff   : > { %v7121_v47 = vmul.f32 %v6892_v57, %v2105_v30  ;;  %v2080_v57 = vadd.f32 %v6947_v21, %v2043_v55  ;;  %v2112_v22 = vmax.f32 %v2082_v43, 0.0  ;;  %v2085_v10 = vadd.f32 %v6947_v21, %v2048_v41  ;;  %v7988_v55 = vld [vmem:[#allocation37_spill] sm:$0xff]  ;;  %v2567_v43 = vld [vmem:[#allocation11 + $0x208] sm:$0xff]  ;;  %v2568_v39 = vld [vmem:[#allocation11 + $0x210] sm:$0xff] }
 0x400   : > { %v7157_v6 = vsel %vm549_vm0, %v2381_v2, %v2382_v46  ;;  %v2114_v40 = vmax.f32 %v2084_v18, 0.0  ;;  %v2387_v5 = vrot.slane %v7160_v16, 1  ;;  %v2113_v48 = vmax.f32 %v2083_v17, 0.0  ;;  %v2585_v2 = vld [vmem:[#allocation11 + $0x298] sm:$0xff]  ;;  %v2570_v17 = vld [vmem:[#allocation11 + $0x220] sm:$0xff] }
 0x401   : > { %v2377_v58 = vrot.slane %v7121_v47, 1  ;;  %v2110_v12 = vmax.f32 %v2080_v57, 0.0  ;;  %v7175_v63 = vmul.f32 %v6925_v36, %v2112_v22  ;;  %v2115_v3 = vmax.f32 %v2085_v10, 0.0  ;;  %v2586_v22 = vld [vmem:[#allocation11 + $0x2a0] sm:$0xff] }
 0x402   : > { %v7184_v50 = vmul.f32 %v6933_v52, %v2114_v40  ;;  %v7192_v32 = vmul.f32 %v7988_v55, %v2113_v48  ;;  %v4537_v51 = vpack.c.bf16 %v2585_v2, %v2584_v45  ;;  %v4539_v41 = vpack.c.bf16 %v2569_v14, %v2568_v39  ;;  %v2571_v40 = vld [vmem:[#allocation11 + $0x228] sm:$0xff]  ;;  %v2589_v48 = vld [vmem:[#allocation11 + $0x2b8] sm:$0xff]  ;;  %v2592_v2 = vld [vmem:[#allocation11 + $0x2d0] sm:$0xff] }
 0x403   : > { %v7137_v26 = vsel %vm549_vm0, %v2376_v9, %v2377_v58  ;;  %v7149_v13 = vsel %vm549_vm0, %v2377_v58, %v2379_v42  ;;  %v7168_v0 = vmul.f32 %v6917_v49, %v2110_v12  ;;  %v2389_v30 = vrot.slane %v7175_v63, 1  ;;  %v2573_v55 = vld [vmem:[#allocation11 + $0x238] sm:$0xff]  ;;  %v2576_v14 = vld [vmem:[#allocation11 + $0x250] sm:$0xff] }
 0x404   : > { %2750 = vmatprep.mubr.f32.mxu1 %v7137_v26  ;;  %v7195_v59 = vmul.f32 %v7989_v11, %v2115_v3  ;;  %v2392_v52 = vrot.slane %v7184_v50, 1  ;;  %v2391_v58 = vrot.slane %v7192_v32, 1  ;;  %v4535_v12 = vpack.c.bf16 %v2567_v43, %v2566_v1  ;;  %v2572_v3 = vld [vmem:[#allocation11 + $0x230] sm:$0xff]  ;;  %v2575_v1 = vld [vmem:[#allocation11 + $0x248] sm:$0xff] }
 0x405   : > { %2751 = vmatmul.mubr.f32.gmra.mrb[78].mxu1 %v7112_v62  ;;  %v2386_v49 = vrot.slane %v7168_v0, 1  ;;  %v7199_v9 = vsel %vm549_vm0, %v2387_v5, %v2389_v30  ;;  %v4541_v18 = vpack.c.bf16 %v2587_v34, %v2586_v22  ;;  %v2418_v10 = vrot.slane %v7011_v7, 2  ;;  %v2577_v22 = vld [vmem:[#allocation11 + $0x258] sm:$0xff] }
 0x406   : > { %2755 = vmatprep.mubr.f32.mxu1 %v7149_v13  ;;  %v2394_v42 = vrot.slane %v7195_v59, 1  ;;  %v7207_v57 = vsel %vm549_vm0, %v2391_v58, %v2392_v52  ;;  %v2591_v58 = vld [vmem:[#allocation11 + $0x2c8] sm:$0xff]  ;;  %v2423_v45 = vrot.slane %v7042_v4, 2 }
 0x407   : > { %v7188_v36 = vsel %vm549_vm0, %v2386_v49, %v2387_v5  ;;  %v2588_v5 = vld [vmem:[#allocation11 + $0x2b0] sm:$0xff]  ;;  %v2417_v49 = vrot.slane %v7007_v61, 2 }
 0x408   : > { %v7212_v46 = vsel %vm549_vm0, %v2392_v52, %v2394_v42  ;;  %v4545_v30 = vpack.c.bf16 %v2589_v48, %v2588_v5  ;;  %v2420_v52 = vrot.slane %v7019_v60, 2  ;;  %v2574_v42 = vld [vmem:[#allocation11 + $0x240] sm:$0xff]  ;;  %v2422_v60 = vrot.slane %v7037_v23, 2  ;;  %v2579_v48 = vld [vmem:[#allocation11 + $0x268] sm:$0xff] }
 0x409   : > { %2756 = vmatmul.mubr.f32.gmra.mrb[80].mxu1 %v7121_v47  ;;  %v7224_v11 = vsel %vm650_vm1, %v2417_v49, %v2418_v10  ;;  %v2578_v5 = vld [vmem:[#allocation11 + $0x260] sm:$0xff] }
 0x40a   : > { %2760 = vmatprep.mubr.f32.mxu1 %v7157_v6  ;;  %v7230_v43 = vsel %vm650_vm1, %v2418_v10, %v2420_v52  ;;  %v7237_v34 = vsel %vm650_vm1, %v2422_v60, %v2423_v45  ;;  %v2433_v60 = vrot.slane %v7121_v47, 2 }
 0x40d   : > { %2761 = vmatmul.mubr.f32.gmra.mrb[82].mxu1 %v7132_v56 }
 0x40e   : > { %2765 = vmatprep.mubr.f32.mxu1 %v7172_v8 }
 0x411   : > { %2766 = vmatmul.mubr.f32.gmra.mrb[84].mxu1 %v7124_v54 }
 0x412   : > { %2770 = vmatprep.mubr.f32.mxu1 %v7188_v36 }
 0x415   : > { %2771 = vmatmul.mubr.f32.gmra.mrb[86].mxu1 %v7168_v0 }
 0x416   : > { %2775 = vmatprep.mubr.f32.mxu1 %v7199_v9 }
 0x419   : > { %2776 = vmatmul.mubr.f32.gmra.mrb[88].mxu1 %v7160_v16 }
 0x41a   : > { %2780 = vmatprep.mubr.f32.mxu1 %v7207_v57 }
 0x41d   : > { %2781 = vmatmul.mubr.f32.gmra.mrb[90].mxu1 %v7192_v32 }
 0x41e   : > { %2785 = vmatprep.mubr.f32.mxu1 %v7212_v46 }
 0x421   : > { %2786 = vmatmul.mubr.f32.gmra.mrb[92].mxu1 %v7184_v50 }
 0x422   : > { %2855 = vmatprep.mubr.f32.mxu1 %v7007_v61 }
 0x425   : > { %2856 = vmatmul.mubr.f32.vlgmr.msra.gmra.mrb[94].mxu1 %v6997_v31  ;;  %v4543_v31 = vpack.c.bf16 %v2571_v40, %v2570_v17  ;;  %v2595_v17 = vld [vmem:[#allocation11 + $0x2e8] sm:$0xff]  ;;  %v4555_v40 = vpack.c.bf16 %v2577_v22, %v2576_v14  ;;  %v2438_v22 = vrot.slane %v7124_v54, 2 }
 0x426   : > { %2860 = vmatprep.mubr.f32.mxu1 %v7011_v7  ;;  %4536 = vmatpush3.bf16.msra.mxu1 %v4535_v12  ;;  %v2590_v7 = vld [vmem:[#allocation11 + $0x2c0] sm:$0xff]  ;;  %v2593_v12 = vld [vmem:[#allocation11 + $0x2d8] sm:$0xff] }
 0x427   : > { %4538 = vmatprep.subr.bf16.mxu1 %v4537_v51  ;;  %v4549_v61 = vpack.c.bf16 %v2591_v58, %v2590_v7  ;;  %v4551_v51 = vpack.c.bf16 %v2575_v1, %v2574_v42  ;;  %v4553_v39 = vpack.c.bf16 %v2593_v12, %v2592_v2  ;;  %v2580_v7 = vld [vmem:[#allocation11 + $0x270] sm:$0xff]  ;;  %v2581_v58 = vld [vmem:[#allocation11 + $0x278] sm:$0xff]  ;;  %v2614_v42 = vld [vmem:[#allocation11 + $0x380] sm:$0xff] }
 0x428   : > { %v2615_v1 = vld [vmem:[#allocation11 + $0x388] sm:$0xff] }
 0x429   : > { %2861 = vmatmul.mubr.f32.gmra.mrb[96].mxu1 %v7004_v24  ;;  %v4547_v24 = vpack.c.bf16 %v2573_v55, %v2572_v3  ;;  %v2597_v3 = vld [vmem:[#allocation11 + $0x2f8] sm:$0xff]  ;;  %v4559_v55 = vpack.c.bf16 %v2579_v48, %v2578_v5  ;;  %v4565_v2 = vpack.c.bf16 %v2615_v1, %v2614_v42  ;;  %v2448_v42 = vrot.slane %v7184_v50, 2 }
 0x42a   : > { %2865 = vmatprep.mubr.f32.mxu1 %v7037_v23  ;;  %4540 = vmatpush3.bf16.msra.mxu1 %v4539_v41  ;;  %v2425_v41 = vrot.slane %v7050_v53, 2  ;;  %v2427_v53 = vrot.slane %v7068_v33, 2  ;;  %v7993_v1 = vld [vmem:[#allocation41_spill] sm:$0xff] }
 0x42b   : > { %4542 = vmatprep.subr.bf16.mxu1 %v4541_v18  ;;  %v2594_v18 = vld [vmem:[#allocation11 + $0x2e0] sm:$0xff] }
 0x42c   : > { %v4557_v10 = vpack.c.bf16 %v2595_v17, %v2594_v18  ;;  %v7243_v49 = vsel %vm650_vm1, %v2423_v45, %v2425_v41  ;;  %v4563_v45 = vpack.c.bf16 %v2581_v58, %v2580_v7  ;;  %v2437_v41 = vrot.slane %v7132_v56, 2  ;;  %v7990_v17 = vld [vmem:[#allocation35_spill] sm:$0xff] }
 0x42d   : > { %2866 = vmatmul.mubr.f32.gmra.mrb[98].mxu1 %v7224_v11  ;;  %v2440_v18 = vrot.slane %v7140_v15, 2  ;;  %v2443_v15 = vrot.slane %v7160_v16, 2 }
 0x42e   : > { %2870 = vmatprep.mubr.f32.mxu1 %v7042_v4  ;;  %4544 = vmatpush3.bf16.msra.mxu1 %v4543_v31  ;;  %v2428_v31 = vrot.slane %v7075_v25, 2 }
 0x42f   : > { %4546 = vmatprep.subr.bf16.mxu1 %v4545_v30  ;;  %v2596_v30 = vld [vmem:[#allocation11 + $0x2f0] sm:$0xff] }
 0x430   : > { %v4561_v52 = vpack.c.bf16 %v2597_v3, %v2596_v30  ;;  %v2442_v30 = vrot.slane %v7168_v0, 2  ;;  %v2445_v3 = vrot.slane %v7175_v63, 2  ;;  %v2450_v63 = vrot.slane %v7195_v59, 2 }
 0x431   : > { %2871 = vmatmul.mubr.f32.gmra.mrb[100].mxu1 %v7230_v43 }
 0x432   : > { %2875 = vmatprep.mubr.f32.mxu1 %v7068_v33  ;;  %4548 = vmatpush3.bf16.msra.mxu1 %v4547_v24  ;;  %v7250_v24 = vsel %vm650_vm1, %v2427_v53, %v2428_v31 }
 0x433   : > { %4550 = vmatprep.subr.bf16.mxu1 %v4549_v61  ;;  %v2430_v61 = vrot.slane %v7088_v29, 2  ;;  %v2432_v29 = vrot.slane %v7112_v62, 2 }
 0x435   : > { %2876 = vmatmul.mubr.f32.gmra.mrb[102].mxu1 %v7237_v34  ;;  %v7256_v12 = vsel %vm650_vm1, %v2428_v31, %v2430_v61  ;;  %v7287_v31 = vsel %vm650_vm1, %v2438_v22, %v2440_v18  ;;  %v7304_v61 = vsel %vm650_vm1, %v2443_v15, %v2445_v3  ;;  %v2603_v3 = vld [vmem:[#allocation11 + $0x328] sm:$0xff] }
 0x436   : > { %2880 = vmatprep.mubr.f32.mxu1 %v7075_v25  ;;  %4552 = vmatpush3.bf16.msra.mxu1 %v4551_v51  ;;  %v7263_v51 = vsel %vm650_vm1, %v2432_v29, %v2433_v60  ;;  %v2599_v29 = vld [vmem:[#allocation11 + $0x308] sm:$0xff] }
 0x437   : > { %4554 = vmatprep.subr.bf16.mxu1 %v4553_v39  ;;  %v2435_v39 = vrot.slane %v7116_v27, 2  ;;  %v7279_v27 = vsel %vm650_vm1, %v2437_v41, %v2438_v22  ;;  %v2616_v22 = vld [vmem:[#allocation11 + $0x390] sm:$0xff]  ;;  %v2617_v41 = vld [vmem:[#allocation11 + $0x398] sm:$0xff] }
 0x438   : > { %v4569_v18 = vpack.c.bf16 %v2617_v41, %v2616_v22 }
 0x439   : > { %2881 = vmatmul.mubr.f32.gmra.mrb[104].mxu1 %v7243_v49  ;;  %v7269_v14 = vsel %vm650_vm1, %v2433_v60, %v2435_v39  ;;  %v2598_v60 = vld [vmem:[#allocation11 + $0x300] sm:$0xff]  ;;  %v7320_v39 = vsel %vm650_vm1, %v2448_v42, %v2450_v63 }
 0x43a   : > { %2885 = vmatprep.mubr.f32.mxu1 %v7112_v62  ;;  %4556 = vmatpush3.bf16.msra.mxu1 %v4555_v40  ;;  %v2049_v40 = vmul.f32 %v6939_v44, %v7990_v17  ;;  %v4567_v59 = vpack.c.bf16 %v2599_v29, %v2598_v60  ;;  %v2600_v17 = vld [vmem:[#allocation11 + $0x310] sm:$0xff]  ;;  %v2625_v29 = vld [vmem:[#allocation11 + $0x3d8] sm:$0xff] }
 0x43b   : > { %4558 = vmatprep.subr.bf16.mxu1 %v4557_v10  ;;  %v7991_v10 = vld [vmem:[#allocation34_spill] sm:$0xff]  ;;  %v2624_v60 = vld [vmem:[#allocation11 + $0x3d0] sm:$0xff] }
 0x43c   : > { %v2050_v5 = vmul.f32 %v6939_v44, %v7991_v10  ;;  %v2086_v48 = vadd.f32 %v6947_v21, %v2049_v40  ;;  %v7296_v44 = vsel %vm650_vm1, %v2442_v30, %v2443_v15  ;;  %v2601_v40 = vld [vmem:[#allocation11 + $0x318] sm:$0xff]  ;;  %v2618_v10 = vld [vmem:[#allocation11 + $0x3a0] sm:$0xff]  ;;  %v4585_v41 = vpack.c.bf16 %v2625_v29, %v2624_v60 }
 0x43d   : > { %2886 = vmatmul.mubr.f32.gmra.mrb[106].mxu1 %v7250_v24  ;;  %v2602_v30 = vld [vmem:[#allocation11 + $0x320] sm:$0xff] }
 0x43e   : > { %2890 = vmatprep.mubr.f32.mxu1 %v7121_v47  ;;  %4560 = vmatpush3.bf16.msra.mxu1 %v4559_v55  ;;  %v2116_v53 = vmax.f32 %v2086_v48, 0.0  ;;  %v2087_v55 = vadd.f32 %v6947_v21, %v2050_v5  ;;  %v2447_v21 = vrot.slane %v7192_v32, 2  ;;  %v2619_v5 = vld [vmem:[#allocation11 + $0x3a8] sm:$0xff]  ;;  %v4571_v48 = vpack.c.bf16 %v2601_v40, %v2600_v17  ;;  %v2626_v17 = vld [vmem:[#allocation11 + $0x3e0] sm:$0xff] }
 0x43f   : > { %4562 = vmatprep.subr.bf16.mxu1 %v4561_v52  ;;  %v7992_v52 = vld [vmem:[#allocation38_spill] sm:$0xff]  ;;  %v4573_v15 = vpack.c.bf16 %v2619_v5, %v2618_v10 }
 0x440   : > { %v7301_v7 = vmul.f32 %v7992_v52, %v2116_v53  ;;  %v2117_v58 = vmax.f32 %v2087_v55, 0.0  ;;  %v2620_v53 = vld [vmem:[#allocation11 + $0x3b0] sm:$0xff]  ;;  %v2621_v55 = vld [vmem:[#allocation11 + $0x3b8] sm:$0xff]  ;;  %v2627_v40 = vld [vmem:[#allocation11 + $0x3e8] sm:$0xff] }
 0x441   : > { %2891 = vmatmul.mubr.f32.gmra.mrb[108].mxu1 %v7256_v12  ;;  %v4577_v52 = vpack.c.bf16 %v2621_v55, %v2620_v53  ;;  %v4589_v5 = vpack.c.bf16 %v2627_v40, %v2626_v17 }
 0x442   : > { %2895 = vmatprep.mubr.f32.mxu1 %v7132_v56  ;;  %4564 = vmatpush3.bf16.msra.mxu1 %v4563_v45  ;;  %v7312_v45 = vmul.f32 %v7993_v1, %v2117_v58  ;;  %v2604_v58 = vld [vmem:[#allocation11 + $0x330] sm:$0xff]  ;;  %v2606_v1 = vld [vmem:[#allocation11 + $0x340] sm:$0xff] }
 0x443   : > { %4566 = vmatprep.subr.bf16.mxu1 %v4565_v2  ;;  %v7315_v2 = vsel %vm650_vm1, %v2447_v21, %v2448_v42  ;;  %v2622_v42 = vld [vmem:[#allocation11 + $0x3c0] sm:$0xff] }
 0x444   : > { %v2472_v17 = vrot.slane %v7312_v45, 1 }
 0x445   : > { %2896 = vmatmul.mubr.f32.gmra.mrb[110].mxu1 %v7263_v51 }
 0x446   : > { %2900 = vmatprep.mubr.f32.mxu1 %v7124_v54 }
 0x449   : > { %2901 = vmatmul.mubr.f32.gmra.mrb[112].mxu1 %v7269_v14 }
 0x44a   : > { %2905 = vmatprep.mubr.f32.mxu1 %v7168_v0 }
 0x44d   : > { %2906 = vmatmul.mubr.f32.gmra.mrb[114].mxu1 %v7279_v27 }
 0x44e   : > { %2910 = vmatprep.mubr.f32.mxu1 %v7160_v16 }
 0x451   : > { %2911 = vmatmul.mubr.f32.gmra.mrb[116].mxu1 %v7287_v31 }
 0x452   : > { %2915 = vmatprep.mubr.f32.mxu1 %v7192_v32 }
 0x455   : > { %2916 = vmatmul.mubr.f32.gmra.mrb[118].mxu1 %v7296_v44 }
 0x456   : > { %2920 = vmatprep.mubr.f32.mxu1 %v7184_v50 }
 0x459   : > { %2921 = vmatmul.mubr.f32.gmra.mrb[120].mxu1 %v7304_v61 }
 0x45a   : > { %2925 = vmatprep.mubr.f32.mxu1 %v7301_v7 }
 0x45d   : > { %2926 = vmatmul.mubr.f32.gmra.mrb[122].mxu1 %v7315_v2 }
 0x45e   : > { %2930 = vmatprep.mubr.f32.mxu1 %v7312_v45 }
 0x461   : > { %2931 = vmatmul.mubr.f32.gmra.mrb[124].mxu1 %v7320_v39 }
 0x462   : > { %3000 = vmatprep.mubr.f32.mxu1 %v7224_v11  ;;  %v4575_v11 = vpack.c.bf16 %v2603_v3, %v2602_v30  ;;  %v2628_v30 = vld [vmem:[#allocation11 + $0x3f0] sm:$0xff]  ;;  %v2629_v3 = vld [vmem:[#allocation11 + $0x3f8] sm:$0xff] }
 0x463   : > { %v4593_v55 = vpack.c.bf16 %v2629_v3, %v2628_v30 }
 0x465   : > { %3001 = vmatmul.mubr.f32.vlgmr.msra.gmra.mrb[126].mxu1 %v7024_v35  ;;  %v2605_v35 = vld [vmem:[#allocation11 + $0x338] sm:$0xff] }
 0x466   : > { %3005 = vmatprep.mubr.f32.mxu1 %v7230_v43  ;;  %4568 = vmatpush3.bf16.msra.mxu1 %v4567_v59  ;;  %v2623_v43 = vld [vmem:[#allocation11 + $0x3c8] sm:$0xff]  ;;  %v4579_v21 = vpack.c.bf16 %v2605_v35, %v2604_v58  ;;  %v2608_v59 = vld [vmem:[#allocation11 + $0x350] sm:$0xff]  ;;  %v2630_v58 = vld [vmem:[#allocation11 + $0x400] sm:$0xff] }
 0x467   : > { %4570 = vmatprep.subr.bf16.mxu1 %v4569_v18  ;;  %v4581_v63 = vpack.c.bf16 %v2623_v43, %v2622_v42  ;;  %v2609_v18 = vld [vmem:[#allocation11 + $0x358] sm:$0xff]  ;;  %v2631_v35 = vld [vmem:[#allocation11 + $0x408] sm:$0xff] }
 0x468   : > { %v4587_v10 = vpack.c.bf16 %v2609_v18, %v2608_v59  ;;  %v4597_v43 = vpack.c.bf16 %v2631_v35, %v2630_v58  ;;  %v2479_v59 = vrot.slane %v7312_v45, 2  ;;  %v2478_v18 = vrot.slane %v7301_v7, 2  ;;  %v2635_v58 = vld [vmem:[#allocation11 + $0x428] sm:$0xff] }
 0x469   : > { %3006 = vmatmul.mubr.f32.gmra.mrb[128].mxu1 %v7033_v19  ;;  %v2607_v19 = vld [vmem:[#allocation11 + $0x348] sm:$0xff] }
 0x46a   : > { %3010 = vmatprep.mubr.f32.mxu1 %v7237_v34  ;;  %4572 = vmatpush3.bf16.msra.mxu1 %v4571_v48  ;;  %v4583_v22 = vpack.c.bf16 %v2607_v19, %v2606_v1  ;;  %v2610_v48 = vld [vmem:[#allocation11 + $0x360] sm:$0xff]  ;;  %v5025_v19 = vld [vmem:[#allocation10] ss:$0 sm:$0xff] }
 0x46b   : > { %4574 = vmatprep.subr.bf16.mxu1 %v4573_v15  ;;  %v2611_v15 = vld [vmem:[#allocation11 + $0x368] sm:$0xff] }
 0x46c   : > { %v4591_v53 = vpack.c.bf16 %v2611_v15, %v2610_v48 }
 0x46d   : > { %3011 = vmatmul.mubr.f32.gmra.mrb[130].mxu1 %v7055_v37 }
 0x46e   : > { %3015 = vmatprep.mubr.f32.mxu1 %v7243_v49  ;;  %4576 = vmatpush3.bf16.msra.mxu1 %v4575_v11  ;;  %v2612_v11 = vld [vmem:[#allocation11 + $0x370] sm:$0xff] }
 0x46f   : > { %4578 = vmatprep.subr.bf16.mxu1 %v4577_v52  ;;  %v2613_v52 = vld [vmem:[#allocation11 + $0x378] sm:$0xff] }
 0x470   : > { %v4595_v42 = vpack.c.bf16 %v2613_v52, %v2612_v11  ;;  %v2634_v52 = vld [vmem:[#allocation11 + $0x420] sm:$0xff] }
 0x471   : > { %3016 = vmatmul.mubr.f32.gmra.mrb[132].mxu1 %v7064_v20  ;;  %v4605_v35 = vpack.c.bf16 %v2635_v58, %v2634_v52 }
 0x472   : > { %3020 = vmatprep.mubr.f32.mxu1 %v7250_v24  ;;  %4580 = vmatpush3.bf16.msra.mxu1 %v4579_v21  ;;  %v5024_v21 = vld [vmem:[#allocation8] ss:$0 sm:$0xff] }
 0x473   : > { %4582 = vmatprep.subr.bf16.mxu1 %v4581_v63  ;;  %v7994_v63 = vld [vmem:[#allocation36_spill] sm:$0xff] }
 0x474   : > { %v2051_v1 = vmul.f32 %v5024_v21, %v7994_v63  ;;  %v2636_v21 = vld [vmem:[#allocation11 + $0x430] sm:$0xff]  ;;  %v2637_v63 = vld [vmem:[#allocation11 + $0x438] sm:$0xff] }
 0x475   : > { %3021 = vmatmul.mubr.f32.gmra.mrb[134].mxu1 %v7093_v38 }
 0x476   : > { %3025 = vmatprep.mubr.f32.mxu1 %v7256_v12  ;;  %4584 = vmatpush3.bf16.msra.mxu1 %v4583_v22  ;;  %v2088_v60 = vadd.f32 %v5025_v19, %v2051_v1  ;;  %v7995_v22 = vld [vmem:[#allocation40_spill] sm:$0xff] }
 0x477   : > { %4586 = vmatprep.subr.bf16.mxu1 %v4585_v41 }
 0x478   : > { %v2118_v29 = vmax.f32 %v2088_v60, 0.0 }
 0x479   : > { %3026 = vmatmul.mubr.f32.gmra.mrb[136].mxu1 %v7105_v28 }
 0x47a   : > { %3030 = vmatprep.mubr.f32.mxu1 %v7263_v51  ;;  %4588 = vmatpush3.bf16.msra.mxu1 %v4587_v10  ;;  %v2328_v41 = vmul.f32 %v7995_v22, %v2118_v29  ;;  %v7357_v10 = vsel %vm650_vm1, %v2478_v18, %v2479_v59  ;;  %v2639_v29 = vld [vmem:[#allocation11 + $0x448] sm:$0xff]  ;;  %v2640_v22 = vld [vmem:[#allocation11 + $0x450] sm:$0xff]  ;;  %v2642_v18 = vld [vmem:[#allocation11 + $0x460] sm:$0xff] }
 0x47b   : > { %4590 = vmatprep.subr.bf16.mxu1 %v4589_v5  ;;  %v2471_v5 = vrot.slane %v7301_v7, 1 }
 0x47c   : > { %v2481_v40 = vrot.slane %v2328_v41, 2  ;;  %v2474_v48 = vrot.slane %v2328_v41, 1  ;;  %v2641_v41 = vld [vmem:[#allocation11 + $0x458] sm:$0xff] }
 0x47d   : > { %3031 = vmatmul.mubr.f32.gmra.mrb[138].mxu1 %v7137_v26  ;;  %v7362_v15 = vsel %vm549_vm0, %v2471_v5, %v2472_v17 }
 0x47e   : > { %3035 = vmatprep.mubr.f32.mxu1 %v7269_v14  ;;  %4592 = vmatpush3.bf16.msra.mxu1 %v4591_v53  ;;  %v7366_v30 = vsel %vm650_vm1, %v2479_v59, %v2481_v40  ;;  %v7370_v3 = vsel %vm549_vm0, %v2472_v17, %v2474_v48  ;;  %v2632_v53 = vld [vmem:[#allocation11 + $0x410] sm:$0xff]  ;;  %v2643_v17 = vld [vmem:[#allocation11 + $0x468] sm:$0xff]  ;;  %v2645_v48 = vld [vmem:[#allocation11 + $0x478] sm:$0xff] }
 0x47f   : > { %4594 = vmatprep.subr.bf16.mxu1 %v4593_v55  ;;  %v2633_v55 = vld [vmem:[#allocation11 + $0x418] sm:$0xff] }
 0x480   : > { %v4601_v11 = vpack.c.bf16 %v2633_v55, %v2632_v53 }
 0x481   : > { %3036 = vmatmul.mubr.f32.gmra.mrb[140].mxu1 %v7149_v13 }
 0x482   : > { %3040 = vmatprep.mubr.f32.mxu1 %v7279_v27  ;;  %4596 = vmatpush3.bf16.msra.mxu1 %v4595_v42 }
 0x483   : > { %4598 = vmatprep.subr.bf16.mxu1 %v4597_v43 }
 0x485   : > { %3041 = vmatmul.mubr.f32.gmra.mrb[142].mxu1 %v7157_v6 }
 0x486   : > { %3045 = vmatprep.mubr.f32.mxu1 %v7287_v31 }
 0x489   : > { %3046 = vmatmul.mubr.f32.gmra.mrb[144].mxu1 %v7172_v8 }
 0x48a   : > { %3050 = vmatprep.mubr.f32.mxu1 %v7296_v44 }
 0x48d   : > { %3051 = vmatmul.mubr.f32.gmra.mrb[146].mxu1 %v7188_v36 }
 0x48e   : > { %3055 = vmatprep.mubr.f32.mxu1 %v7304_v61 }
 0x491   : > { %3056 = vmatmul.mubr.f32.gmra.mrb[148].mxu1 %v7199_v9 }
 0x492   : > { %3060 = vmatprep.mubr.f32.mxu1 %v7315_v2 }
 0x495   : > { %3061 = vmatmul.mubr.f32.gmra.mrb[150].mxu1 %v7207_v57 }
 0x496   : > { %3065 = vmatprep.mubr.f32.mxu1 %v7320_v39 }
 0x499   : > { %3066 = vmatmul.mubr.f32.gmra.mrb[152].mxu1 %v7212_v46 }
 0x49a   : > { %3070 = vmatprep.mubr.f32.mxu1 %v7357_v10 }
 0x49d   : > { %3071 = vmatmul.mubr.f32.gmra.mrb[154].mxu1 %v7362_v15 }
 0x49e   : > { %3075 = vmatprep.mubr.f32.mxu1 %v7366_v30 }
 0x4a1   : > { %3076 = vmatmul.mubr.f32.gmra.mrb[156].mxu1 %v7370_v3 }
 0x4a2   : > { %3145 = vmatprep.mubr.f32.mxu1 %v7055_v37  ;;  %v4609_v37 = vpack.c.bf16 %v2637_v63, %v2636_v21  ;;  %v7998_v21 = vld [vmem:[#allocation47_spill] sm:$0xff]  ;;  %v7999_v63 = vld [vmem:[#allocation42_spill] sm:$0xff] }
 0x4a5   : > { %3146 = vmatmul.mubr.f32.vlgmr.msra.gmra.mrb[158].mxu1 %v7037_v23  ;;  %v2638_v23 = vld [vmem:[#allocation11 + $0x440] sm:$0xff] }
 0x4a6   : > { %3150 = vmatprep.mubr.f32.mxu1 %v7064_v20  ;;  %4600 = vmatpush3.bf16.msra.mxu1 %v4597_v43 }
 0x4a7   : > { %4602 = vmatprep.subr.bf16.mxu1 %v4601_v11 }
 0x4a8   : > { %v3792_v42 = vpop.f32.mrb[62].mxu1 }
 0x4a9   : > { %v3793_v1 = vpop.f32.mrb[63].mxu1  ;;  %3151 = vmatmul.mubr.f32.gmra.mrb[160].mxu1 %v7042_v4  ;;  %v4613_v4 = vpack.c.bf16 %v2639_v29, %v2638_v23 }
 0x4aa   : > { %v7377_v19 = vadd.f32 %v3793_v1, %v3792_v42  ;;  %3155 = vmatprep.mubr.f32.mxu1 %v7093_v38  ;;  %4604 = vmatpush3.bf16.msra.mxu1 %v4601_v11  ;;  %v4617_v38 = vpack.c.bf16 %v2641_v41, %v2640_v22  ;;  %v7997_v42 = vld [vmem:[#allocation43_spill] sm:$0xff] }
 0x4ab   : > { %4606 = vmatprep.subr.bf16.mxu1 %v4605_v35 }
 0x4ac   : > { %v3795_v60 = vpop.f32.mrb[64].mxu1 }
 0x4ad   : > { %v3796_v20 = vpop.f32.mrb[65].mxu1  ;;  %3156 = vmatmul.mubr.f32.gmra.mrb[162].mxu1 %v7068_v33 }
 0x4ae   : > { %v7381_v43 = vadd.f32 %v3796_v20, %v3795_v60  ;;  %3160 = vmatprep.mubr.f32.mxu1 %v7105_v28  ;;  %4608 = vmatpush3.bf16.msra.mxu1 %v4605_v35  ;;  %v4621_v28 = vpack.c.bf16 %v2643_v17, %v2642_v18 }
 0x4af   : > { %4610 = vmatprep.subr.bf16.mxu1 %v4609_v37 }
 0x4b1   : > { %3161 = vmatmul.mubr.f32.gmra.mrb[164].mxu1 %v7075_v25  ;;  %v2644_v25 = vld [vmem:[#allocation11 + $0x470] sm:$0xff] }
 0x4b2   : > { %3165 = vmatprep.mubr.f32.mxu1 %v7137_v26  ;;  %4612 = vmatpush3.bf16.msra.mxu1 %v4609_v37 }
 0x4b3   : > { %4614 = vmatprep.subr.bf16.mxu1 %v4613_v4 }
 0x4b4   : > { %v3798_v59 = vpop.f32.mrb[66].mxu1 }
 0x4b5   : > { %v3799_v33 = vpop.f32.mrb[67].mxu1  ;;  %3166 = vmatmul.mubr.f32.gmra.mrb[166].mxu1 %v7112_v62  ;;  %v4625_v62 = vpack.c.bf16 %v2645_v48, %v2644_v25 }
 0x4b6   : > { %v7387_v40 = vadd.f32 %v3799_v33, %v3798_v59  ;;  %3170 = vmatprep.mubr.f32.mxu1 %v7149_v13  ;;  %4616 = vmatpush3.bf16.msra.mxu1 %v4613_v4 }
 0x4b7   : > { %4618 = vmatprep.subr.bf16.mxu1 %v4617_v38 }
 0x4b8   : > { %v3801_v5 = vpop.f32.mrb[68].mxu1 }
 0x4b9   : > { %v3802_v26 = vpop.f32.mrb[69].mxu1  ;;  %3171 = vmatmul.mubr.f32.gmra.mrb[168].mxu1 %v7121_v47 }
 0x4ba   : > { %v7391_v53 = vadd.f32 %v3802_v26, %v3801_v5  ;;  %3175 = vmatprep.mubr.f32.mxu1 %v7157_v6  ;;  %4620 = vmatpush3.bf16.msra.mxu1 %v4617_v38 }
 0x4bb   : > { %4622 = vmatprep.subr.bf16.mxu1 %v4621_v28 }
 0x4bd   : > { %3176 = vmatmul.mubr.f32.gmra.mrb[170].mxu1 %v7132_v56 }
 0x4be   : > { %3180 = vmatprep.mubr.f32.mxu1 %v7172_v8  ;;  %4624 = vmatpush3.bf16.msra.mxu1 %v4621_v28  ;;  %v8001_v28 = vld [vmem:[#allocation46_spill] sm:$0xff] }
 0x4bf   : > { %4626 = vmatprep.subr.bf16.mxu1 %v4625_v62 }
 0x4c0   : > { %v3804_v13 = vpop.f32.mrb[70].mxu1 }
 0x4c1   : > { %v3805_v55 = vpop.f32.mrb[71].mxu1  ;;  %3181 = vmatmul.mubr.f32.gmra.mrb[172].mxu1 %v7124_v54 }
 0x4c2   : > { %v7397_v11 = vadd.f32 %v3805_v55, %v3804_v13  ;;  %3185 = vmatprep.mubr.f32.mxu1 %v7188_v36  ;;  %4628 = vmatpush3.bf16.msra.mxu1 %v4625_v62 }
 0x4c4   : > { %v3807_v47 = vpop.f32.mrb[72].mxu1 }
 0x4c5   : > { %v3808_v6 = vpop.f32.mrb[73].mxu1  ;;  %3186 = vmatmul.mubr.f32.gmra.mrb[174].mxu1 %v7168_v0 }
 0x4c6   : > { %v7401_v52 = vadd.f32 %v3808_v6, %v3807_v47  ;;  %3190 = vmatprep.mubr.f32.mxu1 %v7199_v9 }
 0x4c9   : > { %3191 = vmatmul.mubr.f32.gmra.mrb[176].mxu1 %v7160_v16 }
 0x4ca   : > { %3195 = vmatprep.mubr.f32.mxu1 %v7207_v57  ;;  %v7996_v57 = vld [vmem:[#allocation45_spill] sm:$0xff] }
 0x4cc   : > { %v3810_v56 = vpop.f32.mrb[74].mxu1 }
 0x4cd   : > { %v3811_v8 = vpop.f32.mrb[75].mxu1  ;;  %3196 = vmatmul.mubr.f32.gmra.mrb[178].mxu1 %v7192_v32 }
 0x4ce   : > { %v7407_v54 = vadd.f32 %v3811_v8, %v3810_v56  ;;  %3200 = vmatprep.mubr.f32.mxu1 %v7212_v46 }
 0x4d0   : > { %v3813_v36 = vpop.f32.mrb[76].mxu1 }
 0x4d1   : > { %v3814_v58 = vpop.f32.mrb[77].mxu1  ;;  %3201 = vmatmul.mubr.f32.gmra.mrb[180].mxu1 %v7184_v50 }
 0x4d2   : > { %v7411_v0 = vadd.f32 %v3814_v58, %v3813_v36  ;;  %3205 = vmatprep.mubr.f32.mxu1 %v7362_v15 }
 0x4d5   : > { %3206 = vmatmul.mubr.f32.gmra.mrb[182].mxu1 %v7301_v7 }
 0x4d6   : > { %3210 = vmatprep.mubr.f32.mxu1 %v7370_v3 }
 0x4d8   : > { %v3816_v16 = vpop.f32.mrb[78].mxu1 }
 0x4d9   : > { %v3817_v9 = vpop.f32.mrb[79].mxu1  ;;  %3211 = vmatmul.mubr.f32.gmra.mrb[184].mxu1 %v7312_v45 }
 0x4da   : > { %v7417_v32 = vadd.f32 %v3817_v9, %v3816_v16  ;;  %3215 = vmatprep.mubr.f32.mxu1 %v7996_v57 }
 0x4dc   : > { %v3819_v46 = vpop.f32.mrb[80].mxu1 }
 0x4dd   : > { %v3820_v35 = vpop.f32.mrb[81].mxu1  ;;  %3216 = vmatmul.mubr.f32.gmra.mrb[186].mxu1 %v7997_v42 }
 0x4de   : > { %v7421_v50 = vadd.f32 %v3820_v35, %v3819_v46  ;;  %3220 = vmatprep.mubr.f32.mxu1 %v7998_v21 }
 0x4e0   : > { %v3822_v15 = vpop.f32.mrb[82].mxu1 }
 0x4e1   : > { %v3823_v7 = vpop.f32.mrb[83].mxu1  ;;  %3221 = vmatmul.mubr.f32.gmra.mrb[188].mxu1 %v7999_v63 }
 0x4e2   : > { %v7425_v3 = vadd.f32 %v3823_v7, %v3822_v15  ;;  %4221 = vmatprep.mubr.f32.mxu1 %v7237_v34 }
 0x4e4   : > { %v3825_v45 = vpop.f32.mrb[84].mxu1 }
 0x4e5   : > { %v3826_v1 = vpop.f32.mrb[85].mxu1  ;;  %4222 = vmatmul.mubr.f32.vlgmr.msra.gmra.mrb[190].mxu1 %v7243_v49 }
 0x4e6   : > { %v7429_v37 = vadd.f32 %v3826_v1, %v3825_v45  ;;  %4224 = vmatprep.mubr.f32.mxu1 %v7250_v24 }
 0x4e8   : > { %v3828_v60 = vpop.f32.mrb[86].mxu1 }
 0x4e9   : > { %v3829_v23 = vpop.f32.mrb[87].mxu1  ;;  %4225 = vmatmul.mubr.f32.gmra.mrb[192].mxu1 %v7256_v12 }
 0x4ea   : > { %v7433_v29 = vadd.f32 %v3829_v23, %v3828_v60  ;;  %4227 = vmatprep.mubr.f32.mxu1 %v7263_v51 }
 0x4ec   : > { %v3831_v20 = vpop.f32.mrb[88].mxu1 }
 0x4ed   : > { %v3832_v4 = vpop.f32.mrb[89].mxu1  ;;  %4228 = vmatmul.mubr.f32.gmra.mrb[194].mxu1 %v7269_v14 }
 0x4ee   : > { %v7437_v34 = vadd.f32 %v3832_v4, %v3831_v20  ;;  %4230 = vmatprep.mubr.f32.mxu1 %v7279_v27 }
 0x4f0   : > { %v3834_v49 = vpop.f32.mrb[90].mxu1 }
 0x4f1   : > { %v3835_v22 = vpop.f32.mrb[91].mxu1  ;;  %4231 = vmatmul.mubr.f32.gmra.mrb[196].mxu1 %v7287_v31 }
 0x4f2   : > { %v7441_v24 = vadd.f32 %v3835_v22, %v3834_v49  ;;  %4233 = vmatprep.mubr.f32.mxu1 %v7296_v44 }
 0x4f4   : > { %v3837_v12 = vpop.f32.mrb[92].mxu1 }
 0x4f5   : > { %v3838_v41 = vpop.f32.mrb[93].mxu1  ;;  %4234 = vmatmul.mubr.f32.gmra.mrb[198].mxu1 %v7304_v61  ;;  %v8000_v61 = vld [vmem:[#allocation44_spill] sm:$0xff] }
 0x4f6   : > { %v7445_v51 = vadd.f32 %v3838_v41, %v3837_v12  ;;  %4236 = vmatprep.mubr.f32.mxu1 %v7315_v2 }
 0x4f8   : > { %v3872_v14 = vpop.f32.mrb[94].mxu1 }
 0x4f9   : > { %v3873_v38 = vpop.f32.mrb[95].mxu1  ;;  %4237 = vmatmul.mubr.f32.gmra.mrb[200].mxu1 %v7320_v39 }
 0x4fa   : > { %v3874_v27 = vadd.f32 %v3873_v38, %v3872_v14  ;;  %4239 = vmatprep.mubr.f32.mxu1 %v7357_v10 }
 0x4fc   : > { %v7451_v31 = vadd.f32 %v3874_v27, %v7377_v19  ;;  %v3875_v59 = vpop.f32.mrb[96].mxu1 }
 0x4fd   : > { %v3876_v44 = vpop.f32.mrb[97].mxu1  ;;  %4240 = vmatmul.mubr.f32.gmra.mrb[202].mxu1 %v7366_v30 }
 0x4fe   : > { %v3877_v18 = vadd.f32 %v3876_v44, %v3875_v59  ;;  %4242 = vmatprep.mubr.f32.mxu1 %v8000_v61 }
 0x500   : > { %v7456_v17 = vadd.f32 %v3877_v18, %v7381_v43  ;;  %v3878_v2 = vpop.f32.mrb[98].mxu1 }
 0x501   : > { %v3879_v33 = vpop.f32.mrb[99].mxu1  ;;  %4243 = vmatmul.mubr.f32.gmra.mrb[204].mxu1 %v8001_v28 }
 0x502   : > { %v3880_v39 = vadd.f32 %v3879_v33, %v3878_v2 }
 0x504   : > { %v7460_v10 = vadd.f32 %v3880_v39, %v7387_v40  ;;  %v3881_v19 = vpop.f32.mrb[100].mxu1 }
 0x505   : > { %v3882_v5 = vpop.f32.mrb[101].mxu1 }
 0x506   : > { %v3883_v25 = vadd.f32 %v3882_v5, %v3881_v19 }
 0x508   : > { %v7463_v48 = vadd.f32 %v3883_v25, %v7391_v53  ;;  %v3884_v30 = vpop.f32.mrb[102].mxu1 }
 0x509   : > { %v3885_v26 = vpop.f32.mrb[103].mxu1 }
 0x50a   : > { %v3886_v62 = vadd.f32 %v3885_v26, %v3884_v30 }
 0x50c   : > { %v7466_v43 = vadd.f32 %v3886_v62, %v7397_v11  ;;  %v3887_v13 = vpop.f32.mrb[104].mxu1 }
 0x50d   : > { %v3888_v55 = vpop.f32.mrb[105].mxu1 }
 0x50e   : > { %v3889_v47 = vadd.f32 %v3888_v55, %v3887_v13 }
 0x510   : > { %v7469_v6 = vadd.f32 %v3889_v47, %v7401_v52  ;;  %v3890_v40 = vpop.f32.mrb[106].mxu1 }
 0x511   : > { %v3891_v56 = vpop.f32.mrb[107].mxu1 }
 0x512   : > { %v3892_v8 = vadd.f32 %v3891_v56, %v3890_v40 }
 0x514   : > { %v7472_v36 = vadd.f32 %v3892_v8, %v7407_v54  ;;  %v3893_v53 = vpop.f32.mrb[108].mxu1 }
 0x515   : > { %v3894_v58 = vpop.f32.mrb[109].mxu1 }
 0x516   : > { %v3895_v16 = vadd.f32 %v3894_v58, %v3893_v53 }
 0x518   : > { %v7475_v9 = vadd.f32 %v3895_v16, %v7411_v0  ;;  %v3896_v11 = vpop.f32.mrb[110].mxu1 }
 0x519   : > { %v3897_v57 = vpop.f32.mrb[111].mxu1 }
 0x51a   : > { %v3898_v46 = vadd.f32 %v3897_v57, %v3896_v11 }
 0x51c   : > { %v7478_v35 = vadd.f32 %v3898_v46, %v7417_v32  ;;  %v3899_v52 = vpop.f32.mrb[112].mxu1 }
 0x51d   : > { %v3900_v42 = vpop.f32.mrb[113].mxu1 }
 0x51e   : > { %v3901_v21 = vadd.f32 %v3900_v42, %v3899_v52 }
 0x520   : > { %v7481_v15 = vadd.f32 %v3901_v21, %v7421_v50  ;;  %v3902_v54 = vpop.f32.mrb[114].mxu1 }
 0x521   : > { %v3903_v7 = vpop.f32.mrb[115].mxu1 }
 0x522   : > { %v3904_v63 = vadd.f32 %v3903_v7, %v3902_v54 }
 0x524   : > { %v7484_v45 = vadd.f32 %v3904_v63, %v7425_v3  ;;  %v3905_v0 = vpop.f32.mrb[116].mxu1 }
 0x525   : > { %v3906_v1 = vpop.f32.mrb[117].mxu1 }
 0x526   : > { %v3907_v60 = vadd.f32 %v3906_v1, %v3905_v0 }
 0x528   : > { %v7487_v23 = vadd.f32 %v3907_v60, %v7429_v37  ;;  %v3908_v32 = vpop.f32.mrb[118].mxu1 }
 0x529   : > { %v3909_v20 = vpop.f32.mrb[119].mxu1 }
 0x52a   : > { %v3910_v4 = vadd.f32 %v3909_v20, %v3908_v32 }
 0x52c   : > { %v7490_v49 = vadd.f32 %v3910_v4, %v7433_v29  ;;  %v3911_v50 = vpop.f32.mrb[120].mxu1 }
 0x52d   : > { %v3912_v22 = vpop.f32.mrb[121].mxu1 }
 0x52e   : > { %v3913_v12 = vadd.f32 %v3912_v22, %v3911_v50 }
 0x530   : > { %v7493_v41 = vadd.f32 %v3913_v12, %v7437_v34  ;;  %v3914_v3 = vpop.f32.mrb[122].mxu1 }
 0x531   : > { %v3915_v14 = vpop.f32.mrb[123].mxu1 }
 0x532   : > { %v3916_v38 = vadd.f32 %v3915_v14, %v3914_v3 }
 0x534   : > { %v7496_v27 = vadd.f32 %v3916_v38, %v7441_v24  ;;  %v3917_v37 = vpop.f32.mrb[124].mxu1 }
 0x535   : > { %v3918_v59 = vpop.f32.mrb[125].mxu1 }
 0x536   : > { %v3919_v44 = vadd.f32 %v3918_v59, %v3917_v37 }
 0x538   : > { %v7499_v18 = vadd.f32 %v3919_v44, %v7445_v51  ;;  %v3952_v29 = vpop.f32.mrb[126].mxu1 }
 0x539   : > { %v3953_v61 = vpop.f32.mrb[127].mxu1 }
 0x53a   : > { %v3954_v2 = vadd.f32 %v3953_v61, %v3952_v29 }
 0x53c   : > { %v7502_v33 = vadd.f32 %v3954_v2, %v7451_v31  ;;  %v3955_v34 = vpop.f32.mrb[128].mxu1 }
 0x53d   : > { %v3956_v28 = vpop.f32.mrb[129].mxu1 }
 0x53e   : > { %v3957_v39 = vadd.f32 %v3956_v28, %v3955_v34 }
 0x540   : > { %v7505_v19 = vadd.f32 %v3957_v39, %v7456_v17  ;;  %v3958_v24 = vpop.f32.mrb[130].mxu1 }
 0x541   : > { %v3959_v5 = vpop.f32.mrb[131].mxu1 }
 0x542   : > { %v3960_v25 = vadd.f32 %v3959_v5, %v3958_v24 }
 0x544   : > { %v7508_v30 = vadd.f32 %v3960_v25, %v7460_v10  ;;  %v3961_v51 = vpop.f32.mrb[132].mxu1 }
 0x545   : > { %v3962_v26 = vpop.f32.mrb[133].mxu1 }
 0x546   : > { %v3963_v62 = vadd.f32 %v3962_v26, %v3961_v51 }
 0x548   : > { %v7511_v13 = vadd.f32 %v3963_v62, %v7463_v48  ;;  %v3964_v31 = vpop.f32.mrb[134].mxu1 }
 0x549   : > { %v3965_v55 = vpop.f32.mrb[135].mxu1 }
 0x54a   : > { %v3966_v47 = vadd.f32 %v3965_v55, %v3964_v31 }
 0x54c   : > { %v7514_v40 = vadd.f32 %v3966_v47, %v7466_v43  ;;  %v3967_v17 = vpop.f32.mrb[136].mxu1 }
 0x54d   : > { %v3968_v56 = vpop.f32.mrb[137].mxu1 }
 0x54e   : > { %v3969_v8 = vadd.f32 %v3968_v56, %v3967_v17 }
 0x550   : > { %v7517_v53 = vadd.f32 %v3969_v8, %v7469_v6  ;;  %v3970_v10 = vpop.f32.mrb[138].mxu1 }
 0x551   : > { %v3971_v58 = vpop.f32.mrb[139].mxu1 }
 0x552   : > { %v3972_v16 = vadd.f32 %v3971_v58, %v3970_v10 }
 0x554   : > { %v7520_v11 = vadd.f32 %v3972_v16, %v7472_v36  ;;  %v3973_v48 = vpop.f32.mrb[140].mxu1 }
 0x555   : > { %v3974_v57 = vpop.f32.mrb[141].mxu1 }
 0x556   : > { %v3975_v46 = vadd.f32 %v3974_v57, %v3973_v48 }
 0x558   : > { %v7523_v52 = vadd.f32 %v3975_v46, %v7475_v9  ;;  %v3976_v43 = vpop.f32.mrb[142].mxu1 }
 0x559   : > { %v3977_v42 = vpop.f32.mrb[143].mxu1 }
 0x55a   : > { %v3978_v21 = vadd.f32 %v3977_v42, %v3976_v43 }
 0x55c   : > { %v7526_v54 = vadd.f32 %v3978_v21, %v7478_v35  ;;  %v3979_v6 = vpop.f32.mrb[144].mxu1 }
 0x55d   : > { %v3980_v7 = vpop.f32.mrb[145].mxu1 }
 0x55e   : > { %v3981_v63 = vadd.f32 %v3980_v7, %v3979_v6 }
 0x560   : > { %v7529_v0 = vadd.f32 %v3981_v63, %v7481_v15  ;;  %v3982_v36 = vpop.f32.mrb[146].mxu1 }
 0x561   : > { %v3983_v1 = vpop.f32.mrb[147].mxu1 }
 0x562   : > { %v3984_v60 = vadd.f32 %v3983_v1, %v3982_v36 }
 0x564   : > { %v7532_v32 = vadd.f32 %v3984_v60, %v7484_v45  ;;  %v3985_v9 = vpop.f32.mrb[148].mxu1 }
 0x565   : > { %v3986_v20 = vpop.f32.mrb[149].mxu1 }
 0x566   : > { %v3987_v4 = vadd.f32 %v3986_v20, %v3985_v9 }
 0x568   : > { %v7535_v50 = vadd.f32 %v3987_v4, %v7487_v23  ;;  %v3988_v35 = vpop.f32.mrb[150].mxu1 }
 0x569   : > { %v3989_v22 = vpop.f32.mrb[151].mxu1 }
 0x56a   : > { %v3990_v12 = vadd.f32 %v3989_v22, %v3988_v35 }
 0x56c   : > { %v7538_v3 = vadd.f32 %v3990_v12, %v7490_v49  ;;  %v3991_v15 = vpop.f32.mrb[152].mxu1 }
 0x56d   : > { %v3992_v14 = vpop.f32.mrb[153].mxu1 }
 0x56e   : > { %v3993_v38 = vadd.f32 %v3992_v14, %v3991_v15 }
 0x570   : > { %v7541_v37 = vadd.f32 %v3993_v38, %v7493_v41  ;;  %v3994_v45 = vpop.f32.mrb[154].mxu1 }
 0x571   : > { %v3995_v59 = vpop.f32.mrb[155].mxu1 }
 0x572   : > { %v3996_v44 = vadd.f32 %v3995_v59, %v3994_v45 }
 0x574   : > { %v7544_v29 = vadd.f32 %v3996_v44, %v7496_v27  ;;  %v3997_v23 = vpop.f32.mrb[156].mxu1 }
 0x575   : > { %v3998_v61 = vpop.f32.mrb[157].mxu1 }
 0x576   : > { %v3999_v2 = vadd.f32 %v3998_v61, %v3997_v23 }
 0x578   : > { %v7547_v34 = vadd.f32 %v3999_v2, %v7499_v18  ;;  %v4032_v49 = vpop.f32.mrb[158].mxu1 }
 0x579   : > { %v4033_v28 = vpop.f32.mrb[159].mxu1 }
 0x57a   : > { %v4034_v39 = vadd.f32 %v4033_v28, %v4032_v49 }
 0x57c   : > { %v4035_v24 = vpop.f32.mrb[160].mxu1  ;;  %v7550_v5 = vadd.f32 %v4034_v39, %v7502_v33 }
 0x57d   : > { %v4036_v41 = vpop.f32.mrb[161].mxu1 }
 0x57e   : > { %v4037_v25 = vadd.f32 %v4036_v41, %v4035_v24 }
 0x580   : > { %v4038_v51 = vpop.f32.mrb[162].mxu1  ;;  %v3153_v26 = vadd.f32 %v4037_v25, %v7505_v19 }
 0x581   : > { %v4039_v27 = vpop.f32.mrb[163].mxu1 }
 0x582   : > { %v4040_v62 = vadd.f32 %v4039_v27, %v4038_v51 }
 0x584   : > { %v4041_v31 = vpop.f32.mrb[164].mxu1  ;;  %v7554_v55 = vadd.f32 %v4040_v62, %v7508_v30 }
 0x585   : > { %v4042_v18 = vpop.f32.mrb[165].mxu1 }
 0x586   : > { %v4043_v47 = vadd.f32 %v4042_v18, %v4041_v31 }
 0x588   : > { %v4044_v17 = vpop.f32.mrb[166].mxu1  ;;  %v3163_v56 = vadd.f32 %v4043_v47, %v7511_v13 }
 0x589   : > { %v4045_v8 = vpop.f32.mrb[167].mxu1 }
 0x58a   : > { %v4046_v10 = vadd.f32 %v4045_v8, %v4044_v17  ;;  %v3692_v17 = vld [vmem:[%s5843_s23 + $0x42] sm:$0xff] }
 0x58c   : > { %v4047_v33 = vpop.f32.mrb[168].mxu1  ;;  %v7558_v58 = vadd.f32 %v4046_v10, %v7514_v40 }
 0x58d   : > { %v4048_v16 = vpop.f32.mrb[169].mxu1 }
 0x58e   : > { %v4049_v48 = vadd.f32 %v4048_v16, %v4047_v33 }
 0x590   : > { %v4050_v19 = vpop.f32.mrb[170].mxu1  ;;  %v7561_v57 = vadd.f32 %v4049_v48, %v7517_v53  ;;  %v3695_v48 = vld [vmem:[%s5843_s23 + $0x6a] sm:$0xff] }
 0x591   : > { %v4051_v46 = vpop.f32.mrb[171].mxu1 }
 0x592   : > { %v4052_v30 = vadd.f32 %v4051_v46, %v4050_v19 }
 0x594   : > { %v4053_v43 = vpop.f32.mrb[172].mxu1  ;;  %v7564_v42 = vadd.f32 %v4052_v30, %v7520_v11 }
 0x595   : > { %v4054_v21 = vpop.f32.mrb[173].mxu1 }
 0x596   : > { %v4055_v13 = vadd.f32 %v4054_v21, %v4053_v43  ;;  %v3694_v21 = vld [vmem:[%s5843_s23 + $0x62] sm:$0xff] }
 0x598   : > { %v4056_v6 = vpop.f32.mrb[174].mxu1  ;;  %v7567_v7 = vadd.f32 %v4055_v13, %v7523_v52 }
 0x599   : > { %v4057_v40 = vpop.f32.mrb[175].mxu1 }
 0x59a   : > { %v4058_v63 = vadd.f32 %v4057_v40, %v4056_v6 }
 0x59c   : > { %v4059_v36 = vpop.f32.mrb[176].mxu1  ;;  %v7570_v1 = vadd.f32 %v4058_v63, %v7526_v54 }
 0x59d   : > { %v4060_v53 = vpop.f32.mrb[177].mxu1 }
 0x59e   : > { %v4061_v60 = vadd.f32 %v4060_v53, %v4059_v36 }
 0x5a0   : > { %v4062_v9 = vpop.f32.mrb[178].mxu1  ;;  %v7573_v20 = vadd.f32 %v4061_v60, %v7529_v0 }
 0x5a1   : > { %v4063_v11 = vpop.f32.mrb[179].mxu1 }
 0x5a2   : > { %v4064_v4 = vadd.f32 %v4063_v11, %v4062_v9 }
 0x5a4   : > { %v4065_v35 = vpop.f32.mrb[180].mxu1  ;;  %v7576_v22 = vadd.f32 %v4064_v4, %v7532_v32  ;;  %v3696_v4 = vld [vmem:[%s5843_s23 + $0x82] sm:$0xff] }
 0x5a5   : > { %v4066_v52 = vpop.f32.mrb[181].mxu1 }
 0x5a6   : > { %v4067_v12 = vadd.f32 %v4066_v52, %v4065_v35 }
 0x5a8   : > { %v4068_v15 = vpop.f32.mrb[182].mxu1  ;;  %v7579_v14 = vadd.f32 %v4067_v12, %v7535_v50 }
 0x5a9   : > { %v4069_v54 = vpop.f32.mrb[183].mxu1 }
 0x5aa   : > { %v4070_v38 = vadd.f32 %v4069_v54, %v4068_v15 }
 0x5ac   : > { %v4071_v45 = vpop.f32.mrb[184].mxu1  ;;  %v7582_v59 = vadd.f32 %v4070_v38, %v7538_v3  ;;  %v7590_v3 = vld [vmem:[#allocation13] ss:$0 sm:$0xff] }
 0x5ad   : > { %v4072_v0 = vpop.f32.mrb[185].mxu1 }
 0x5ae   : > { %v4073_v44 = vadd.f32 %v4072_v0, %v4071_v45 }
 0x5b0   : > { %v4074_v23 = vpop.f32.mrb[186].mxu1  ;;  %v7585_v61 = vadd.f32 %v4073_v44, %v7541_v37  ;;  %v7595_v37 = vld [vmem:[#allocation14] ss:$0 sm:$0xff]  ;;  %v3699_v44 = vld [vmem:[%s5843_s23 + $0xaa] sm:$0xff] }
 0x5b1   : > { %v4075_v32 = vpop.f32.mrb[187].mxu1 }
 0x5b2   : > { %v4076_v2 = vadd.f32 %v4075_v32, %v4074_v23 }
 0x5b4   : > { %v4077_v49 = vpop.f32.mrb[188].mxu1  ;;  %v7588_v50 = vadd.f32 %v4076_v2, %v7544_v29  ;;  %v3693_v29 = vld [vmem:[%s5843_s23 + $0x4a] sm:$0xff] }
 0x5b5   : > { %v4078_v28 = vpop.f32.mrb[189].mxu1 }
 0x5b6   : > { %v4079_v39 = vadd.f32 %v4078_v28, %v4077_v49  ;;  %v3698_v49 = vld [vmem:[%s5843_s23 + $0xa2] sm:$0xff] }
 0x5b8   : > { %v4223_v24 = vpop.f32.mrb[190].mxu1  ;;  %v7593_v41 = vadd.f32 %v4079_v39, %v7547_v34 }
 0x5b9   : > { %v3298_v25 = vadd.f32 %v4223_v24, %v3153_v26  ;;  %v3292_v51 = vpop.f32.mrb[191].mxu1 }
 0x5ba   : > { %v3293_v27 = vadd.f32 %v3292_v51, %v7550_v5 }
 0x5bb   : > { %v3379_v62 = vmul.f32 %v7590_v3, %v3298_v25 }
 0x5bc   : > { %v3378_v31 = vmul.f32 %v7590_v3, %v3293_v27  ;;  %v4226_v18 = vpop.f32.mrb[192].mxu1 }
 0x5bd   : > { %v3402_v47 = vadd.f32 %v7595_v37, %v3379_v62  ;;  %v3308_v34 = vadd.f32 %v4226_v18, %v3163_v56  ;;  %v3302_v8 = vpop.f32.mrb[193].mxu1 }
 0x5be   : > { %v3401_v26 = vadd.f32 %v7595_v37, %v3378_v31  ;;  %v3303_v10 = vadd.f32 %v3302_v8, %v7554_v55 }
 0x5bf   : > { %v3435_v33 = vadd.f32 %v3693_v29, %v3402_v47  ;;  %v3381_v5 = vmul.f32 %v7590_v3, %v3308_v34  ;;  %v3701_v29 = vld [vmem:[%s5843_s23 + $0xca] sm:$0xff] }
 0x5c0   : > { %v3434_v16 = vadd.f32 %v3692_v17, %v3401_v26  ;;  %v3380_v19 = vmul.f32 %v7590_v3, %v3303_v10  ;;  %v4229_v46 = vpop.f32.mrb[194].mxu1  ;;  %v3700_v17 = vld [vmem:[%s5843_s23 + $0xc2] sm:$0xff] }
 0x5c1   : > { %v3451_v30 = vmax.f32 %v3435_v33, 0.0  ;;  %v3404_v43 = vadd.f32 %v7595_v37, %v3381_v5  ;;  %v3318_v56 = vadd.f32 %v4229_v46, %v7561_v57  ;;  %v3312_v13 = vpop.f32.mrb[195].mxu1  ;;  %v3697_v57 = vld [vmem:[%s5843_s23 + $0x8a] sm:$0xff] }
 0x5c2   : > { %v3450_v6 = vmax.f32 %v3434_v16, 0.0  ;;  %v3403_v55 = vadd.f32 %v7595_v37, %v3380_v19  ;;  %v3313_v40 = vadd.f32 %v3312_v13, %v7558_v58 }
 0x5c3   : > { %3467 = vst [vmem:[%s7614_s8 + $0x8] sm:$0xff] %v3451_v30  ;;  %v3437_v63 = vadd.f32 %v3695_v48, %v3404_v43  ;;  %v3383_v36 = vmul.f32 %v7590_v3, %v3318_v56  ;;  %v3703_v48 = vld [vmem:[%s5843_s23 + $0xea] sm:$0xff]  ;;  %v3702_v43 = vld [vmem:[%s5843_s23 + $0xe2] sm:$0xff] }
 0x5c4   : > { %3466 = vst [vmem:[%s7614_s8] sm:$0xff] %v3450_v6  ;;  %v3436_v53 = vadd.f32 %v3694_v21, %v3403_v55  ;;  %v3382_v60 = vmul.f32 %v7590_v3, %v3313_v40  ;;  %v4232_v9 = vpop.f32.mrb[196].mxu1 }
 0x5c5   : > { %v3453_v11 = vmax.f32 %v3437_v63, 0.0  ;;  %v3406_v58 = vadd.f32 %v7595_v37, %v3383_v36  ;;  %v3328_v35 = vadd.f32 %v4232_v9, %v7567_v7  ;;  %v3322_v52 = vpop.f32.mrb[197].mxu1  ;;  %v3705_v36 = vld [vmem:[%s5843_s23 + $0x10a] sm:$0xff]  ;;  %v3704_v9 = vld [vmem:[%s5843_s23 + $0x102] sm:$0xff] }
 0x5c6   : > { %v3452_v12 = vmax.f32 %v3436_v53, 0.0  ;;  %v3405_v15 = vadd.f32 %v7595_v37, %v3382_v60  ;;  %v3323_v54 = vadd.f32 %v3322_v52, %v7564_v42 }
 0x5c7   : > { %3469 = vst [vmem:[%s7614_s8 + $0x18] sm:$0xff] %v3453_v11  ;;  %v3439_v38 = vadd.f32 %v3697_v57, %v3406_v58  ;;  %v3385_v45 = vmul.f32 %v7590_v3, %v3328_v35 }
 0x5c8   : > { %3468 = vst [vmem:[%s7614_s8 + $0x10] sm:$0xff] %v3452_v12  ;;  %v3438_v0 = vadd.f32 %v3696_v4, %v3405_v15  ;;  %v3384_v23 = vmul.f32 %v7590_v3, %v3323_v54  ;;  %v4235_v32 = vpop.f32.mrb[198].mxu1  ;;  %v3707_v54 = vld [vmem:[%s5843_s23 + $0x12a] sm:$0xff] }
 0x5c9   : > { %v3455_v7 = vmax.f32 %v3439_v38, 0.0  ;;  %v3408_v2 = vadd.f32 %v7595_v37, %v3385_v45  ;;  %v3338_v42 = vadd.f32 %v4235_v32, %v7573_v20  ;;  %v3332_v28 = vpop.f32.mrb[199].mxu1 }
 0x5ca   : > { %v3454_v39 = vmax.f32 %v3438_v0, 0.0  ;;  %v3407_v24 = vadd.f32 %v7595_v37, %v3384_v23  ;;  %v3333_v25 = vadd.f32 %v3332_v28, %v7570_v1  ;;  %v3706_v0 = vld [vmem:[%s5843_s23 + $0x122] sm:$0xff]  ;;  %s3483_s23 = scalar_lea.sflag [#allocation4], %s5839_s26 }
 0x5cb   : > { %3471 = vst [vmem:[%s7614_s8 + $0x28] sm:$0xff] %v3455_v7  ;;  %v3441_v51 = vadd.f32 %v3699_v44, %v3408_v2  ;;  %v3387_v27 = vmul.f32 %v7590_v3, %v3338_v42 }
 0x5cc   : > { %3470 = vst [vmem:[%s7614_s8 + $0x20] sm:$0xff] %v3454_v39  ;;  %v3440_v62 = vadd.f32 %v3698_v49, %v3407_v24  ;;  %v3386_v31 = vmul.f32 %v7590_v3, %v3333_v25  ;;  %v4238_v18 = vpop.f32.mrb[200].mxu1 }
 0x5cd   : > { %v3457_v20 = vmax.f32 %v3441_v51, 0.0  ;;  %v3410_v47 = vadd.f32 %v7595_v37, %v3387_v27  ;;  %v3348_v1 = vadd.f32 %v4238_v18, %v7579_v14  ;;  %v3342_v34 = vpop.f32.mrb[201].mxu1 }
 0x5ce   : > { %v3456_v8 = vmax.f32 %v3440_v62, 0.0  ;;  %v3409_v26 = vadd.f32 %v7595_v37, %v3386_v31  ;;  %v3343_v10 = vadd.f32 %v3342_v34, %v7576_v22 }
 0x5cf   : > { %3473 = vst [vmem:[%s7614_s8 + $0x38] sm:$0xff] %v3457_v20  ;;  %v3443_v33 = vadd.f32 %v3701_v29, %v3410_v47  ;;  %v3389_v5 = vmul.f32 %v7590_v3, %v3348_v1 }
 0x5d0   : > { %3472 = vst [vmem:[%s7614_s8 + $0x30] sm:$0xff] %v3456_v8  ;;  %v3442_v16 = vadd.f32 %v3700_v17, %v3409_v26  ;;  %v3388_v19 = vmul.f32 %v7590_v3, %v3343_v10  ;;  %v4241_v46 = vpop.f32.mrb[202].mxu1 }
 0x5d1   : > { %v3459_v14 = vmax.f32 %v3443_v33, 0.0  ;;  %v3412_v30 = vadd.f32 %v7595_v37, %v3389_v5  ;;  %v3358_v22 = vadd.f32 %v4241_v46, %v7585_v61  ;;  %v3352_v21 = vpop.f32.mrb[203].mxu1 }
 0x5d2   : > { %v3458_v56 = vmax.f32 %v3442_v16, 0.0  ;;  %v3411_v13 = vadd.f32 %v7595_v37, %v3388_v19  ;;  %v3353_v6 = vadd.f32 %v3352_v21, %v7582_v59 }
 0x5d3   : > { %3475 = vst [vmem:[%s7614_s8 + $0x48] sm:$0xff] %v3459_v14  ;;  %v3445_v55 = vadd.f32 %v3703_v48, %v3412_v30  ;;  %v3391_v40 = vmul.f32 %v7590_v3, %v3358_v22 }
 0x5d4   : > { %3474 = vst [vmem:[%s7614_s8 + $0x40] sm:$0xff] %v3458_v56  ;;  %v3444_v63 = vadd.f32 %v3702_v43, %v3411_v13  ;;  %v3390_v53 = vmul.f32 %v7590_v3, %v3353_v6  ;;  %v4244_v57 = vpop.f32.mrb[204].mxu1 }
 0x5d5   : > { %v3461_v61 = vmax.f32 %v3445_v55, 0.0  ;;  %v3414_v60 = vadd.f32 %v7595_v37, %v3391_v40  ;;  %v3368_v59 = vadd.f32 %v4244_v57, %v7593_v41  ;;  %v3362_v11 = vpop.f32.mrb[205].mxu1 }
 0x5d6   : > { %v3460_v58 = vmax.f32 %v3444_v63, 0.0  ;;  %v3413_v4 = vadd.f32 %v7595_v37, %v3390_v53  ;;  %v3363_v35 = vadd.f32 %v3362_v11, %v7588_v50 }
 0x5d7   : > { %3477 = vst [vmem:[%s7614_s8 + $0x58] sm:$0xff] %v3461_v61  ;;  %v3447_v52 = vadd.f32 %v3705_v36, %v3414_v60  ;;  %v3393_v12 = vmul.f32 %v7590_v3, %v3368_v59 }
 0x5d8   : > { %3476 = vst [vmem:[%s7614_s8 + $0x50] sm:$0xff] %v3460_v58  ;;  %v3446_v15 = vadd.f32 %v3704_v9, %v3413_v4  ;;  %v3392_v38 = vmul.f32 %v7590_v3, %v3363_v35 }
 0x5d9   : > { %v3463_v41 = vmax.f32 %v3447_v52, 0.0  ;;  %v3416_v45 = vadd.f32 %v7595_v37, %v3393_v12 }
 0x5da   : > { %v3462_v50 = vmax.f32 %v3446_v15, 0.0  ;;  %v3415_v44 = vadd.f32 %v7595_v37, %v3392_v38 }
 0x5db   : > { %3479 = vst [vmem:[%s7614_s8 + $0x68] sm:$0xff] %v3463_v41  ;;  %v3449_v23 = vadd.f32 %v3707_v54, %v3416_v45 }
 0x5dc   : > { %3478 = vst [vmem:[%s7614_s8 + $0x60] sm:$0xff] %v3462_v50  ;;  %v3448_v32 = vadd.f32 %v3706_v0, %v3415_v44 }
 0x5dd   : > { %v3465_v7 = vmax.f32 %v3449_v23, 0.0 }
 0x5de   : > { %v3464_v3 = vmax.f32 %v3448_v32, 0.0 }
 0x5df   : > { %3481 = vst [vmem:[%s7614_s8 + $0x78] sm:$0xff] %v3465_v7 }
 0x5e0   : > { %3480 = vst [vmem:[%s7614_s8 + $0x70] sm:$0xff] %v3464_v3 }
 0x5e1   : > { %5267 = shalt.err (!%p5264_p7)
}
 0x5e2   : > { %s5268_s8 = scalar_lea.hbm %s7682_s21, 2048  ;;  %s5272_s1 = scalar_lea.hbm %s8004_s25, 8192 }
 0x5e3   : > { %p5269_p2 = scmp.ne.s32.totalorder %s7682_s21, %s5268_s8  ;;  %p5273_p0 = scmp.lt.u32.totalorder %s7682_s21, %s8004_s25 }
 0x5e4   : > { %p5274_p1 = scmp.lt.u32.totalorder %s5272_s1, %s5268_s8  ;;  %p5276_p6 = scmp.lt.u32.totalorder %s5268_s8, %s7682_s21 }
 0x5e5   : > { %p5270_p10 = pnand %p5269_p2, %p8005_p5 }
 0x5e6   : > { %p5275_p3 = por %p5274_p1, %p5273_p0 }
 0x5e7   : > { %p5271_p11 = pneg %p5270_p10 }
 0x5e8   : > { %p5277_p13 = por %p5276_p6, %p5275_p3 }
 0x5ea   : > { %p5278_p8 = pnand %p5277_p13, %p5271_p11 }
 0x5ec   : > { %5281 = shalt.err (!%p5278_p8)
}
 0x5ed   : > { %s5411_s0 = smov 128   ;;  %s5412_s12 = smov 8  }
 0x5ee   : > { %4860 = dma.vmem_to_hbm [thread:$0]  (%p8005_p5), %s7684_s5, 2048, %s7682_s21, %s3483_s23, %s5411_s0, %s5411_s0, %s5412_s12  }
 0x5ef PF: > { %p4905_p4 = scmp.ge.s32.totalorder %s5396_s15, 2  ;;  %s3513_s6 = sand.u32 1, %s5368_s30  }
 0x5f0   : > { %p8006_p9 = scmp.ne.s32.totalorder %s7860_s24, 0  ;;  %s3514_s27 = scalar_lea.sflag [#allocation4], %s3513_s6 }
 0x5f2   : > { %p4889_p12 = pnand %p4905_p4, %p8006_p9 }
 0x5f4   : > { %5351 = dma.done.wait (!%p4889_p12), %s3514_s27, 2048  }
 0x5f5   : > { %5353 = vsyncadd (!%p4889_p12), %s3514_s27, 4294965248  ;;  %s30_s15 = sadd.s32 1, %s5396_s15   ;;  %s8007_s27 = sld [smem:[#allocation25_spill]] }
 0x5f6   : > { %p27_p7 = scmp.ge.s32.totalorder %s30_s15, 6   ;;  %s8008_s22 = sld [smem:[#allocation29_spill]] }
 0x5f7   : > { %s8009_s28 = smov %s5364_s29  ;;  %s8010_s29 = smov %s5777_s3 }
 0x5f8   : > { %s8011_s30 = smov %s5372_s9  ;;  %s8012_s9 = smov %s5376_s10 }
 0x5f9   : > { %s8013_s10 = smov %s5721_s17  ;;  %s8014_s11 = smov %s5388_s13 }
 0x5fa   : > { %s8015_s12 = smov %s5392_s14  ;;  %s8016_s13 = smov %s8019_s20 }
 0x5fb   :  { %29 = sbr.rel (!%p27_p7) target bundleno = 24 (0x18), region = 135 }
 0x5fc   : > { %s8017_s14 = smov %s8008_s22 }
 0x602   :  { %3519 = vsyncpa [#allocation3], 1 }
 0x603   :  { %3521 = vsyncpa [#allocation3 + $0x1], 1 }
 0x604   :  { %3522 = vsyncpa [#allocation6], 1 }
 0x605   :  { %3524 = vsyncpa [#allocation6 + $0x1], 1 }
 0x606   :  { %3525 = vsyncpa [#allocation9], 1 }
 0x607   :  { %3526 = vsyncpa [#allocation12], 1 }
 0x608   :  { %3527 = vsyncpa [#allocation15], 1 }
 0x609   :  { %3528 = vsyncpa [#allocation4], 1 }
 0x60a   :  { %3530 = vsyncpa [#allocation4 + $0x1], 1 }

</bundles_post_ra>
